<compile_context>
chip_gen: v6e
topology: v6e:2x2x1
jax: 0.10.0
libtpu: 0.0.40
codegen_flags: <defaults>
</compile_context>

<pallas_src>
import functools

import jax
import jax.numpy as jnp
from jax.experimental import pallas as pl
from jax.experimental.pallas import tpu as pltpu


def _round_up(v, m):
    return (v + m - 1) // m * m


def _pick_nb(n, per_image_bytes, budget=12 << 20):
    """Images per grid step: divisor of n, keep >= 2 grid steps when possible
    (pipelining + v7x dual TensorCore), stay under a per-step VMEM budget."""
    best = 1
    for cand in range(1, n + 1):
        if n % cand:
            continue
        if n >= 2 and n // cand < 2:
            continue
        if cand * per_image_bytes > budget:
            continue
        best = cand
    return best


def _ricd_kernel(x_ref, w_ref, b_ref, a_ref, o_ref, *, C, P, nb, lpad, Lp,
                 use_roll):
    """One grid step processes nb images laid back-to-back on the lane axis.

    x_ref : (1, C, nb*lpad) f32  flattened pad-2 frames (stride lpad per image)
    w_ref : (25, 2C, C)     f32  fused per-tap weights (conv1 rows 0..C-1,
                                 conv2 rows C..2C-1, zeros outside 3x3 window)
    b_ref : (2C, 1)         f32  fused biases
    a_ref : (2,)            f32  PReLU slopes [alpha1, alpha2] (SMEM)
    o_ref : (1, C, Wc)      f32  lane-dense output slab (wrapper trims)
    """
    Wc = (nb - 1) * lpad + Lp
    a1 = a_ref[0]
    a2 = a_ref[1]

    # Bias folded into the accumulator init (lane broadcast).
    acc = jnp.broadcast_to(b_ref[...], (2 * C, Wc)).astype(jnp.float32)

    for dy in range(5):
        if use_roll:
            # One materialized slab per row offset; dx shifts are XLU rolls.
            slab = x_ref[0, :, dy * P: dy * P + Wc]                 # (C, Wc)
        for dx in range(5):
            if use_roll:
                # Left-shift by dx == circular roll by (Wc - dx); the wrapped
                # tail lanes only feed trimmed pad columns.
                xs = slab if dx == 0 else pltpu.roll(slab, Wc - dx, axis=1)
            else:
                off = dy * P + dx
                xs = x_ref[0, :, off: off + Wc]                     # (C, Wc)
            acc = acc + jnp.dot(w_ref[dy * 5 + dx], xs,
                                preferred_element_type=jnp.float32)

    y1 = acc[:C, :]                  # conv1 + b1
    y2 = acc[C:, :]                  # conv2 + b2
    y1 = jnp.where(y1 >= 0, y1, a1 * y1)   # PReLU (single shared slope)
    y2 = jnp.where(y2 >= 0, y2, a2 * y2)
    o_ref[0] = jax.nn.sigmoid(y1 - y2)


def ricd_forward(x, w1, b1, w2, b2, alpha1, alpha2, *, nb=None, use_roll=True):
    """x: (N, C, H, W) f32 -> sigmoid(PReLU(conv5x5(x)) - PReLU(conv3x3(x)))."""
    N, C, H, W = x.shape
    P = W + 4                               # pad-2 row stride
    L = H * P                               # flat output span per image
    Lp = _round_up(L, 128)                  # lane-padded output span
    flat = (H + 4) * P                      # flat pad-2 frame length
    # Per-image lane stride: every tap read (offset <= 4P+4) of a width-Lp
    # slab must stay inside the image's own (zero-extended) lane region.
    lpad = _round_up(4 * P + 4 + Lp, 128)

    if nb is None:
        nb = _pick_nb(N, per_image_bytes=8 * C * lpad * 4)
    G = N // nb
    Wc = (nb - 1) * lpad + Lp               # per-step slab width (mult of 128)

    # ---- layout plumbing (wrapper side, fused by XLA under jit) -------------
    x_pad = jnp.pad(x.astype(jnp.float32), ((0, 0), (0, 0), (2, 2), (2, 2)))
    x_flat = x_pad.reshape(N, C, flat)
    x_flat = jnp.pad(x_flat, ((0, 0), (0, 0), (0, lpad - flat)))
    x_lanes = jnp.transpose(x_flat.reshape(G, nb, C, lpad), (0, 2, 1, 3))
    x_lanes = x_lanes.reshape(G, C, nb * lpad)

    # Fused per-tap weights: (25, 2C, C); conv2's 3x3 sits at offsets 1..3.
    w1_t = jnp.transpose(w1.astype(jnp.float32), (2, 3, 0, 1))      # (5,5,C,C)
    w2_t = jnp.transpose(w2.astype(jnp.float32), (2, 3, 0, 1))      # (3,3,C,C)
    w_f = jnp.zeros((5, 5, 2 * C, C), jnp.float32)
    w_f = w_f.at[:, :, :C, :].set(w1_t)
    w_f = w_f.at[1:4, 1:4, C:, :].set(w2_t)
    w_f = w_f.reshape(25, 2 * C, C)
    b_f = jnp.concatenate([b1, b2]).reshape(2 * C, 1).astype(jnp.float32)
    alphas = jnp.stack([alpha1.reshape(()), alpha2.reshape(())]).astype(jnp.float32)

    # Explicit scoped-VMEM budget from the block sizes (double-buffered I/O +
    # working set), capped well under v7x's 64 MiB physical VMEM.
    in_b = C * nb * lpad * 4
    out_b = C * Wc * 4
    w_b = (25 * 2 * C * C + 2 * C) * 4
    work_b = 14 * C * Wc * 4
    vmem_limit = int(min(48 << 20,
                         max(8 << 20, 2 * (2 * (in_b + out_b + w_b) + work_b))))

    kernel = functools.partial(_ricd_kernel, C=C, P=P, nb=nb, lpad=lpad, Lp=Lp,
                               use_roll=use_roll)
    smem = pl.BlockSpec(memory_space=pltpu.MemorySpace.SMEM)

    frames = pl.pallas_call(
        kernel,
        out_shape=jax.ShapeDtypeStruct((G, C, Wc), jnp.float32),
        grid=(G,),
        in_specs=[
            pl.BlockSpec((1, C, nb * lpad), lambda g: (g, 0, 0)),   # frames
            pl.BlockSpec((25, 2 * C, C), lambda g: (0, 0, 0)),      # fused taps
            pl.BlockSpec((2 * C, 1), lambda g: (0, 0)),             # fused bias
            smem,                                                   # PReLU slopes
        ],
        out_specs=pl.BlockSpec((1, C, Wc), lambda g: (g, 0, 0)),
        compiler_params=pltpu.CompilerParams(
            dimension_semantics=("parallel",),
            vmem_limit_bytes=vmem_limit),
    )(x_lanes, w_f, b_f, alphas)

    # Trim inter-image gaps and pad columns from the lane-dense slabs.
    cols = [frames[:, :, b * lpad: b * lpad + L] for b in range(nb)]
    y = jnp.stack(cols, axis=1).reshape(N, C, H, P)
    return y[:, :, :, :W]


def ricd_reference(x, w1, b1, w2, b2, alpha1, alpha2):
    """Pure-JAX reference using lax.conv for validation."""
    dn = ("NCHW", "OIHW", "NCHW")
    y1 = jax.lax.conv_general_dilated(x, w1, (1, 1), [(2, 2), (2, 2)],
                                      dimension_numbers=dn) + b1[None, :, None, None]
    y2 = jax.lax.conv_general_dilated(x, w2, (1, 1), [(1, 1), (1, 1)],
                                      dimension_numbers=dn) + b2[None, :, None, None]
    y1 = jnp.where(y1 >= 0, y1, alpha1[0] * y1)
    y2 = jnp.where(y2 >= 0, y2, alpha2[0] * y2)
    return jax.nn.sigmoid(y1 - y2)


if __name__ == "__main__":
    N, C, H, W = 2, 4, 16, 16   # nChannels=C

    key = jax.random.PRNGKey(0)
    kx, k1, k2, kb1, kb2 = jax.random.split(key, 5)

    x = jax.random.normal(kx, (N, C, H, W), dtype=jnp.float32)
    w1 = jax.random.normal(k1, (C, C, 5, 5), dtype=jnp.float32) * 0.1   # conv1.weight
    b1 = jax.random.normal(kb1, (C,), dtype=jnp.float32) * 0.1          # conv1.bias
    w2 = jax.random.normal(k2, (C, C, 3, 3), dtype=jnp.float32) * 0.1   # conv2.weight
    b2 = jax.random.normal(kb2, (C,), dtype=jnp.float32) * 0.1          # conv2.bias
    alpha1 = jnp.array([0.25], dtype=jnp.float32)                       # relu1 (PReLU init)
    alpha2 = jnp.array([0.25], dtype=jnp.float32)                       # relu2 (PReLU init)

    args = (x, w1, b1, w2, b2, alpha1, alpha2)
    try:
        out = jax.block_until_ready(
            jax.jit(functools.partial(ricd_forward, use_roll=True))(*args))
    except Exception:
        # Fallback path: per-tap lane slices instead of XLU rolls.
        out = jax.block_until_ready(
            jax.jit(functools.partial(ricd_forward, use_roll=False))(*args))

    ref = ricd_reference(*args)
    assert out.shape == (N, C, H, W)
    err = float(jnp.max(jnp.abs(out - ref)))
    assert jnp.allclose(out, ref, atol=1e-4), err
    print("KERNEL_OK")
</pallas_src>

<mosaic_0001>
module attributes {stable_mosaic.version = 11 : i64} {
  func.func @_ricd_kernel(%arg0: i32, %arg1: memref<1x4x512xf32, #tpu.memory_space<vmem>>, %arg2: memref<25x8x4xf32, #tpu.memory_space<vmem>>, %arg3: memref<8x1xf32, #tpu.memory_space<vmem>>, %arg4: memref<2xf32, #tpu.memory_space<smem>>, %arg5: memref<1x4x384xf32, #tpu.memory_space<vmem>>) attributes {dimension_semantics = [#tpu.dimension_semantics<parallel>], iteration_bounds = array<i64: 2>, scalar_prefetch = 0 : i64, scratch_operands = 0 : i64, tpu.core_type = #tpu.core_type<tc>, window_params = [{transform_indices = @transform_0, window_bounds = array<i64: 1, 4, 512>}, {pipeline_mode = #tpu.pipeline_mode<synchronous>, transform_indices = @transform_1, window_bounds = array<i64: 25, 8, 4>}, {pipeline_mode = #tpu.pipeline_mode<synchronous>, transform_indices = @transform_2, window_bounds = array<i64: 8, 1>}, {transform_indices = @transform_3, window_bounds = array<i64: 2>}, {transform_indices = @transform_4, window_bounds = array<i64: 1, 4, 384>}]} {
    %c0 = arith.constant 0 : index
    %0 = memref.load %arg4[%c0] : memref<2xf32, #tpu.memory_space<smem>>
    %c1 = arith.constant 1 : index
    %1 = memref.load %arg4[%c1] : memref<2xf32, #tpu.memory_space<smem>>
    %c0_0 = arith.constant 0 : index
    %c0_1 = arith.constant 0 : index
    %2 = vector.load %arg3[%c0_0, %c0_1] : memref<8x1xf32, #tpu.memory_space<vmem>>, vector<8x1xf32>
    %3 = vector.shape_cast %2 : vector<8x1xf32> to vector<8x1xf32>
    %4 = vector.broadcast %3 : vector<8x1xf32> to vector<8x384xf32>
    %c0_2 = arith.constant 0 : index
    %c0_3 = arith.constant 0 : index
    %c0_4 = arith.constant 0 : index
    %5 = vector.load %arg1[%c0_2, %c0_3, %c0_4] : memref<1x4x512xf32, #tpu.memory_space<vmem>>, vector<1x4x384xf32>
    %6 = vector.shape_cast %5 : vector<1x4x384xf32> to vector<4x384xf32>
    %c0_5 = arith.constant 0 : index
    %c0_6 = arith.constant 0 : index
    %c0_7 = arith.constant 0 : index
    %7 = vector.load %arg2[%c0_5, %c0_6, %c0_7] : memref<25x8x4xf32, #tpu.memory_space<vmem>>, vector<1x8x4xf32>
    %8 = vector.shape_cast %7 : vector<1x8x4xf32> to vector<8x4xf32>
    %cst = arith.constant dense<0.000000e+00> : vector<8x384xf32>
    %9 = tpu.matmul %8, %6, %cst {dimension_numbers = #tpu.dot_dimension_numbers<[1], [0], [0], [1], [0, 0, 1, 1], [], []>} : vector<8x4xf32>, vector<4x384xf32>, vector<8x384xf32> -> vector<8x384xf32>
    %10 = arith.addf %4, %9 : vector<8x384xf32>
    %c383_i32 = arith.constant 383 : i32
    %11 = tpu.dynamic_rotate %6 by %c383_i32 dim 1 : vector<4x384xf32>, i32 -> vector<4x384xf32>
    %c1_8 = arith.constant 1 : index
    %c0_9 = arith.constant 0 : index
    %c0_10 = arith.constant 0 : index
    %12 = vector.load %arg2[%c1_8, %c0_9, %c0_10] : memref<25x8x4xf32, #tpu.memory_space<vmem>>, vector<1x8x4xf32>
    %13 = vector.shape_cast %12 : vector<1x8x4xf32> to vector<8x4xf32>
    %cst_11 = arith.constant dense<0.000000e+00> : vector<8x384xf32>
    %14 = tpu.matmul %13, %11, %cst_11 {dimension_numbers = #tpu.dot_dimension_numbers<[1], [0], [0], [1], [0, 0, 1, 1], [], []>} : vector<8x4xf32>, vector<4x384xf32>, vector<8x384xf32> -> vector<8x384xf32>
    %15 = arith.addf %10, %14 : vector<8x384xf32>
    %c382_i32 = arith.constant 382 : i32
    %16 = tpu.dynamic_rotate %6 by %c382_i32 dim 1 : vector<4x384xf32>, i32 -> vector<4x384xf32>
    %c2 = arith.constant 2 : index
    %c0_12 = arith.constant 0 : index
    %c0_13 = arith.constant 0 : index
    %17 = vector.load %arg2[%c2, %c0_12, %c0_13] : memref<25x8x4xf32, #tpu.memory_space<vmem>>, vector<1x8x4xf32>
    %18 = vector.shape_cast %17 : vector<1x8x4xf32> to vector<8x4xf32>
    %cst_14 = arith.constant dense<0.000000e+00> : vector<8x384xf32>
    %19 = tpu.matmul %18, %16, %cst_14 {dimension_numbers = #tpu.dot_dimension_numbers<[1], [0], [0], [1], [0, 0, 1, 1], [], []>} : vector<8x4xf32>, vector<4x384xf32>, vector<8x384xf32> -> vector<8x384xf32>
    %20 = arith.addf %15, %19 : vector<8x384xf32>
    %c381_i32 = arith.constant 381 : i32
    %21 = tpu.dynamic_rotate %6 by %c381_i32 dim 1 : vector<4x384xf32>, i32 -> vector<4x384xf32>
    %c3 = arith.constant 3 : index
    %c0_15 = arith.constant 0 : index
    %c0_16 = arith.constant 0 : index
    %22 = vector.load %arg2[%c3, %c0_15, %c0_16] : memref<25x8x4xf32, #tpu.memory_space<vmem>>, vector<1x8x4xf32>
    %23 = vector.shape_cast %22 : vector<1x8x4xf32> to vector<8x4xf32>
    %cst_17 = arith.constant dense<0.000000e+00> : vector<8x384xf32>
    %24 = tpu.matmul %23, %21, %cst_17 {dimension_numbers = #tpu.dot_dimension_numbers<[1], [0], [0], [1], [0, 0, 1, 1], [], []>} : vector<8x4xf32>, vector<4x384xf32>, vector<8x384xf32> -> vector<8x384xf32>
    %25 = arith.addf %20, %24 : vector<8x384xf32>
    %c380_i32 = arith.constant 380 : i32
    %26 = tpu.dynamic_rotate %6 by %c380_i32 dim 1 : vector<4x384xf32>, i32 -> vector<4x384xf32>
    %c4 = arith.constant 4 : index
    %c0_18 = arith.constant 0 : index
    %c0_19 = arith.constant 0 : index
    %27 = vector.load %arg2[%c4, %c0_18, %c0_19] : memref<25x8x4xf32, #tpu.memory_space<vmem>>, vector<1x8x4xf32>
    %28 = vector.shape_cast %27 : vector<1x8x4xf32> to vector<8x4xf32>
    %cst_20 = arith.constant dense<0.000000e+00> : vector<8x384xf32>
    %29 = tpu.matmul %28, %26, %cst_20 {dimension_numbers = #tpu.dot_dimension_numbers<[1], [0], [0], [1], [0, 0, 1, 1], [], []>} : vector<8x4xf32>, vector<4x384xf32>, vector<8x384xf32> -> vector<8x384xf32>
    %30 = arith.addf %25, %29 : vector<8x384xf32>
    %c0_21 = arith.constant 0 : index
    %c0_22 = arith.constant 0 : index
    %c20 = arith.constant 20 : index
    %31 = vector.load %arg1[%c0_21, %c0_22, %c20] : memref<1x4x512xf32, #tpu.memory_space<vmem>>, vector<1x4x384xf32>
    %32 = vector.shape_cast %31 : vector<1x4x384xf32> to vector<4x384xf32>
    %c5 = arith.constant 5 : index
    %c0_23 = arith.constant 0 : index
    %c0_24 = arith.constant 0 : index
    %33 = vector.load %arg2[%c5, %c0_23, %c0_24] : memref<25x8x4xf32, #tpu.memory_space<vmem>>, vector<1x8x4xf32>
    %34 = vector.shape_cast %33 : vector<1x8x4xf32> to vector<8x4xf32>
    %cst_25 = arith.constant dense<0.000000e+00> : vector<8x384xf32>
    %35 = tpu.matmul %34, %32, %cst_25 {dimension_numbers = #tpu.dot_dimension_numbers<[1], [0], [0], [1], [0, 0, 1, 1], [], []>} : vector<8x4xf32>, vector<4x384xf32>, vector<8x384xf32> -> vector<8x384xf32>
    %36 = arith.addf %30, %35 : vector<8x384xf32>
    %c383_i32_26 = arith.constant 383 : i32
    %37 = tpu.dynamic_rotate %32 by %c383_i32_26 dim 1 : vector<4x384xf32>, i32 -> vector<4x384xf32>
    %c6 = arith.constant 6 : index
    %c0_27 = arith.constant 0 : index
    %c0_28 = arith.constant 0 : index
    %38 = vector.load %arg2[%c6, %c0_27, %c0_28] : memref<25x8x4xf32, #tpu.memory_space<vmem>>, vector<1x8x4xf32>
    %39 = vector.shape_cast %38 : vector<1x8x4xf32> to vector<8x4xf32>
    %cst_29 = arith.constant dense<0.000000e+00> : vector<8x384xf32>
    %40 = tpu.matmul %39, %37, %cst_29 {dimension_numbers = #tpu.dot_dimension_numbers<[1], [0], [0], [1], [0, 0, 1, 1], [], []>} : vector<8x4xf32>, vector<4x384xf32>, vector<8x384xf32> -> vector<8x384xf32>
    %41 = arith.addf %36, %40 : vector<8x384xf32>
    %c382_i32_30 = arith.constant 382 : i32
    %42 = tpu.dynamic_rotate %32 by %c382_i32_30 dim 1 : vector<4x384xf32>, i32 -> vector<4x384xf32>
    %c7 = arith.constant 7 : index
    %c0_31 = arith.constant 0 : index
    %c0_32 = arith.constant 0 : index
    %43 = vector.load %arg2[%c7, %c0_31, %c0_32] : memref<25x8x4xf32, #tpu.memory_space<vmem>>, vector<1x8x4xf32>
    %44 = vector.shape_cast %43 : vector<1x8x4xf32> to vector<8x4xf32>
    %cst_33 = arith.constant dense<0.000000e+00> : vector<8x384xf32>
    %45 = tpu.matmul %44, %42, %cst_33 {dimension_numbers = #tpu.dot_dimension_numbers<[1], [0], [0], [1], [0, 0, 1, 1], [], []>} : vector<8x4xf32>, vector<4x384xf32>, vector<8x384xf32> -> vector<8x384xf32>
    %46 = arith.addf %41, %45 : vector<8x384xf32>
    %c381_i32_34 = arith.constant 381 : i32
    %47 = tpu.dynamic_rotate %32 by %c381_i32_34 dim 1 : vector<4x384xf32>, i32 -> vector<4x384xf32>
    %c8 = arith.constant 8 : index
    %c0_35 = arith.constant 0 : index
    %c0_36 = arith.constant 0 : index
    %48 = vector.load %arg2[%c8, %c0_35, %c0_36] : memref<25x8x4xf32, #tpu.memory_space<vmem>>, vector<1x8x4xf32>
    %49 = vector.shape_cast %48 : vector<1x8x4xf32> to vector<8x4xf32>
    %cst_37 = arith.constant dense<0.000000e+00> : vector<8x384xf32>
    %50 = tpu.matmul %49, %47, %cst_37 {dimension_numbers = #tpu.dot_dimension_numbers<[1], [0], [0], [1], [0, 0, 1, 1], [], []>} : vector<8x4xf32>, vector<4x384xf32>, vector<8x384xf32> -> vector<8x384xf32>
    %51 = arith.addf %46, %50 : vector<8x384xf32>
    %c380_i32_38 = arith.constant 380 : i32
    %52 = tpu.dynamic_rotate %32 by %c380_i32_38 dim 1 : vector<4x384xf32>, i32 -> vector<4x384xf32>
    %c9 = arith.constant 9 : index
    %c0_39 = arith.constant 0 : index
    %c0_40 = arith.constant 0 : index
    %53 = vector.load %arg2[%c9, %c0_39, %c0_40] : memref<25x8x4xf32, #tpu.memory_space<vmem>>, vector<1x8x4xf32>
    %54 = vector.shape_cast %53 : vector<1x8x4xf32> to vector<8x4xf32>
    %cst_41 = arith.constant dense<0.000000e+00> : vector<8x384xf32>
    %55 = tpu.matmul %54, %52, %cst_41 {dimension_numbers = #tpu.dot_dimension_numbers<[1], [0], [0], [1], [0, 0, 1, 1], [], []>} : vector<8x4xf32>, vector<4x384xf32>, vector<8x384xf32> -> vector<8x384xf32>
    %56 = arith.addf %51, %55 : vector<8x384xf32>
    %c0_42 = arith.constant 0 : index
    %c0_43 = arith.constant 0 : index
    %c40 = arith.constant 40 : index
    %57 = vector.load %arg1[%c0_42, %c0_43, %c40] : memref<1x4x512xf32, #tpu.memory_space<vmem>>, vector<1x4x384xf32>
    %58 = vector.shape_cast %57 : vector<1x4x384xf32> to vector<4x384xf32>
    %c10 = arith.constant 10 : index
    %c0_44 = arith.constant 0 : index
    %c0_45 = arith.constant 0 : index
    %59 = vector.load %arg2[%c10, %c0_44, %c0_45] : memref<25x8x4xf32, #tpu.memory_space<vmem>>, vector<1x8x4xf32>
    %60 = vector.shape_cast %59 : vector<1x8x4xf32> to vector<8x4xf32>
    %cst_46 = arith.constant dense<0.000000e+00> : vector<8x384xf32>
    %61 = tpu.matmul %60, %58, %cst_46 {dimension_numbers = #tpu.dot_dimension_numbers<[1], [0], [0], [1], [0, 0, 1, 1], [], []>} : vector<8x4xf32>, vector<4x384xf32>, vector<8x384xf32> -> vector<8x384xf32>
    %62 = arith.addf %56, %61 : vector<8x384xf32>
    %c383_i32_47 = arith.constant 383 : i32
    %63 = tpu.dynamic_rotate %58 by %c383_i32_47 dim 1 : vector<4x384xf32>, i32 -> vector<4x384xf32>
    %c11 = arith.constant 11 : index
    %c0_48 = arith.constant 0 : index
    %c0_49 = arith.constant 0 : index
    %64 = vector.load %arg2[%c11, %c0_48, %c0_49] : memref<25x8x4xf32, #tpu.memory_space<vmem>>, vector<1x8x4xf32>
    %65 = vector.shape_cast %64 : vector<1x8x4xf32> to vector<8x4xf32>
    %cst_50 = arith.constant dense<0.000000e+00> : vector<8x384xf32>
    %66 = tpu.matmul %65, %63, %cst_50 {dimension_numbers = #tpu.dot_dimension_numbers<[1], [0], [0], [1], [0, 0, 1, 1], [], []>} : vector<8x4xf32>, vector<4x384xf32>, vector<8x384xf32> -> vector<8x384xf32>
    %67 = arith.addf %62, %66 : vector<8x384xf32>
    %c382_i32_51 = arith.constant 382 : i32
    %68 = tpu.dynamic_rotate %58 by %c382_i32_51 dim 1 : vector<4x384xf32>, i32 -> vector<4x384xf32>
    %c12 = arith.constant 12 : index
    %c0_52 = arith.constant 0 : index
    %c0_53 = arith.constant 0 : index
    %69 = vector.load %arg2[%c12, %c0_52, %c0_53] : memref<25x8x4xf32, #tpu.memory_space<vmem>>, vector<1x8x4xf32>
    %70 = vector.shape_cast %69 : vector<1x8x4xf32> to vector<8x4xf32>
    %cst_54 = arith.constant dense<0.000000e+00> : vector<8x384xf32>
    %71 = tpu.matmul %70, %68, %cst_54 {dimension_numbers = #tpu.dot_dimension_numbers<[1], [0], [0], [1], [0, 0, 1, 1], [], []>} : vector<8x4xf32>, vector<4x384xf32>, vector<8x384xf32> -> vector<8x384xf32>
    %72 = arith.addf %67, %71 : vector<8x384xf32>
    %c381_i32_55 = arith.constant 381 : i32
    %73 = tpu.dynamic_rotate %58 by %c381_i32_55 dim 1 : vector<4x384xf32>, i32 -> vector<4x384xf32>
    %c13 = arith.constant 13 : index
    %c0_56 = arith.constant 0 : index
    %c0_57 = arith.constant 0 : index
    %74 = vector.load %arg2[%c13, %c0_56, %c0_57] : memref<25x8x4xf32, #tpu.memory_space<vmem>>, vector<1x8x4xf32>
    %75 = vector.shape_cast %74 : vector<1x8x4xf32> to vector<8x4xf32>
    %cst_58 = arith.constant dense<0.000000e+00> : vector<8x384xf32>
    %76 = tpu.matmul %75, %73, %cst_58 {dimension_numbers = #tpu.dot_dimension_numbers<[1], [0], [0], [1], [0, 0, 1, 1], [], []>} : vector<8x4xf32>, vector<4x384xf32>, vector<8x384xf32> -> vector<8x384xf32>
    %77 = arith.addf %72, %76 : vector<8x384xf32>
    %c380_i32_59 = arith.constant 380 : i32
    %78 = tpu.dynamic_rotate %58 by %c380_i32_59 dim 1 : vector<4x384xf32>, i32 -> vector<4x384xf32>
    %c14 = arith.constant 14 : index
    %c0_60 = arith.constant 0 : index
    %c0_61 = arith.constant 0 : index
    %79 = vector.load %arg2[%c14, %c0_60, %c0_61] : memref<25x8x4xf32, #tpu.memory_space<vmem>>, vector<1x8x4xf32>
    %80 = vector.shape_cast %79 : vector<1x8x4xf32> to vector<8x4xf32>
    %cst_62 = arith.constant dense<0.000000e+00> : vector<8x384xf32>
    %81 = tpu.matmul %80, %78, %cst_62 {dimension_numbers = #tpu.dot_dimension_numbers<[1], [0], [0], [1], [0, 0, 1, 1], [], []>} : vector<8x4xf32>, vector<4x384xf32>, vector<8x384xf32> -> vector<8x384xf32>
    %82 = arith.addf %77, %81 : vector<8x384xf32>
    %c0_63 = arith.constant 0 : index
    %c0_64 = arith.constant 0 : index
    %c60 = arith.constant 60 : index
    %83 = vector.load %arg1[%c0_63, %c0_64, %c60] : memref<1x4x512xf32, #tpu.memory_space<vmem>>, vector<1x4x384xf32>
    %84 = vector.shape_cast %83 : vector<1x4x384xf32> to vector<4x384xf32>
    %c15 = arith.constant 15 : index
    %c0_65 = arith.constant 0 : index
    %c0_66 = arith.constant 0 : index
    %85 = vector.load %arg2[%c15, %c0_65, %c0_66] : memref<25x8x4xf32, #tpu.memory_space<vmem>>, vector<1x8x4xf32>
    %86 = vector.shape_cast %85 : vector<1x8x4xf32> to vector<8x4xf32>
    %cst_67 = arith.constant dense<0.000000e+00> : vector<8x384xf32>
    %87 = tpu.matmul %86, %84, %cst_67 {dimension_numbers = #tpu.dot_dimension_numbers<[1], [0], [0], [1], [0, 0, 1, 1], [], []>} : vector<8x4xf32>, vector<4x384xf32>, vector<8x384xf32> -> vector<8x384xf32>
    %88 = arith.addf %82, %87 : vector<8x384xf32>
    %c383_i32_68 = arith.constant 383 : i32
    %89 = tpu.dynamic_rotate %84 by %c383_i32_68 dim 1 : vector<4x384xf32>, i32 -> vector<4x384xf32>
    %c16 = arith.constant 16 : index
    %c0_69 = arith.constant 0 : index
    %c0_70 = arith.constant 0 : index
    %90 = vector.load %arg2[%c16, %c0_69, %c0_70] : memref<25x8x4xf32, #tpu.memory_space<vmem>>, vector<1x8x4xf32>
    %91 = vector.shape_cast %90 : vector<1x8x4xf32> to vector<8x4xf32>
    %cst_71 = arith.constant dense<0.000000e+00> : vector<8x384xf32>
    %92 = tpu.matmul %91, %89, %cst_71 {dimension_numbers = #tpu.dot_dimension_numbers<[1], [0], [0], [1], [0, 0, 1, 1], [], []>} : vector<8x4xf32>, vector<4x384xf32>, vector<8x384xf32> -> vector<8x384xf32>
    %93 = arith.addf %88, %92 : vector<8x384xf32>
    %c382_i32_72 = arith.constant 382 : i32
    %94 = tpu.dynamic_rotate %84 by %c382_i32_72 dim 1 : vector<4x384xf32>, i32 -> vector<4x384xf32>
    %c17 = arith.constant 17 : index
    %c0_73 = arith.constant 0 : index
    %c0_74 = arith.constant 0 : index
    %95 = vector.load %arg2[%c17, %c0_73, %c0_74] : memref<25x8x4xf32, #tpu.memory_space<vmem>>, vector<1x8x4xf32>
    %96 = vector.shape_cast %95 : vector<1x8x4xf32> to vector<8x4xf32>
    %cst_75 = arith.constant dense<0.000000e+00> : vector<8x384xf32>
    %97 = tpu.matmul %96, %94, %cst_75 {dimension_numbers = #tpu.dot_dimension_numbers<[1], [0], [0], [1], [0, 0, 1, 1], [], []>} : vector<8x4xf32>, vector<4x384xf32>, vector<8x384xf32> -> vector<8x384xf32>
    %98 = arith.addf %93, %97 : vector<8x384xf32>
    %c381_i32_76 = arith.constant 381 : i32
    %99 = tpu.dynamic_rotate %84 by %c381_i32_76 dim 1 : vector<4x384xf32>, i32 -> vector<4x384xf32>
    %c18 = arith.constant 18 : index
    %c0_77 = arith.constant 0 : index
    %c0_78 = arith.constant 0 : index
    %100 = vector.load %arg2[%c18, %c0_77, %c0_78] : memref<25x8x4xf32, #tpu.memory_space<vmem>>, vector<1x8x4xf32>
    %101 = vector.shape_cast %100 : vector<1x8x4xf32> to vector<8x4xf32>
    %cst_79 = arith.constant dense<0.000000e+00> : vector<8x384xf32>
    %102 = tpu.matmul %101, %99, %cst_79 {dimension_numbers = #tpu.dot_dimension_numbers<[1], [0], [0], [1], [0, 0, 1, 1], [], []>} : vector<8x4xf32>, vector<4x384xf32>, vector<8x384xf32> -> vector<8x384xf32>
    %103 = arith.addf %98, %102 : vector<8x384xf32>
    %c380_i32_80 = arith.constant 380 : i32
    %104 = tpu.dynamic_rotate %84 by %c380_i32_80 dim 1 : vector<4x384xf32>, i32 -> vector<4x384xf32>
    %c19 = arith.constant 19 : index
    %c0_81 = arith.constant 0 : index
    %c0_82 = arith.constant 0 : index
    %105 = vector.load %arg2[%c19, %c0_81, %c0_82] : memref<25x8x4xf32, #tpu.memory_space<vmem>>, vector<1x8x4xf32>
    %106 = vector.shape_cast %105 : vector<1x8x4xf32> to vector<8x4xf32>
    %cst_83 = arith.constant dense<0.000000e+00> : vector<8x384xf32>
    %107 = tpu.matmul %106, %104, %cst_83 {dimension_numbers = #tpu.dot_dimension_numbers<[1], [0], [0], [1], [0, 0, 1, 1], [], []>} : vector<8x4xf32>, vector<4x384xf32>, vector<8x384xf32> -> vector<8x384xf32>
    %108 = arith.addf %103, %107 : vector<8x384xf32>
    %c0_84 = arith.constant 0 : index
    %c0_85 = arith.constant 0 : index
    %c80 = arith.constant 80 : index
    %109 = vector.load %arg1[%c0_84, %c0_85, %c80] : memref<1x4x512xf32, #tpu.memory_space<vmem>>, vector<1x4x384xf32>
    %110 = vector.shape_cast %109 : vector<1x4x384xf32> to vector<4x384xf32>
    %c20_86 = arith.constant 20 : index
    %c0_87 = arith.constant 0 : index
    %c0_88 = arith.constant 0 : index
    %111 = vector.load %arg2[%c20_86, %c0_87, %c0_88] : memref<25x8x4xf32, #tpu.memory_space<vmem>>, vector<1x8x4xf32>
    %112 = vector.shape_cast %111 : vector<1x8x4xf32> to vector<8x4xf32>
    %cst_89 = arith.constant dense<0.000000e+00> : vector<8x384xf32>
    %113 = tpu.matmul %112, %110, %cst_89 {dimension_numbers = #tpu.dot_dimension_numbers<[1], [0], [0], [1], [0, 0, 1, 1], [], []>} : vector<8x4xf32>, vector<4x384xf32>, vector<8x384xf32> -> vector<8x384xf32>
    %114 = arith.addf %108, %113 : vector<8x384xf32>
    %c383_i32_90 = arith.constant 383 : i32
    %115 = tpu.dynamic_rotate %110 by %c383_i32_90 dim 1 : vector<4x384xf32>, i32 -> vector<4x384xf32>
    %c21 = arith.constant 21 : index
    %c0_91 = arith.constant 0 : index
    %c0_92 = arith.constant 0 : index
    %116 = vector.load %arg2[%c21, %c0_91, %c0_92] : memref<25x8x4xf32, #tpu.memory_space<vmem>>, vector<1x8x4xf32>
    %117 = vector.shape_cast %116 : vector<1x8x4xf32> to vector<8x4xf32>
    %cst_93 = arith.constant dense<0.000000e+00> : vector<8x384xf32>
    %118 = tpu.matmul %117, %115, %cst_93 {dimension_numbers = #tpu.dot_dimension_numbers<[1], [0], [0], [1], [0, 0, 1, 1], [], []>} : vector<8x4xf32>, vector<4x384xf32>, vector<8x384xf32> -> vector<8x384xf32>
    %119 = arith.addf %114, %118 : vector<8x384xf32>
    %c382_i32_94 = arith.constant 382 : i32
    %120 = tpu.dynamic_rotate %110 by %c382_i32_94 dim 1 : vector<4x384xf32>, i32 -> vector<4x384xf32>
    %c22 = arith.constant 22 : index
    %c0_95 = arith.constant 0 : index
    %c0_96 = arith.constant 0 : index
    %121 = vector.load %arg2[%c22, %c0_95, %c0_96] : memref<25x8x4xf32, #tpu.memory_space<vmem>>, vector<1x8x4xf32>
    %122 = vector.shape_cast %121 : vector<1x8x4xf32> to vector<8x4xf32>
    %cst_97 = arith.constant dense<0.000000e+00> : vector<8x384xf32>
    %123 = tpu.matmul %122, %120, %cst_97 {dimension_numbers = #tpu.dot_dimension_numbers<[1], [0], [0], [1], [0, 0, 1, 1], [], []>} : vector<8x4xf32>, vector<4x384xf32>, vector<8x384xf32> -> vector<8x384xf32>
    %124 = arith.addf %119, %123 : vector<8x384xf32>
    %c381_i32_98 = arith.constant 381 : i32
    %125 = tpu.dynamic_rotate %110 by %c381_i32_98 dim 1 : vector<4x384xf32>, i32 -> vector<4x384xf32>
    %c23 = arith.constant 23 : index
    %c0_99 = arith.constant 0 : index
    %c0_100 = arith.constant 0 : index
    %126 = vector.load %arg2[%c23, %c0_99, %c0_100] : memref<25x8x4xf32, #tpu.memory_space<vmem>>, vector<1x8x4xf32>
    %127 = vector.shape_cast %126 : vector<1x8x4xf32> to vector<8x4xf32>
    %cst_101 = arith.constant dense<0.000000e+00> : vector<8x384xf32>
    %128 = tpu.matmul %127, %125, %cst_101 {dimension_numbers = #tpu.dot_dimension_numbers<[1], [0], [0], [1], [0, 0, 1, 1], [], []>} : vector<8x4xf32>, vector<4x384xf32>, vector<8x384xf32> -> vector<8x384xf32>
    %129 = arith.addf %124, %128 : vector<8x384xf32>
    %c380_i32_102 = arith.constant 380 : i32
    %130 = tpu.dynamic_rotate %110 by %c380_i32_102 dim 1 : vector<4x384xf32>, i32 -> vector<4x384xf32>
    %c24 = arith.constant 24 : index
    %c0_103 = arith.constant 0 : index
    %c0_104 = arith.constant 0 : index
    %131 = vector.load %arg2[%c24, %c0_103, %c0_104] : memref<25x8x4xf32, #tpu.memory_space<vmem>>, vector<1x8x4xf32>
    %132 = vector.shape_cast %131 : vector<1x8x4xf32> to vector<8x4xf32>
    %cst_105 = arith.constant dense<0.000000e+00> : vector<8x384xf32>
    %133 = tpu.matmul %132, %130, %cst_105 {dimension_numbers = #tpu.dot_dimension_numbers<[1], [0], [0], [1], [0, 0, 1, 1], [], []>} : vector<8x4xf32>, vector<4x384xf32>, vector<8x384xf32> -> vector<8x384xf32>
    %134 = arith.addf %129, %133 : vector<8x384xf32>
    %135 = vector.extract_strided_slice %134 {offsets = [0, 0], sizes = [4, 384], strides = [1, 1]} : vector<8x384xf32> to vector<4x384xf32>
    %136 = vector.extract_strided_slice %134 {offsets = [4, 0], sizes = [4, 384], strides = [1, 1]} : vector<8x384xf32> to vector<4x384xf32>
    %cst_106 = arith.constant 0.000000e+00 : f32
    %137 = vector.broadcast %cst_106 : f32 to vector<4x384xf32>
    %138 = arith.cmpf oge, %135, %137 : vector<4x384xf32>
    %139 = vector.broadcast %0 : f32 to vector<4x384xf32>
    %140 = arith.mulf %139, %135 : vector<4x384xf32>
    %141 = arith.select %138, %135, %140 : vector<4x384xi1>, vector<4x384xf32>
    %cst_107 = arith.constant 0.000000e+00 : f32
    %142 = vector.broadcast %cst_107 : f32 to vector<4x384xf32>
    %143 = arith.cmpf oge, %136, %142 : vector<4x384xf32>
    %144 = vector.broadcast %1 : f32 to vector<4x384xf32>
    %145 = arith.mulf %144, %136 : vector<4x384xf32>
    %146 = arith.select %143, %136, %145 : vector<4x384xi1>, vector<4x384xf32>
    %147 = arith.subf %141, %146 : vector<4x384xf32>
    %148 = arith.negf %147 : vector<4x384xf32>
    %149 = math.exp %148 : vector<4x384xf32>
    %cst_108 = arith.constant 1.000000e+00 : f32
    %150 = vector.broadcast %cst_108 : f32 to vector<4x384xf32>
    %151 = arith.addf %150, %149 : vector<4x384xf32>
    %152 = arith.divf %150, %151 : vector<4x384xf32>
    %c0_109 = arith.constant 0 : index
    %c0_110 = arith.constant 0 : index
    %c0_111 = arith.constant 0 : index
    %153 = vector.load %arg5[%c0_109, %c0_110, %c0_111] : memref<1x4x384xf32, #tpu.memory_space<vmem>>, vector<1x4x384xf32>
    %154 = vector.shape_cast %153 : vector<1x4x384xf32> to vector<4x384xf32>
    %155 = vector.shape_cast %152 : vector<4x384xf32> to vector<1x4x384xf32>
    tpu.vector_store %arg5[%c0_109, %c0_110, %c0_111], %155 {strides = array<i32>} : memref<1x4x384xf32, #tpu.memory_space<vmem>>, vector<1x4x384xf32>,
    return
  }
  func.func @transform_0(%arg0: i32) -> (i32, i32, i32) {
    %c0_i32 = arith.constant 0 : i32
    %c0_i32_0 = arith.constant 0 : i32
    %c0_i32_1 = arith.constant 0 : i32
    return %arg0, %c0_i32, %c0_i32_0 : i32, i32, i32
  }
  func.func @transform_1(%arg0: i32) -> (i32, i32, i32) {
    %c0_i32 = arith.constant 0 : i32
    %c0_i32_0 = arith.constant 0 : i32
    %c0_i32_1 = arith.constant 0 : i32
    %c0_i32_2 = arith.constant 0 : i32
    return %c0_i32, %c0_i32_0, %c0_i32_1 : i32, i32, i32
  }
  func.func @transform_2(%arg0: i32) -> (i32, i32) {
    %c0_i32 = arith.constant 0 : i32
    %c0_i32_0 = arith.constant 0 : i32
    %c0_i32_1 = arith.constant 0 : i32
    return %c0_i32, %c0_i32_0 : i32, i32
  }
  func.func @transform_3(%arg0: i32) -> i32 {
    %c0_i32 = arith.constant 0 : i32
    %c0_i32_0 = arith.constant 0 : i32
    return %c0_i32 : i32
  }
  func.func @transform_4(%arg0: i32) -> (i32, i32, i32) {
    %c0_i32 = arith.constant 0 : i32
    %c0_i32_0 = arith.constant 0 : i32
    %c0_i32_1 = arith.constant 0 : i32
    return %arg0, %c0_i32, %c0_i32_0 : i32, i32, i32
  }
}

module attributes {stable_mosaic.version = 11 : i64} {
  func.func @_ricd_kernel(%arg0: i32, %arg1: memref<1x4x512xf32, #tpu.memory_space<vmem>>, %arg2: memref<25x8x4xf32, #tpu.memory_space<vmem>>, %arg3: memref<8x1xf32, #tpu.memory_space<vmem>>, %arg4: memref<2xf32, #tpu.memory_space<smem>>, %arg5: memref<1x4x384xf32, #tpu.memory_space<vmem>>) attributes {dimension_semantics = [#tpu.dimension_semantics<parallel>], iteration_bounds = array<i64: 2>, scalar_prefetch = 0 : i64, scratch_operands = 0 : i64, tpu.core_type = #tpu.core_type<tc>, window_params = [{transform_indices = @transform_0, window_bounds = array<i64: 1, 4, 512>}, {pipeline_mode = #tpu.pipeline_mode<synchronous>, transform_indices = @transform_1, window_bounds = array<i64: 25, 8, 4>}, {pipeline_mode = #tpu.pipeline_mode<synchronous>, transform_indices = @transform_2, window_bounds = array<i64: 8, 1>}, {transform_indices = @transform_3, window_bounds = array<i64: 2>}, {transform_indices = @transform_4, window_bounds = array<i64: 1, 4, 384>}]} {
    %c0 = arith.constant 0 : index
    %0 = memref.load %arg4[%c0] : memref<2xf32, #tpu.memory_space<smem>>
    %c1 = arith.constant 1 : index
    %1 = memref.load %arg4[%c1] : memref<2xf32, #tpu.memory_space<smem>>
    %c0_0 = arith.constant 0 : index
    %c0_1 = arith.constant 0 : index
    %2 = vector.load %arg3[%c0_0, %c0_1] : memref<8x1xf32, #tpu.memory_space<vmem>>, vector<8x1xf32>
    %3 = vector.shape_cast %2 : vector<8x1xf32> to vector<8x1xf32>
    %4 = vector.broadcast %3 : vector<8x1xf32> to vector<8x384xf32>
    %c0_2 = arith.constant 0 : index
    %c0_3 = arith.constant 0 : index
    %c0_4 = arith.constant 0 : index
    %5 = vector.load %arg1[%c0_2, %c0_3, %c0_4] : memref<1x4x512xf32, #tpu.memory_space<vmem>>, vector<1x4x384xf32>
    %6 = vector.shape_cast %5 : vector<1x4x384xf32> to vector<4x384xf32>
    %c0_5 = arith.constant 0 : index
    %c0_6 = arith.constant 0 : index
    %c0_7 = arith.constant 0 : index
    %7 = vector.load %arg2[%c0_5, %c0_6, %c0_7] : memref<25x8x4xf32, #tpu.memory_space<vmem>>, vector<1x8x4xf32>
    %8 = vector.shape_cast %7 : vector<1x8x4xf32> to vector<8x4xf32>
    %cst = arith.constant dense<0.000000e+00> : vector<8x384xf32>
    %9 = tpu.matmul %8, %6, %cst {dimension_numbers = #tpu.dot_dimension_numbers<[1], [0], [0], [1], [0, 0, 1, 1], [], []>} : vector<8x4xf32>, vector<4x384xf32>, vector<8x384xf32> -> vector<8x384xf32>
    %10 = arith.addf %4, %9 : vector<8x384xf32>
    %c0_8 = arith.constant 0 : index
    %c0_9 = arith.constant 0 : index
    %c1_10 = arith.constant 1 : index
    %11 = vector.load %arg1[%c0_8, %c0_9, %c1_10] : memref<1x4x512xf32, #tpu.memory_space<vmem>>, vector<1x4x384xf32>
    %12 = vector.shape_cast %11 : vector<1x4x384xf32> to vector<4x384xf32>
    %c1_11 = arith.constant 1 : index
    %c0_12 = arith.constant 0 : index
    %c0_13 = arith.constant 0 : index
    %13 = vector.load %arg2[%c1_11, %c0_12, %c0_13] : memref<25x8x4xf32, #tpu.memory_space<vmem>>, vector<1x8x4xf32>
    %14 = vector.shape_cast %13 : vector<1x8x4xf32> to vector<8x4xf32>
    %cst_14 = arith.constant dense<0.000000e+00> : vector<8x384xf32>
    %15 = tpu.matmul %14, %12, %cst_14 {dimension_numbers = #tpu.dot_dimension_numbers<[1], [0], [0], [1], [0, 0, 1, 1], [], []>} : vector<8x4xf32>, vector<4x384xf32>, vector<8x384xf32> -> vector<8x384xf32>
    %16 = arith.addf %10, %15 : vector<8x384xf32>
    %c0_15 = arith.constant 0 : index
    %c0_16 = arith.constant 0 : index
    %c2 = arith.constant 2 : index
    %17 = vector.load %arg1[%c0_15, %c0_16, %c2] : memref<1x4x512xf32, #tpu.memory_space<vmem>>, vector<1x4x384xf32>
    %18 = vector.shape_cast %17 : vector<1x4x384xf32> to vector<4x384xf32>
    %c2_17 = arith.constant 2 : index
    %c0_18 = arith.constant 0 : index
    %c0_19 = arith.constant 0 : index
    %19 = vector.load %arg2[%c2_17, %c0_18, %c0_19] : memref<25x8x4xf32, #tpu.memory_space<vmem>>, vector<1x8x4xf32>
    %20 = vector.shape_cast %19 : vector<1x8x4xf32> to vector<8x4xf32>
    %cst_20 = arith.constant dense<0.000000e+00> : vector<8x384xf32>
    %21 = tpu.matmul %20, %18, %cst_20 {dimension_numbers = #tpu.dot_dimension_numbers<[1], [0], [0], [1], [0, 0, 1, 1], [], []>} : vector<8x4xf32>, vector<4x384xf32>, vector<8x384xf32> -> vector<8x384xf32>
    %22 = arith.addf %16, %21 : vector<8x384xf32>
    %c0_21 = arith.constant 0 : index
    %c0_22 = arith.constant 0 : index
    %c3 = arith.constant 3 : index
    %23 = vector.load %arg1[%c0_21, %c0_22, %c3] : memref<1x4x512xf32, #tpu.memory_space<vmem>>, vector<1x4x384xf32>
    %24 = vector.shape_cast %23 : vector<1x4x384xf32> to vector<4x384xf32>
    %c3_23 = arith.constant 3 : index
    %c0_24 = arith.constant 0 : index
    %c0_25 = arith.constant 0 : index
    %25 = vector.load %arg2[%c3_23, %c0_24, %c0_25] : memref<25x8x4xf32, #tpu.memory_space<vmem>>, vector<1x8x4xf32>
    %26 = vector.shape_cast %25 : vector<1x8x4xf32> to vector<8x4xf32>
    %cst_26 = arith.constant dense<0.000000e+00> : vector<8x384xf32>
    %27 = tpu.matmul %26, %24, %cst_26 {dimension_numbers = #tpu.dot_dimension_numbers<[1], [0], [0], [1], [0, 0, 1, 1], [], []>} : vector<8x4xf32>, vector<4x384xf32>, vector<8x384xf32> -> vector<8x384xf32>
    %28 = arith.addf %22, %27 : vector<8x384xf32>
    %c0_27 = arith.constant 0 : index
    %c0_28 = arith.constant 0 : index
    %c4 = arith.constant 4 : index
    %29 = vector.load %arg1[%c0_27, %c0_28, %c4] : memref<1x4x512xf32, #tpu.memory_space<vmem>>, vector<1x4x384xf32>
    %30 = vector.shape_cast %29 : vector<1x4x384xf32> to vector<4x384xf32>
    %c4_29 = arith.constant 4 : index
    %c0_30 = arith.constant 0 : index
    %c0_31 = arith.constant 0 : index
    %31 = vector.load %arg2[%c4_29, %c0_30, %c0_31] : memref<25x8x4xf32, #tpu.memory_space<vmem>>, vector<1x8x4xf32>
    %32 = vector.shape_cast %31 : vector<1x8x4xf32> to vector<8x4xf32>
    %cst_32 = arith.constant dense<0.000000e+00> : vector<8x384xf32>
    %33 = tpu.matmul %32, %30, %cst_32 {dimension_numbers = #tpu.dot_dimension_numbers<[1], [0], [0], [1], [0, 0, 1, 1], [], []>} : vector<8x4xf32>, vector<4x384xf32>, vector<8x384xf32> -> vector<8x384xf32>
    %34 = arith.addf %28, %33 : vector<8x384xf32>
    %c0_33 = arith.constant 0 : index
    %c0_34 = arith.constant 0 : index
    %c20 = arith.constant 20 : index
    %35 = vector.load %arg1[%c0_33, %c0_34, %c20] : memref<1x4x512xf32, #tpu.memory_space<vmem>>, vector<1x4x384xf32>
    %36 = vector.shape_cast %35 : vector<1x4x384xf32> to vector<4x384xf32>
    %c5 = arith.constant 5 : index
    %c0_35 = arith.constant 0 : index
    %c0_36 = arith.constant 0 : index
    %37 = vector.load %arg2[%c5, %c0_35, %c0_36] : memref<25x8x4xf32, #tpu.memory_space<vmem>>, vector<1x8x4xf32>
    %38 = vector.shape_cast %37 : vector<1x8x4xf32> to vector<8x4xf32>
    %cst_37 = arith.constant dense<0.000000e+00> : vector<8x384xf32>
    %39 = tpu.matmul %38, %36, %cst_37 {dimension_numbers = #tpu.dot_dimension_numbers<[1], [0], [0], [1], [0, 0, 1, 1], [], []>} : vector<8x4xf32>, vector<4x384xf32>, vector<8x384xf32> -> vector<8x384xf32>
    %40 = arith.addf %34, %39 : vector<8x384xf32>
    %c0_38 = arith.constant 0 : index
    %c0_39 = arith.constant 0 : index
    %c21 = arith.constant 21 : index
    %41 = vector.load %arg1[%c0_38, %c0_39, %c21] : memref<1x4x512xf32, #tpu.memory_space<vmem>>, vector<1x4x384xf32>
    %42 = vector.shape_cast %41 : vector<1x4x384xf32> to vector<4x384xf32>
    %c6 = arith.constant 6 : index
    %c0_40 = arith.constant 0 : index
    %c0_41 = arith.constant 0 : index
    %43 = vector.load %arg2[%c6, %c0_40, %c0_41] : memref<25x8x4xf32, #tpu.memory_space<vmem>>, vector<1x8x4xf32>
    %44 = vector.shape_cast %43 : vector<1x8x4xf32> to vector<8x4xf32>
    %cst_42 = arith.constant dense<0.000000e+00> : vector<8x384xf32>
    %45 = tpu.matmul %44, %42, %cst_42 {dimension_numbers = #tpu.dot_dimension_numbers<[1], [0], [0], [1], [0, 0, 1, 1], [], []>} : vector<8x4xf32>, vector<4x384xf32>, vector<8x384xf32> -> vector<8x384xf32>
    %46 = arith.addf %40, %45 : vector<8x384xf32>
    %c0_43 = arith.constant 0 : index
    %c0_44 = arith.constant 0 : index
    %c22 = arith.constant 22 : index
    %47 = vector.load %arg1[%c0_43, %c0_44, %c22] : memref<1x4x512xf32, #tpu.memory_space<vmem>>, vector<1x4x384xf32>
    %48 = vector.shape_cast %47 : vector<1x4x384xf32> to vector<4x384xf32>
    %c7 = arith.constant 7 : index
    %c0_45 = arith.constant 0 : index
    %c0_46 = arith.constant 0 : index
    %49 = vector.load %arg2[%c7, %c0_45, %c0_46] : memref<25x8x4xf32, #tpu.memory_space<vmem>>, vector<1x8x4xf32>
    %50 = vector.shape_cast %49 : vector<1x8x4xf32> to vector<8x4xf32>
    %cst_47 = arith.constant dense<0.000000e+00> : vector<8x384xf32>
    %51 = tpu.matmul %50, %48, %cst_47 {dimension_numbers = #tpu.dot_dimension_numbers<[1], [0], [0], [1], [0, 0, 1, 1], [], []>} : vector<8x4xf32>, vector<4x384xf32>, vector<8x384xf32> -> vector<8x384xf32>
    %52 = arith.addf %46, %51 : vector<8x384xf32>
    %c0_48 = arith.constant 0 : index
    %c0_49 = arith.constant 0 : index
    %c23 = arith.constant 23 : index
    %53 = vector.load %arg1[%c0_48, %c0_49, %c23] : memref<1x4x512xf32, #tpu.memory_space<vmem>>, vector<1x4x384xf32>
    %54 = vector.shape_cast %53 : vector<1x4x384xf32> to vector<4x384xf32>
    %c8 = arith.constant 8 : index
    %c0_50 = arith.constant 0 : index
    %c0_51 = arith.constant 0 : index
    %55 = vector.load %arg2[%c8, %c0_50, %c0_51] : memref<25x8x4xf32, #tpu.memory_space<vmem>>, vector<1x8x4xf32>
    %56 = vector.shape_cast %55 : vector<1x8x4xf32> to vector<8x4xf32>
    %cst_52 = arith.constant dense<0.000000e+00> : vector<8x384xf32>
    %57 = tpu.matmul %56, %54, %cst_52 {dimension_numbers = #tpu.dot_dimension_numbers<[1], [0], [0], [1], [0, 0, 1, 1], [], []>} : vector<8x4xf32>, vector<4x384xf32>, vector<8x384xf32> -> vector<8x384xf32>
    %58 = arith.addf %52, %57 : vector<8x384xf32>
    %c0_53 = arith.constant 0 : index
    %c0_54 = arith.constant 0 : index
    %c24 = arith.constant 24 : index
    %59 = vector.load %arg1[%c0_53, %c0_54, %c24] : memref<1x4x512xf32, #tpu.memory_space<vmem>>, vector<1x4x384xf32>
    %60 = vector.shape_cast %59 : vector<1x4x384xf32> to vector<4x384xf32>
    %c9 = arith.constant 9 : index
    %c0_55 = arith.constant 0 : index
    %c0_56 = arith.constant 0 : index
    %61 = vector.load %arg2[%c9, %c0_55, %c0_56] : memref<25x8x4xf32, #tpu.memory_space<vmem>>, vector<1x8x4xf32>
    %62 = vector.shape_cast %61 : vector<1x8x4xf32> to vector<8x4xf32>
    %cst_57 = arith.constant dense<0.000000e+00> : vector<8x384xf32>
    %63 = tpu.matmul %62, %60, %cst_57 {dimension_numbers = #tpu.dot_dimension_numbers<[1], [0], [0], [1], [0, 0, 1, 1], [], []>} : vector<8x4xf32>, vector<4x384xf32>, vector<8x384xf32> -> vector<8x384xf32>
    %64 = arith.addf %58, %63 : vector<8x384xf32>
    %c0_58 = arith.constant 0 : index
    %c0_59 = arith.constant 0 : index
    %c40 = arith.constant 40 : index
    %65 = vector.load %arg1[%c0_58, %c0_59, %c40] : memref<1x4x512xf32, #tpu.memory_space<vmem>>, vector<1x4x384xf32>
    %66 = vector.shape_cast %65 : vector<1x4x384xf32> to vector<4x384xf32>
    %c10 = arith.constant 10 : index
    %c0_60 = arith.constant 0 : index
    %c0_61 = arith.constant 0 : index
    %67 = vector.load %arg2[%c10, %c0_60, %c0_61] : memref<25x8x4xf32, #tpu.memory_space<vmem>>, vector<1x8x4xf32>
    %68 = vector.shape_cast %67 : vector<1x8x4xf32> to vector<8x4xf32>
    %cst_62 = arith.constant dense<0.000000e+00> : vector<8x384xf32>
    %69 = tpu.matmul %68, %66, %cst_62 {dimension_numbers = #tpu.dot_dimension_numbers<[1], [0], [0], [1], [0, 0, 1, 1], [], []>} : vector<8x4xf32>, vector<4x384xf32>, vector<8x384xf32> -> vector<8x384xf32>
    %70 = arith.addf %64, %69 : vector<8x384xf32>
    %c0_63 = arith.constant 0 : index
    %c0_64 = arith.constant 0 : index
    %c41 = arith.constant 41 : index
    %71 = vector.load %arg1[%c0_63, %c0_64, %c41] : memref<1x4x512xf32, #tpu.memory_space<vmem>>, vector<1x4x384xf32>
    %72 = vector.shape_cast %71 : vector<1x4x384xf32> to vector<4x384xf32>
    %c11 = arith.constant 11 : index
    %c0_65 = arith.constant 0 : index
    %c0_66 = arith.constant 0 : index
    %73 = vector.load %arg2[%c11, %c0_65, %c0_66] : memref<25x8x4xf32, #tpu.memory_space<vmem>>, vector<1x8x4xf32>
    %74 = vector.shape_cast %73 : vector<1x8x4xf32> to vector<8x4xf32>
    %cst_67 = arith.constant dense<0.000000e+00> : vector<8x384xf32>
    %75 = tpu.matmul %74, %72, %cst_67 {dimension_numbers = #tpu.dot_dimension_numbers<[1], [0], [0], [1], [0, 0, 1, 1], [], []>} : vector<8x4xf32>, vector<4x384xf32>, vector<8x384xf32> -> vector<8x384xf32>
    %76 = arith.addf %70, %75 : vector<8x384xf32>
    %c0_68 = arith.constant 0 : index
    %c0_69 = arith.constant 0 : index
    %c42 = arith.constant 42 : index
    %77 = vector.load %arg1[%c0_68, %c0_69, %c42] : memref<1x4x512xf32, #tpu.memory_space<vmem>>, vector<1x4x384xf32>
    %78 = vector.shape_cast %77 : vector<1x4x384xf32> to vector<4x384xf32>
    %c12 = arith.constant 12 : index
    %c0_70 = arith.constant 0 : index
    %c0_71 = arith.constant 0 : index
    %79 = vector.load %arg2[%c12, %c0_70, %c0_71] : memref<25x8x4xf32, #tpu.memory_space<vmem>>, vector<1x8x4xf32>
    %80 = vector.shape_cast %79 : vector<1x8x4xf32> to vector<8x4xf32>
    %cst_72 = arith.constant dense<0.000000e+00> : vector<8x384xf32>
    %81 = tpu.matmul %80, %78, %cst_72 {dimension_numbers = #tpu.dot_dimension_numbers<[1], [0], [0], [1], [0, 0, 1, 1], [], []>} : vector<8x4xf32>, vector<4x384xf32>, vector<8x384xf32> -> vector<8x384xf32>
    %82 = arith.addf %76, %81 : vector<8x384xf32>
    %c0_73 = arith.constant 0 : index
    %c0_74 = arith.constant 0 : index
    %c43 = arith.constant 43 : index
    %83 = vector.load %arg1[%c0_73, %c0_74, %c43] : memref<1x4x512xf32, #tpu.memory_space<vmem>>, vector<1x4x384xf32>
    %84 = vector.shape_cast %83 : vector<1x4x384xf32> to vector<4x384xf32>
    %c13 = arith.constant 13 : index
    %c0_75 = arith.constant 0 : index
    %c0_76 = arith.constant 0 : index
    %85 = vector.load %arg2[%c13, %c0_75, %c0_76] : memref<25x8x4xf32, #tpu.memory_space<vmem>>, vector<1x8x4xf32>
    %86 = vector.shape_cast %85 : vector<1x8x4xf32> to vector<8x4xf32>
    %cst_77 = arith.constant dense<0.000000e+00> : vector<8x384xf32>
    %87 = tpu.matmul %86, %84, %cst_77 {dimension_numbers = #tpu.dot_dimension_numbers<[1], [0], [0], [1], [0, 0, 1, 1], [], []>} : vector<8x4xf32>, vector<4x384xf32>, vector<8x384xf32> -> vector<8x384xf32>
    %88 = arith.addf %82, %87 : vector<8x384xf32>
    %c0_78 = arith.constant 0 : index
    %c0_79 = arith.constant 0 : index
    %c44 = arith.constant 44 : index
    %89 = vector.load %arg1[%c0_78, %c0_79, %c44] : memref<1x4x512xf32, #tpu.memory_space<vmem>>, vector<1x4x384xf32>
    %90 = vector.shape_cast %89 : vector<1x4x384xf32> to vector<4x384xf32>
    %c14 = arith.constant 14 : index
    %c0_80 = arith.constant 0 : index
    %c0_81 = arith.constant 0 : index
    %91 = vector.load %arg2[%c14, %c0_80, %c0_81] : memref<25x8x4xf32, #tpu.memory_space<vmem>>, vector<1x8x4xf32>
    %92 = vector.shape_cast %91 : vector<1x8x4xf32> to vector<8x4xf32>
    %cst_82 = arith.constant dense<0.000000e+00> : vector<8x384xf32>
    %93 = tpu.matmul %92, %90, %cst_82 {dimension_numbers = #tpu.dot_dimension_numbers<[1], [0], [0], [1], [0, 0, 1, 1], [], []>} : vector<8x4xf32>, vector<4x384xf32>, vector<8x384xf32> -> vector<8x384xf32>
    %94 = arith.addf %88, %93 : vector<8x384xf32>
    %c0_83 = arith.constant 0 : index
    %c0_84 = arith.constant 0 : index
    %c60 = arith.constant 60 : index
    %95 = vector.load %arg1[%c0_83, %c0_84, %c60] : memref<1x4x512xf32, #tpu.memory_space<vmem>>, vector<1x4x384xf32>
    %96 = vector.shape_cast %95 : vector<1x4x384xf32> to vector<4x384xf32>
    %c15 = arith.constant 15 : index
    %c0_85 = arith.constant 0 : index
    %c0_86 = arith.constant 0 : index
    %97 = vector.load %arg2[%c15, %c0_85, %c0_86] : memref<25x8x4xf32, #tpu.memory_space<vmem>>, vector<1x8x4xf32>
    %98 = vector.shape_cast %97 : vector<1x8x4xf32> to vector<8x4xf32>
    %cst_87 = arith.constant dense<0.000000e+00> : vector<8x384xf32>
    %99 = tpu.matmul %98, %96, %cst_87 {dimension_numbers = #tpu.dot_dimension_numbers<[1], [0], [0], [1], [0, 0, 1, 1], [], []>} : vector<8x4xf32>, vector<4x384xf32>, vector<8x384xf32> -> vector<8x384xf32>
    %100 = arith.addf %94, %99 : vector<8x384xf32>
    %c0_88 = arith.constant 0 : index
    %c0_89 = arith.constant 0 : index
    %c61 = arith.constant 61 : index
    %101 = vector.load %arg1[%c0_88, %c0_89, %c61] : memref<1x4x512xf32, #tpu.memory_space<vmem>>, vector<1x4x384xf32>
    %102 = vector.shape_cast %101 : vector<1x4x384xf32> to vector<4x384xf32>
    %c16 = arith.constant 16 : index
    %c0_90 = arith.constant 0 : index
    %c0_91 = arith.constant 0 : index
    %103 = vector.load %arg2[%c16, %c0_90, %c0_91] : memref<25x8x4xf32, #tpu.memory_space<vmem>>, vector<1x8x4xf32>
    %104 = vector.shape_cast %103 : vector<1x8x4xf32> to vector<8x4xf32>
    %cst_92 = arith.constant dense<0.000000e+00> : vector<8x384xf32>
    %105 = tpu.matmul %104, %102, %cst_92 {dimension_numbers = #tpu.dot_dimension_numbers<[1], [0], [0], [1], [0, 0, 1, 1], [], []>} : vector<8x4xf32>, vector<4x384xf32>, vector<8x384xf32> -> vector<8x384xf32>
    %106 = arith.addf %100, %105 : vector<8x384xf32>
    %c0_93 = arith.constant 0 : index
    %c0_94 = arith.constant 0 : index
    %c62 = arith.constant 62 : index
    %107 = vector.load %arg1[%c0_93, %c0_94, %c62] : memref<1x4x512xf32, #tpu.memory_space<vmem>>, vector<1x4x384xf32>
    %108 = vector.shape_cast %107 : vector<1x4x384xf32> to vector<4x384xf32>
    %c17 = arith.constant 17 : index
    %c0_95 = arith.constant 0 : index
    %c0_96 = arith.constant 0 : index
    %109 = vector.load %arg2[%c17, %c0_95, %c0_96] : memref<25x8x4xf32, #tpu.memory_space<vmem>>, vector<1x8x4xf32>
    %110 = vector.shape_cast %109 : vector<1x8x4xf32> to vector<8x4xf32>
    %cst_97 = arith.constant dense<0.000000e+00> : vector<8x384xf32>
    %111 = tpu.matmul %110, %108, %cst_97 {dimension_numbers = #tpu.dot_dimension_numbers<[1], [0], [0], [1], [0, 0, 1, 1], [], []>} : vector<8x4xf32>, vector<4x384xf32>, vector<8x384xf32> -> vector<8x384xf32>
    %112 = arith.addf %106, %111 : vector<8x384xf32>
    %c0_98 = arith.constant 0 : index
    %c0_99 = arith.constant 0 : index
    %c63 = arith.constant 63 : index
    %113 = vector.load %arg1[%c0_98, %c0_99, %c63] : memref<1x4x512xf32, #tpu.memory_space<vmem>>, vector<1x4x384xf32>
    %114 = vector.shape_cast %113 : vector<1x4x384xf32> to vector<4x384xf32>
    %c18 = arith.constant 18 : index
    %c0_100 = arith.constant 0 : index
    %c0_101 = arith.constant 0 : index
    %115 = vector.load %arg2[%c18, %c0_100, %c0_101] : memref<25x8x4xf32, #tpu.memory_space<vmem>>, vector<1x8x4xf32>
    %116 = vector.shape_cast %115 : vector<1x8x4xf32> to vector<8x4xf32>
    %cst_102 = arith.constant dense<0.000000e+00> : vector<8x384xf32>
    %117 = tpu.matmul %116, %114, %cst_102 {dimension_numbers = #tpu.dot_dimension_numbers<[1], [0], [0], [1], [0, 0, 1, 1], [], []>} : vector<8x4xf32>, vector<4x384xf32>, vector<8x384xf32> -> vector<8x384xf32>
    %118 = arith.addf %112, %117 : vector<8x384xf32>
    %c0_103 = arith.constant 0 : index
    %c0_104 = arith.constant 0 : index
    %c64 = arith.constant 64 : index
    %119 = vector.load %arg1[%c0_103, %c0_104, %c64] : memref<1x4x512xf32, #tpu.memory_space<vmem>>, vector<1x4x384xf32>
    %120 = vector.shape_cast %119 : vector<1x4x384xf32> to vector<4x384xf32>
    %c19 = arith.constant 19 : index
    %c0_105 = arith.constant 0 : index
    %c0_106 = arith.constant 0 : index
    %121 = vector.load %arg2[%c19, %c0_105, %c0_106] : memref<25x8x4xf32, #tpu.memory_space<vmem>>, vector<1x8x4xf32>
    %122 = vector.shape_cast %121 : vector<1x8x4xf32> to vector<8x4xf32>
    %cst_107 = arith.constant dense<0.000000e+00> : vector<8x384xf32>
    %123 = tpu.matmul %122, %120, %cst_107 {dimension_numbers = #tpu.dot_dimension_numbers<[1], [0], [0], [1], [0, 0, 1, 1], [], []>} : vector<8x4xf32>, vector<4x384xf32>, vector<8x384xf32> -> vector<8x384xf32>
    %124 = arith.addf %118, %123 : vector<8x384xf32>
    %c0_108 = arith.constant 0 : index
    %c0_109 = arith.constant 0 : index
    %c80 = arith.constant 80 : index
    %125 = vector.load %arg1[%c0_108, %c0_109, %c80] : memref<1x4x512xf32, #tpu.memory_space<vmem>>, vector<1x4x384xf32>
    %126 = vector.shape_cast %125 : vector<1x4x384xf32> to vector<4x384xf32>
    %c20_110 = arith.constant 20 : index
    %c0_111 = arith.constant 0 : index
    %c0_112 = arith.constant 0 : index
    %127 = vector.load %arg2[%c20_110, %c0_111, %c0_112] : memref<25x8x4xf32, #tpu.memory_space<vmem>>, vector<1x8x4xf32>
    %128 = vector.shape_cast %127 : vector<1x8x4xf32> to vector<8x4xf32>
    %cst_113 = arith.constant dense<0.000000e+00> : vector<8x384xf32>
    %129 = tpu.matmul %128, %126, %cst_113 {dimension_numbers = #tpu.dot_dimension_numbers<[1], [0], [0], [1], [0, 0, 1, 1], [], []>} : vector<8x4xf32>, vector<4x384xf32>, vector<8x384xf32> -> vector<8x384xf32>
    %130 = arith.addf %124, %129 : vector<8x384xf32>
    %c0_114 = arith.constant 0 : index
    %c0_115 = arith.constant 0 : index
    %c81 = arith.constant 81 : index
    %131 = vector.load %arg1[%c0_114, %c0_115, %c81] : memref<1x4x512xf32, #tpu.memory_space<vmem>>, vector<1x4x384xf32>
    %132 = vector.shape_cast %131 : vector<1x4x384xf32> to vector<4x384xf32>
    %c21_116 = arith.constant 21 : index
    %c0_117 = arith.constant 0 : index
    %c0_118 = arith.constant 0 : index
    %133 = vector.load %arg2[%c21_116, %c0_117, %c0_118] : memref<25x8x4xf32, #tpu.memory_space<vmem>>, vector<1x8x4xf32>
    %134 = vector.shape_cast %133 : vector<1x8x4xf32> to vector<8x4xf32>
    %cst_119 = arith.constant dense<0.000000e+00> : vector<8x384xf32>
    %135 = tpu.matmul %134, %132, %cst_119 {dimension_numbers = #tpu.dot_dimension_numbers<[1], [0], [0], [1], [0, 0, 1, 1], [], []>} : vector<8x4xf32>, vector<4x384xf32>, vector<8x384xf32> -> vector<8x384xf32>
    %136 = arith.addf %130, %135 : vector<8x384xf32>
    %c0_120 = arith.constant 0 : index
    %c0_121 = arith.constant 0 : index
    %c82 = arith.constant 82 : index
    %137 = vector.load %arg1[%c0_120, %c0_121, %c82] : memref<1x4x512xf32, #tpu.memory_space<vmem>>, vector<1x4x384xf32>
    %138 = vector.shape_cast %137 : vector<1x4x384xf32> to vector<4x384xf32>
    %c22_122 = arith.constant 22 : index
    %c0_123 = arith.constant 0 : index
    %c0_124 = arith.constant 0 : index
    %139 = vector.load %arg2[%c22_122, %c0_123, %c0_124] : memref<25x8x4xf32, #tpu.memory_space<vmem>>, vector<1x8x4xf32>
    %140 = vector.shape_cast %139 : vector<1x8x4xf32> to vector<8x4xf32>
    %cst_125 = arith.constant dense<0.000000e+00> : vector<8x384xf32>
    %141 = tpu.matmul %140, %138, %cst_125 {dimension_numbers = #tpu.dot_dimension_numbers<[1], [0], [0], [1], [0, 0, 1, 1], [], []>} : vector<8x4xf32>, vector<4x384xf32>, vector<8x384xf32> -> vector<8x384xf32>
    %142 = arith.addf %136, %141 : vector<8x384xf32>
    %c0_126 = arith.constant 0 : index
    %c0_127 = arith.constant 0 : index
    %c83 = arith.constant 83 : index
    %143 = vector.load %arg1[%c0_126, %c0_127, %c83] : memref<1x4x512xf32, #tpu.memory_space<vmem>>, vector<1x4x384xf32>
    %144 = vector.shape_cast %143 : vector<1x4x384xf32> to vector<4x384xf32>
    %c23_128 = arith.constant 23 : index
    %c0_129 = arith.constant 0 : index
    %c0_130 = arith.constant 0 : index
    %145 = vector.load %arg2[%c23_128, %c0_129, %c0_130] : memref<25x8x4xf32, #tpu.memory_space<vmem>>, vector<1x8x4xf32>
    %146 = vector.shape_cast %145 : vector<1x8x4xf32> to vector<8x4xf32>
    %cst_131 = arith.constant dense<0.000000e+00> : vector<8x384xf32>
    %147 = tpu.matmul %146, %144, %cst_131 {dimension_numbers = #tpu.dot_dimension_numbers<[1], [0], [0], [1], [0, 0, 1, 1], [], []>} : vector<8x4xf32>, vector<4x384xf32>, vector<8x384xf32> -> vector<8x384xf32>
    %148 = arith.addf %142, %147 : vector<8x384xf32>
    %c0_132 = arith.constant 0 : index
    %c0_133 = arith.constant 0 : index
    %c84 = arith.constant 84 : index
    %149 = vector.load %arg1[%c0_132, %c0_133, %c84] : memref<1x4x512xf32, #tpu.memory_space<vmem>>, vector<1x4x384xf32>
    %150 = vector.shape_cast %149 : vector<1x4x384xf32> to vector<4x384xf32>
    %c24_134 = arith.constant 24 : index
    %c0_135 = arith.constant 0 : index
    %c0_136 = arith.constant 0 : index
    %151 = vector.load %arg2[%c24_134, %c0_135, %c0_136] : memref<25x8x4xf32, #tpu.memory_space<vmem>>, vector<1x8x4xf32>
    %152 = vector.shape_cast %151 : vector<1x8x4xf32> to vector<8x4xf32>
    %cst_137 = arith.constant dense<0.000000e+00> : vector<8x384xf32>
    %153 = tpu.matmul %152, %150, %cst_137 {dimension_numbers = #tpu.dot_dimension_numbers<[1], [0], [0], [1], [0, 0, 1, 1], [], []>} : vector<8x4xf32>, vector<4x384xf32>, vector<8x384xf32> -> vector<8x384xf32>
    %154 = arith.addf %148, %153 : vector<8x384xf32>
    %155 = vector.extract_strided_slice %154 {offsets = [0, 0], sizes = [4, 384], strides = [1, 1]} : vector<8x384xf32> to vector<4x384xf32>
    %156 = vector.extract_strided_slice %154 {offsets = [4, 0], sizes = [4, 384], strides = [1, 1]} : vector<8x384xf32> to vector<4x384xf32>
    %cst_138 = arith.constant 0.000000e+00 : f32
    %157 = vector.broadcast %cst_138 : f32 to vector<4x384xf32>
    %158 = arith.cmpf oge, %155, %157 : vector<4x384xf32>
    %159 = vector.broadcast %0 : f32 to vector<4x384xf32>
    %160 = arith.mulf %159, %155 : vector<4x384xf32>
    %161 = arith.select %158, %155, %160 : vector<4x384xi1>, vector<4x384xf32>
    %cst_139 = arith.constant 0.000000e+00 : f32
    %162 = vector.broadcast %cst_139 : f32 to vector<4x384xf32>
    %163 = arith.cmpf oge, %156, %162 : vector<4x384xf32>
    %164 = vector.broadcast %1 : f32 to vector<4x384xf32>
    %165 = arith.mulf %164, %156 : vector<4x384xf32>
    %166 = arith.select %163, %156, %165 : vector<4x384xi1>, vector<4x384xf32>
    %167 = arith.subf %161, %166 : vector<4x384xf32>
    %168 = arith.negf %167 : vector<4x384xf32>
    %169 = math.exp %168 : vector<4x384xf32>
    %cst_140 = arith.constant 1.000000e+00 : f32
    %170 = vector.broadcast %cst_140 : f32 to vector<4x384xf32>
    %171 = arith.addf %170, %169 : vector<4x384xf32>
    %172 = arith.divf %170, %171 : vector<4x384xf32>
    %c0_141 = arith.constant 0 : index
    %c0_142 = arith.constant 0 : index
    %c0_143 = arith.constant 0 : index
    %173 = vector.load %arg5[%c0_141, %c0_142, %c0_143] : memref<1x4x384xf32, #tpu.memory_space<vmem>>, vector<1x4x384xf32>
    %174 = vector.shape_cast %173 : vector<1x4x384xf32> to vector<4x384xf32>
    %175 = vector.shape_cast %172 : vector<4x384xf32> to vector<1x4x384xf32>
    tpu.vector_store %arg5[%c0_141, %c0_142, %c0_143], %175 {strides = array<i32>} : memref<1x4x384xf32, #tpu.memory_space<vmem>>, vector<1x4x384xf32>,
    return
  }
  func.func @transform_0(%arg0: i32) -> (i32, i32, i32) {
    %c0_i32 = arith.constant 0 : i32
    %c0_i32_0 = arith.constant 0 : i32
    %c0_i32_1 = arith.constant 0 : i32
    return %arg0, %c0_i32, %c0_i32_0 : i32, i32, i32
  }
  func.func @transform_1(%arg0: i32) -> (i32, i32, i32) {
    %c0_i32 = arith.constant 0 : i32
    %c0_i32_0 = arith.constant 0 : i32
    %c0_i32_1 = arith.constant 0 : i32
    %c0_i32_2 = arith.constant 0 : i32
    return %c0_i32, %c0_i32_0, %c0_i32_1 : i32, i32, i32
  }
  func.func @transform_2(%arg0: i32) -> (i32, i32) {
    %c0_i32 = arith.constant 0 : i32
    %c0_i32_0 = arith.constant 0 : i32
    %c0_i32_1 = arith.constant 0 : i32
    return %c0_i32, %c0_i32_0 : i32, i32
  }
  func.func @transform_3(%arg0: i32) -> i32 {
    %c0_i32 = arith.constant 0 : i32
    %c0_i32_0 = arith.constant 0 : i32
    return %c0_i32 : i32
  }
  func.func @transform_4(%arg0: i32) -> (i32, i32, i32) {
    %c0_i32 = arith.constant 0 : i32
    %c0_i32_0 = arith.constant 0 : i32
    %c0_i32_1 = arith.constant 0 : i32
    return %arg0, %c0_i32, %c0_i32_0 : i32, i32, i32
  }
}

</mosaic_0001>

<bundles_post_ra>
// kernel: ricd_forward.1
= control target key start
LH: loop header
LB: loop body
LE: loop exit
PB: predicated region body
PF: predicated region fallthrough
CT: control target
= control target key end

     0   :  { %9 = vsyncpa [#allocation3], 0  ;;  %s5003_s15 = smov 0   ;;  %s5631_s0 = inlined_call_operand.vmem [shape: f32[2,4,512], index: 0, kind: input, shape index: {}]   ;;  %s5632_s1 = inlined_call_operand.vmem [shape: f32[25,8,4], index: 1, kind: input, shape index: {}]   ;;  %s5633_s2 = inlined_call_operand.vmem [shape: f32[8,1], index: 2, kind: input, shape index: {}]   ;;  %s5634_s3 = inlined_call_operand.vmem [shape: f32[2], index: 3, kind: input, shape index: {}]   ;;  %s5635_s4 = inlined_call_operand.vmem [shape: f32[2,4,384], index: 4, kind: output, shape index: {}]  }
   0x1 LB: > { %s4552_s16 = sadd.s32 4294967295, %s4964_s15   ;;  %p4554_p0 = scmp.ge.s32.totalorder %s4964_s15, 1  ;;  %s4964_s15 = sphi %s5003_s15, %s15_s15  }
   0x2   : > { %p135_p1 = scmp.lt.s32.totalorder %s4964_s15, 3  ;;  %s154_s19 = sshll.u32 %s5634_s3, 4  ;;  %s155_s19 = int_to_ptr.vmem [resolvable:$true] %s154_s19 }
   0x3   : > { %p4902_p3 = scmp.eq.s32.totalorder %s4552_s16, 0  ;;  %s4939_s21 = scalar_lea.vmem %s155_s19, 16 }
   0x4   : > { %p5014_p2 = pnand %p4554_p0, %p135_p1  ;;  %p4940_p6 = scmp.ne.s32.totalorder %s155_s19, %s4939_s21 }
   0x5   : > { %p4947_p10 = scmp.lt.s32.totalorder %s155_s19, %s155_s19  ;;  %p4948_p11 = scmp.lt.s32.totalorder %s4939_s21, %s4939_s21 }
   0x6   : > { %p4898_p4 = pneg %p5014_p2 }
   0x7   : > { %p4949_p12 = por %p4948_p11, %p4947_p10 }
   0x8   : > { %p4899_p5 = pnand %p4902_p3, %p4898_p4 }
   0xa   : > { %p4941_p7 = pneg %p4899_p5 }
   0xc   : > { %p4942_p8 = pnand %p4941_p7, %p4940_p6 }
   0xe   : > { %p4943_p9 = pneg %p4942_p8 }
  0x10   : > { %p4950_p13 = pnand %p4949_p12, %p4943_p9 }
  0x12   : > { %4953 = shalt.err (!%p4950_p13)
}
  0x13   : > { %s4966_s22 = smov [#allocation2]   ;;  %175 = sbr.rel (%p5014_p2) target bundleno = 608 (0x260), region = 36 }
  0x14   : > { %4901 = dma.vmem_to_smem (!%p4899_p5), %s155_s19, 16, %s4966_s22, [#allocation3]  }
  0x18   : > { %4959 = dma.done.wait (%p4902_p3), [#allocation3], 16  }
  0x19   : > { %4961 = vsyncadd (%p4902_p3), [#allocation3], 4294967280 }
  0x1a   : > { %181 = sfence }
  0x1b   : > { %p202_p0 = scmp.lt.s32.totalorder %s4552_s16, 1  ;;  %s4967_s27 = smov 108   ;;  %vm230_vm0 = vcmask 1043456   ;;  %v222_v5 = vld [vmem:[%s5632_s1] sm:$0xff]  ;;  %vm226_vm1 = vcmask 31744   ;;  %v4970_v6 = vmov 0.0   ;;  %v388_v12 = vlaneseq }
  0x1c   : > { %s4968_s28 = smov 88   ;;  %s4969_s29 = smov 127   ;;  %4768 = vmatprep.subr.mxu1 %v4970_v6  ;;  %vm4971_vm2 = vmmov 0   ;;  %301 = vmatprep.mubr.f32.mxu0 %v4970_v6  ;;  %vm1072_vm3 = vcmask 883712   ;;  %v4568_v27 = vld [vmem:[%s5632_s1 + $0x8] sm:$0xff]  ;;  %vm1916_vm5 = vcmask 719872  }
  0x1d   : > { %s5638_s16 = smov (!%p202_p0, %s4552_s16), 1  ;;  %4770 = vmatprep.mubr.msk.f32.mxu1 %vm4971_vm2, %v4970_v6  ;;  %s4972_s6 = smov 68   ;;  %v5071_v17 = vand.u32 127, %v388_v12  ;;  %v4574_v40 = vld [vmem:[%s5632_s1 + $0x10] sm:$0xff]  ;;  %v4580_v48 = vld [vmem:[%s5632_s1 + $0x18] sm:$0xff]  ;;  %v4586_v54 = vld [vmem:[%s5632_s1 + $0x20] sm:$0xff] }
  0x1e   : > { %s4717_s23 = sshll.u32 %s5638_s16, 4  ;;  %s4973_s7 = smov 126   ;;  %v4592_v55 = vld [vmem:[%s5632_s1 + $0x28] sm:$0xff]  ;;  %vm2760_vm9 = vcmask 556032   ;;  %v4977_v59 = vmov 0   ;;  %vm3604_vm10 = vcmask 392192  }
  0x1f   : > { %s206_s26 = scalar_lea.vmem %s5631_s0, %s4717_s23  ;;  %s4974_s8 = smov 125   ;;  %vm390_vm4 = vcmp.lt.s32.totalorder %v5071_v17, 127  ;;  %vm558_vm6 = vcmp.lt.s32.totalorder %v5071_v17, 126  ;;  %vm726_vm7 = vcmp.lt.s32.totalorder %v5071_v17, 125  ;;  %vm894_vm8 = vcmp.lt.s32.totalorder %v5071_v17, 124  ;;  %4924 = vset.pattern.permute.xlu0 %v4977_v59 }
  0x20   : > { %v1057_v0 = vld [vmem:[%s206_s26 + $0x8] sm:$0xff]  ;;  %v1056_v1 = vld [vmem:[%s206_s26] sm:$0xff]  ;;  %s4975_s9 = smov 124   ;;  %s4976_s10 = smov 48  }
  0x21   : > { %1068 = vrot.lane.b32.xlu0 %v1057_v0, %s4967_s27  ;;  %1064 = vrot.lane.b32.xlu1 %v1056_v1, %s4967_s27  ;;  %v1062_v2 = vcombine.high %v1056_v1, %v1056_v1  ;;  %v1063_v3 = vcombine.high %v1057_v0, %v1057_v0  ;;  %v221_v4 = vld [vmem:[%s206_s26 + $0x8] sm:$0xf]  ;;  %s212_s13 = sld [smem:[#allocation2]]  ;;  %s4893_s17 = smul.u32 12, %s5638_s16 }
  0x22   : > { %4769 = vmatpush3.msk.msra.mxu1 %vm230_vm0, %v221_v4  ;;  %s4562_s14 = sld [smem:[#allocation2 + $0x1]] }
  0x23   : > { %4563 = vmatprep.subr.msk.mxu0 %vm230_vm0, %v1062_v2  ;;  %4771 = vmatmul.mubr.msk.f32.vlgmr.msra.gmra.mxu1 %vm226_vm1, %v222_v5  ;;  %s211_s20 = scalar_lea.vmem %s5635_s4, %s4893_s17 }
  0x24   : > { %4564 = vmatpush1.msk.msra.mxu0 %vm230_vm0, %v1056_v1  ;;  %4773 = vmatprep.subr.mxu1 %v4970_v6 }
  0x25   : > { %1912 = vrot.lane.b32.xlu1 %v1057_v0, %s4968_s28  ;;  %1066 = vrot.lane.b32.xlu0 %v1062_v2, %s4967_s27 }
  0x26   : > { %4565 = vmatmul.mubr.msk.f32.vlgmr.msra.gmra.mxu0 %vm226_vm1, %v222_v5  ;;  %4775 = vmatprep.mubr.msk.f32.mxu1 %vm4971_vm2, %v4970_v6  ;;  %v214_v5 = vld [vmem:[%s5633_s2] sm:$0xff] }
  0x27   : > { %472 = vmatprep.mubr.f32.mxu0 %v4970_v6 }
  0x29   : > { %1070 = vrot.lane.b32.xlu1 %v1063_v3, %s4967_s27  ;;  %1910 = vrot.lane.b32.xlu0 %v1062_v2, %s4968_s28 }
  0x2d   : > { %1908 = vrot.lane.b32.xlu1 %v1056_v1, %s4968_s28  ;;  %1914 = vrot.lane.b32.xlu0 %v1063_v3, %s4968_s28 }
  0x31   : > { %386 = vrot.lane.b32.xlu1 %v221_v4, %s4969_s29  ;;  %384 = vrot.lane.b32.xlu0 %v1062_v2, %s4969_s29 }
  0x35   : > { %2754 = vrot.lane.b32.xlu1 %v1062_v2, %s4972_s6  ;;  %382 = vrot.lane.b32.xlu0 %v1056_v1, %s4969_s29 }
  0x39   : > { %2758 = vrot.lane.b32.xlu1 %v1063_v3, %s4972_s6  ;;  %2756 = vrot.lane.b32.xlu0 %v1057_v0, %s4972_s6 }
  0x3d   : > { %554 = vrot.lane.b32.xlu1 %v1062_v2, %s4973_s7  ;;  %2752 = vrot.lane.b32.xlu0 %v1056_v1, %s4972_s6 }
  0x41   : > { %552 = vrot.lane.b32.xlu1 %v1056_v1, %s4973_s7  ;;  %556 = vrot.lane.b32.xlu0 %v221_v4, %s4973_s7 }
  0x45   : > { %724 = vrot.lane.b32.xlu1 %v221_v4, %s4974_s8  ;;  %722 = vrot.lane.b32.xlu0 %v1062_v2, %s4974_s8 }
  0x49   : > { %890 = vrot.lane.b32.xlu1 %v1062_v2, %s4975_s9  ;;  %720 = vrot.lane.b32.xlu0 %v1056_v1, %s4974_s8 }
  0x4d   : > { %888 = vrot.lane.b32.xlu1 %v1056_v1, %s4975_s9  ;;  %892 = vrot.lane.b32.xlu0 %v221_v4, %s4975_s9 }
  0x51   : > { %3600 = vrot.lane.b32.xlu0 %v1057_v0, %s4976_s10  ;;  %3598 = vrot.lane.b32.xlu1 %v1062_v2, %s4976_s10 }
  0x55   : > { %3596 = vrot.lane.b32.xlu0 %v1056_v1, %s4976_s10  ;;  %3602 = vrot.lane.b32.xlu1 %v1063_v3, %s4976_s10 }
  0x93   : > { %v1069_v7 = vpop.permute.xlu0 %1068  ;;  %v1065_v8 = vpop.permute.xlu1 %1064 }
  0x97   : > { %v1913_v9 = vpop.permute.xlu1 %1912  ;;  %v1067_v10 = vpop.permute.xlu0 %1066 }
  0x98   : > { %v5059_v11 = vsel %vm1072_vm3, %v1067_v10, %v1069_v7  ;;  %v5063_v15 = vsel %vm1072_vm3, %v1065_v8, %v1067_v10 }
  0x99   : > { %1234 = vrot.lane.b32.xlu0 %v5059_v11, %s4969_s29 }
  0x9b   : > { %v1071_v13 = vpop.permute.xlu1 %1070  ;;  %v1911_v14 = vpop.permute.xlu0 %1910 }
  0x9c   : > { %v5065_v16 = vsel %vm1072_vm3, %v1069_v7, %v1071_v13  ;;  %v5116_v32 = vsel %vm1916_vm5, %v1911_v14, %v1913_v9  ;;  %v4598_v13 = vld [vmem:[%s5632_s1 + $0x30] sm:$0xff] }
  0x9d   : > { %1236 = vrot.lane.b32.xlu1 %v5065_v16, %s4969_s29  ;;  %1232 = vrot.lane.b32.xlu0 %v5063_v15, %s4969_s29 }
  0x9f   : > { %v1909_v18 = vpop.permute.xlu1 %1908  ;;  %v1915_v19 = vpop.permute.xlu0 %1914 }
  0xa0   : > { %v5123_v33 = vsel %vm1916_vm5, %v1909_v18, %v1911_v14  ;;  %v5125_v36 = vsel %vm1916_vm5, %v1913_v9, %v1915_v19 }
  0xa1   : > { %1401 = vrot.lane.b32.xlu1 %v5059_v11, %s4973_s7  ;;  %1403 = vrot.lane.b32.xlu0 %v5065_v16, %s4973_s7 }
  0xa3   : > { %v387_v20 = vpop.permute.xlu1 %386  ;;  %v385_v21 = vpop.permute.xlu0 %384 }
  0xa4   : > { %v391_v22 = vsel %vm390_vm4, %v385_v21, %v387_v20 }
  0xa5   : > { %1399 = vrot.lane.b32.xlu1 %v5063_v15, %s4973_s7  ;;  %1568 = vrot.lane.b32.xlu0 %v5059_v11, %s4974_s8 }
  0xa6   : > { %4569 = vmatprep.subr.msk.mxu0 %vm230_vm0, %v391_v22 }
  0xa7   : > { %v5085_v23 = vpop.permute.xlu1 %2754  ;;  %v383_v24 = vpop.permute.xlu0 %382 }
  0xa8   : > { %v392_v25 = vsel %vm390_vm4, %v383_v24, %v385_v21  ;;  %v393_v26 = vsel %vm390_vm4, %v387_v20, %v383_v24  ;;  %v4604_v20 = vld [vmem:[%s5632_s1 + $0x38] sm:$0xff] }
  0xa9   : > { %1570 = vrot.lane.b32.xlu1 %v5065_v16, %s4974_s8  ;;  %1566 = vrot.lane.b32.xlu0 %v5063_v15, %s4974_s8 }
  0xaa   : > { %4774 = vmatpush3.msk.msra.mxu1 %vm230_vm0, %v393_v26  ;;  %4570 = vmatpush1.msk.msra.mxu0 %vm230_vm0, %v392_v25 }
  0xab   : > { %v5100_v28 = vpop.permute.xlu1 %2758  ;;  %v5102_v29 = vpop.permute.xlu0 %2756  ;;  %4776 = vmatmul.mubr.msk.f32.vlgmr.msra.gmra.mxu1 %vm226_vm1, %v4568_v27  ;;  %4571 = vmatmul.mubr.msk.f32.vlgmr.msra.gmra.mxu0 %vm226_vm1, %v4568_v27 }
  0xac   : > { %4778 = vmatprep.subr.mxu1 %v4970_v6  ;;  %4780 = vmatprep.mubr.msk.f32.mxu1 %vm4971_vm2, %v4970_v6  ;;  %v5216_v56 = vsel %vm2760_vm9, %v5085_v23, %v5102_v29  ;;  %v5228_v57 = vsel %vm2760_vm9, %v5102_v29, %v5100_v28  ;;  %v4610_v28 = vld [vmem:[%s5632_s1 + $0x40] sm:$0xff] }
  0xad   : > { %1735 = vrot.lane.b32.xlu1 %v5059_v11, %s4975_s9  ;;  %1737 = vrot.lane.b32.xlu0 %v5065_v16, %s4975_s9 }
  0xae   : > { %640 = vmatprep.mubr.f32.mxu0 %v4970_v6 }
  0xaf   : > { %v555_v30 = vpop.permute.xlu1 %554  ;;  %v5114_v31 = vpop.permute.xlu0 %2752 }
  0xb0   : > { %v5232_v58 = vsel %vm2760_vm9, %v5114_v31, %v5085_v23 }
  0xb1   : > { %1733 = vrot.lane.b32.xlu1 %v5063_v15, %s4975_s9  ;;  %2078 = vrot.lane.b32.xlu0 %v5116_v32, %s4969_s29 }
  0xb3   : > { %v553_v34 = vpop.permute.xlu1 %552  ;;  %v557_v35 = vpop.permute.xlu0 %556 }
  0xb4   : > { %v560_v37 = vsel %vm558_vm6, %v553_v34, %v555_v30  ;;  %v559_v38 = vsel %vm558_vm6, %v555_v30, %v557_v35  ;;  %v561_v39 = vsel %vm558_vm6, %v557_v35, %v553_v34 }
  0xb5   : > { %2080 = vrot.lane.b32.xlu1 %v5125_v36, %s4969_s29  ;;  %2076 = vrot.lane.b32.xlu0 %v5123_v33, %s4969_s29 }
  0xb6   : > { %4575 = vmatprep.subr.msk.mxu0 %vm230_vm0, %v559_v38  ;;  %4779 = vmatpush3.msk.msra.mxu1 %vm230_vm0, %v561_v39 }
  0xb7   : > { %v725_v41 = vpop.permute.xlu1 %724  ;;  %v723_v42 = vpop.permute.xlu0 %722  ;;  %4781 = vmatmul.mubr.msk.f32.vlgmr.msra.gmra.mxu1 %vm226_vm1, %v4574_v40  ;;  %4576 = vmatpush1.msk.msra.mxu0 %vm230_vm0, %v560_v37  ;;  %v4616_v37 = vld [vmem:[%s5632_s1 + $0x48] sm:$0xff] }
  0xb8   : > { %v727_v43 = vsel %vm726_vm7, %v723_v42, %v725_v41  ;;  %4577 = vmatmul.mubr.msk.f32.vlgmr.msra.gmra.mxu0 %vm226_vm1, %v4574_v40  ;;  %4783 = vmatprep.subr.mxu1 %v4970_v6 }
  0xb9   : > { %2245 = vrot.lane.b32.xlu1 %v5116_v32, %s4973_s7  ;;  %2247 = vrot.lane.b32.xlu0 %v5125_v36, %s4973_s7 }
  0xba   : > { %4581 = vmatprep.subr.msk.mxu0 %vm230_vm0, %v727_v43  ;;  %4785 = vmatprep.mubr.msk.f32.mxu1 %vm4971_vm2, %v4970_v6  ;;  %v4622_v43 = vld [vmem:[%s5632_s1 + $0x50] sm:$0xff] }
  0xbb   : > { %v891_v44 = vpop.permute.xlu1 %890  ;;  %v721_v45 = vpop.permute.xlu0 %720  ;;  %808 = vmatprep.mubr.f32.mxu0 %v4970_v6 }
  0xbc   : > { %v728_v46 = vsel %vm726_vm7, %v721_v45, %v723_v42  ;;  %v729_v47 = vsel %vm726_vm7, %v725_v41, %v721_v45 }
  0xbd   : > { %2243 = vrot.lane.b32.xlu1 %v5123_v33, %s4973_s7  ;;  %2412 = vrot.lane.b32.xlu0 %v5116_v32, %s4974_s8 }
  0xbe   : > { %4784 = vmatpush3.msk.msra.mxu1 %vm230_vm0, %v729_v47  ;;  %4582 = vmatpush1.msk.msra.mxu0 %vm230_vm0, %v728_v46  ;;  %v4628_v46 = vld [vmem:[%s5632_s1 + $0x58] sm:$0xff] }
  0xbf   : > { %v889_v49 = vpop.permute.xlu1 %888  ;;  %4786 = vmatmul.mubr.msk.f32.vlgmr.msra.gmra.mxu1 %vm226_vm1, %v4580_v48  ;;  %v893_v50 = vpop.permute.xlu0 %892  ;;  %4583 = vmatmul.mubr.msk.f32.vlgmr.msra.gmra.mxu0 %vm226_vm1, %v4580_v48 }
  0xc0   : > { %v896_v51 = vsel %vm894_vm8, %v889_v49, %v891_v44  ;;  %v895_v52 = vsel %vm894_vm8, %v891_v44, %v893_v50  ;;  %v897_v53 = vsel %vm894_vm8, %v893_v50, %v889_v49  ;;  %4788 = vmatprep.subr.mxu1 %v4970_v6  ;;  %4790 = vmatprep.mubr.msk.f32.mxu1 %vm4971_vm2, %v4970_v6 }
  0xc1   : > { %2414 = vrot.lane.b32.xlu1 %v5125_v36, %s4974_s8  ;;  %2410 = vrot.lane.b32.xlu0 %v5123_v33, %s4974_s8 }
  0xc2   : > { %4587 = vmatprep.subr.msk.mxu0 %vm230_vm0, %v895_v52  ;;  %4789 = vmatpush3.msk.msra.mxu1 %vm230_vm0, %v897_v53 }
  0xc3   : > { %4588 = vmatpush1.msk.msra.mxu0 %vm230_vm0, %v896_v51  ;;  %4793 = vmatprep.subr.mxu1 %v4970_v6  ;;  %v3599_v60 = vpop.permute.xlu1 %3598  ;;  %v3601_v61 = vpop.permute.xlu0 %3600  ;;  %v4634_v51 = vld [vmem:[%s5632_s1 + $0x60] sm:$0xff] }
  0xc4   : > { %976 = vmatprep.mubr.f32.mxu0 %v4970_v6  ;;  %4791 = vmatmul.mubr.msk.f32.vlgmr.msra.gmra.mxu1 %vm226_vm1, %v4586_v54  ;;  %v5254_v62 = vsel %vm3604_vm10, %v3599_v60, %v3601_v61 }
  0xc5   : > { %4593 = vmatprep.subr.msk.mxu0 %vm230_vm0, %v5059_v11  ;;  %4794 = vmatpush3.msk.msra.mxu1 %vm230_vm0, %v5065_v16 }
  0xc6   : > { %4589 = vmatmul.mubr.msk.f32.vlgmr.msra.gmra.mxu0 %vm226_vm1, %v4586_v54  ;;  %2579 = vrot.lane.b32.xlu1 %v5116_v32, %s4975_s9 }
  0xc7   : > { %4594 = vmatpush1.msk.msra.mxu0 %vm230_vm0, %v5063_v15  ;;  %2581 = vrot.lane.b32.xlu0 %v5125_v36, %s4975_s9  ;;  %v3603_v63 = vpop.permute.xlu1 %3602  ;;  %v3597_v0 = vpop.permute.xlu0 %3596 }
  0xc8   : > { %4795 = vmatprep.mubr.msk.f32.mxu1 %vm4971_vm2, %v4970_v6  ;;  %4798 = vmatprep.subr.mxu1 %v4970_v6  ;;  %v5260_v1 = vsel %vm3604_vm10, %v3601_v61, %v3603_v63  ;;  %v5262_v2 = vsel %vm3604_vm10, %v3597_v0, %v3599_v60  ;;  %v4640_v60 = vld [vmem:[%s5632_s1 + $0x68] sm:$0xff] }
  0xc9   : > { %1149 = vmatprep.mubr.f32.mxu0 %v4970_v6  ;;  %4796 = vmatmul.mubr.msk.f32.vlgmr.msra.gmra.mxu1 %vm226_vm1, %v4592_v55 }
  0xca   : > { %2577 = vrot.lane.b32.xlu1 %v5123_v33, %s4975_s9  ;;  %4595 = vmatmul.mubr.msk.f32.vlgmr.msra.gmra.mxu0 %vm226_vm1, %v4592_v55 }
  0xcb   : > { %2922 = vrot.lane.b32.xlu0 %v5216_v56, %s4969_s29  ;;  %1319 = vmatprep.mubr.f32.mxu0 %v4970_v6 }
  0xcc   : > { %4800 = vmatprep.mubr.msk.f32.mxu1 %vm4971_vm2, %v4970_v6 }
  0xce   : > { %2924 = vrot.lane.b32.xlu1 %v5228_v57, %s4969_s29 }
  0xcf   : > { %2920 = vrot.lane.b32.xlu0 %v5232_v58, %s4969_s29 }
  0xd2   : > { %3089 = vrot.lane.b32.xlu1 %v5216_v56, %s4973_s7 }
  0xd3   : > { %3091 = vrot.lane.b32.xlu0 %v5228_v57, %s4973_s7 }
  0xd6   : > { %3087 = vrot.lane.b32.xlu1 %v5232_v58, %s4973_s7 }
  0xd7   : > { %3256 = vrot.lane.b32.xlu0 %v5216_v56, %s4974_s8 }
  0xda   : > { %3258 = vrot.lane.b32.xlu1 %v5228_v57, %s4974_s8 }
  0xdb   : > { %3254 = vrot.lane.b32.xlu0 %v5232_v58, %s4974_s8 }
  0xde   : > { %3423 = vrot.lane.b32.xlu1 %v5216_v56, %s4975_s9 }
  0xdf   : > { %3425 = vrot.lane.b32.xlu0 %v5228_v57, %s4975_s9 }
  0xe2   : > { %3421 = vrot.lane.b32.xlu1 %v5232_v58, %s4975_s9 }
  0xe3   : > { %3766 = vrot.lane.b32.xlu0 %v5254_v62, %s4969_s29  ;;  %v5280_v3 = vpop.f32.mrf.mxu1 }
  0xe5   : > { %v4772_v4 = vpop.f32.mrf.mxu1 }
  0xe6   : > { %3768 = vrot.lane.b32.xlu1 %v5260_v1, %s4969_s29 }
  0xe7   : > { %3764 = vrot.lane.b32.xlu0 %v5262_v2, %s4969_s29 }
  0xea   : > { %3933 = vrot.lane.b32.xlu1 %v5254_v62, %s4973_s7 }
  0xeb   : > { %3935 = vrot.lane.b32.xlu0 %v5260_v1, %s4973_s7 }
  0xee   : > { %3931 = vrot.lane.b32.xlu1 %v5262_v2, %s4973_s7 }
  0xef   : > { %4100 = vrot.lane.b32.xlu0 %v5254_v62, %s4974_s8 }
  0xf2   : > { %4102 = vrot.lane.b32.xlu1 %v5260_v1, %s4974_s8 }
  0xf3   : > { %4098 = vrot.lane.b32.xlu0 %v5262_v2, %s4974_s8 }
  0xf6   : > { %4267 = vrot.lane.b32.xlu1 %v5254_v62, %s4975_s9 }
  0xf7   : > { %4269 = vrot.lane.b32.xlu0 %v5260_v1, %s4975_s9 }
  0xfa   : > { %4265 = vrot.lane.b32.xlu1 %v5262_v2, %s4975_s9 }
  0xfb   : > { %217 = vperm.xlu0 %4924, %v214_v5   ;;  %v4646_v5 = vld [vmem:[%s5632_s1 + $0x70] sm:$0xff] }
 0x10b   : > { %v1235_v7 = vpop.permute.xlu0 %1234 }
 0x10f   : > { %v1237_v8 = vpop.permute.xlu1 %1236  ;;  %v1233_v9 = vpop.permute.xlu0 %1232 }
 0x110   : > { %v1238_v10 = vsel %vm390_vm4, %v1235_v7, %v1237_v8  ;;  %v1239_v11 = vsel %vm390_vm4, %v1233_v9, %v1235_v7  ;;  %v1240_v12 = vsel %vm390_vm4, %v1237_v8, %v1233_v9 }
 0x111   : > { %4599 = vmatprep.subr.msk.mxu0 %vm230_vm0, %v1238_v10  ;;  %4799 = vmatpush3.msk.msra.mxu1 %vm230_vm0, %v1240_v12 }
 0x112   : > { %4600 = vmatpush1.msk.msra.mxu0 %vm230_vm0, %v1239_v11  ;;  %4803 = vmatprep.subr.mxu1 %v4970_v6 }
 0x113   : > { %v1402_v14 = vpop.permute.xlu1 %1401  ;;  %v1404_v15 = vpop.permute.xlu0 %1403  ;;  %4601 = vmatmul.mubr.msk.f32.vlgmr.msra.gmra.mxu0 %vm226_vm1, %v4598_v13  ;;  %4801 = vmatmul.mubr.msk.f32.vlgmr.msra.gmra.mxu1 %vm226_vm1, %v4598_v13  ;;  %v4652_v13 = vld [vmem:[%s5632_s1 + $0x78] sm:$0xff] }
 0x114   : > { %v1405_v16 = vsel %vm558_vm6, %v1402_v14, %v1404_v15  ;;  %1486 = vmatprep.mubr.f32.mxu0 %v4970_v6  ;;  %4805 = vmatprep.mubr.msk.f32.mxu1 %vm4971_vm2, %v4970_v6 }
 0x115   : > { %4605 = vmatprep.subr.msk.mxu0 %vm230_vm0, %v1405_v16 }
 0x117   : > { %v1400_v18 = vpop.permute.xlu1 %1399  ;;  %v1569_v19 = vpop.permute.xlu0 %1568 }
 0x118   : > { %v1406_v21 = vsel %vm558_vm6, %v1400_v18, %v1402_v14  ;;  %v1407_v22 = vsel %vm558_vm6, %v1404_v15, %v1400_v18  ;;  %v4658_v15 = vld [vmem:[%s5632_s1 + $0x80] sm:$0xff] }
 0x119   : > { %4606 = vmatpush1.msk.msra.mxu0 %vm230_vm0, %v1406_v21  ;;  %4804 = vmatpush3.msk.msra.mxu1 %vm230_vm0, %v1407_v22  ;;  %v4664_v22 = vld [vmem:[%s5632_s1 + $0x88] sm:$0xff] }
 0x11a   : > { %4607 = vmatmul.mubr.msk.f32.vlgmr.msra.gmra.mxu0 %vm226_vm1, %v4604_v20  ;;  %4808 = vmatprep.subr.mxu1 %v4970_v6 }
 0x11b   : > { %v1571_v23 = vpop.permute.xlu1 %1570  ;;  %v1567_v24 = vpop.permute.xlu0 %1566  ;;  %4806 = vmatmul.mubr.msk.f32.vlgmr.msra.gmra.mxu1 %vm226_vm1, %v4604_v20  ;;  %1653 = vmatprep.mubr.f32.mxu0 %v4970_v6 }
 0x11c   : > { %v1572_v25 = vsel %vm726_vm7, %v1569_v19, %v1571_v23  ;;  %v1573_v26 = vsel %vm726_vm7, %v1567_v24, %v1569_v19  ;;  %v1574_v27 = vsel %vm726_vm7, %v1571_v23, %v1567_v24  ;;  %4810 = vmatprep.mubr.msk.f32.mxu1 %vm4971_vm2, %v4970_v6 }
 0x11d   : > { %4611 = vmatprep.subr.msk.mxu0 %vm230_vm0, %v1572_v25  ;;  %4809 = vmatpush3.msk.msra.mxu1 %vm230_vm0, %v1574_v27 }
 0x11e   : > { %4612 = vmatpush1.msk.msra.mxu0 %vm230_vm0, %v1573_v26  ;;  %4813 = vmatprep.subr.mxu1 %v4970_v6  ;;  %v4670_v26 = vld [vmem:[%s5632_s1 + $0x90] sm:$0xff] }
 0x11f   : > { %v1736_v29 = vpop.permute.xlu1 %1735  ;;  %v1738_v30 = vpop.permute.xlu0 %1737  ;;  %4613 = vmatmul.mubr.msk.f32.vlgmr.msra.gmra.mxu0 %vm226_vm1, %v4610_v28  ;;  %4811 = vmatmul.mubr.msk.f32.vlgmr.msra.gmra.mxu1 %vm226_vm1, %v4610_v28 }
 0x120   : > { %v1739_v31 = vsel %vm894_vm8, %v1736_v29, %v1738_v30  ;;  %1820 = vmatprep.mubr.f32.mxu0 %v4970_v6  ;;  %4815 = vmatprep.mubr.msk.f32.mxu1 %vm4971_vm2, %v4970_v6 }
 0x121   : > { %4617 = vmatprep.subr.msk.mxu0 %vm230_vm0, %v1739_v31 }
 0x123   : > { %v1734_v34 = vpop.permute.xlu1 %1733  ;;  %v2079_v35 = vpop.permute.xlu0 %2078 }
 0x124   : > { %v1740_v38 = vsel %vm894_vm8, %v1734_v34, %v1736_v29  ;;  %v1741_v39 = vsel %vm894_vm8, %v1738_v30, %v1734_v34 }
 0x125   : > { %4618 = vmatpush1.msk.msra.mxu0 %vm230_vm0, %v1740_v38  ;;  %4814 = vmatpush3.msk.msra.mxu1 %vm230_vm0, %v1741_v39 }
 0x126   : > { %4619 = vmatmul.mubr.msk.f32.vlgmr.msra.gmra.mxu0 %vm226_vm1, %v4616_v37  ;;  %4816 = vmatmul.mubr.msk.f32.vlgmr.msra.gmra.mxu1 %vm226_vm1, %v4616_v37 }
 0x127   : > { %4623 = vmatprep.subr.msk.mxu0 %vm230_vm0, %v5116_v32  ;;  %4818 = vmatprep.subr.mxu1 %v4970_v6  ;;  %v2081_v40 = vpop.permute.xlu1 %2080  ;;  %v2077_v41 = vpop.permute.xlu0 %2076 }
 0x128   : > { %v2082_v42 = vsel %vm390_vm4, %v2079_v35, %v2081_v40  ;;  %4819 = vmatpush3.msk.msra.mxu1 %vm230_vm0, %v5125_v36  ;;  %4624 = vmatpush1.msk.msra.mxu0 %vm230_vm0, %v5123_v33  ;;  %v2083_v32 = vsel %vm390_vm4, %v2077_v41, %v2079_v35  ;;  %v2084_v44 = vsel %vm390_vm4, %v2081_v40, %v2077_v41  ;;  %v4676_v35 = vld [vmem:[%s5632_s1 + $0x98] sm:$0xff] }
 0x129   : > { %1993 = vmatprep.mubr.f32.mxu0 %v4970_v6  ;;  %4820 = vmatprep.mubr.msk.f32.mxu1 %vm4971_vm2, %v4970_v6 }
 0x12a   : > { %4629 = vmatprep.subr.msk.mxu0 %vm230_vm0, %v2082_v42  ;;  %4823 = vmatprep.subr.mxu1 %v4970_v6 }
 0x12b   : > { %4625 = vmatmul.mubr.msk.f32.vlgmr.msra.gmra.mxu0 %vm226_vm1, %v4622_v43  ;;  %4821 = vmatmul.mubr.msk.f32.vlgmr.msra.gmra.mxu1 %vm226_vm1, %v4622_v43  ;;  %v2246_v33 = vpop.permute.xlu1 %2245  ;;  %v2248_v36 = vpop.permute.xlu0 %2247  ;;  %v4682_v43 = vld [vmem:[%s5632_s1 + $0xa0] sm:$0xff] }
 0x12c   : > { %4630 = vmatpush1.msk.msra.mxu0 %vm230_vm0, %v2083_v32  ;;  %4824 = vmatpush3.msk.msra.mxu1 %vm230_vm0, %v2084_v44  ;;  %v2249_v45 = vsel %vm558_vm6, %v2246_v33, %v2248_v36  ;;  %v4688_v44 = vld [vmem:[%s5632_s1 + $0xa8] sm:$0xff] }
 0x12d   : > { %2163 = vmatprep.mubr.f32.mxu0 %v4970_v6  ;;  %4825 = vmatprep.mubr.msk.f32.mxu1 %vm4971_vm2, %v4970_v6 }
 0x12e   : > { %4635 = vmatprep.subr.msk.mxu0 %vm230_vm0, %v2249_v45  ;;  %4828 = vmatprep.subr.mxu1 %v4970_v6 }
 0x12f   : > { %4631 = vmatmul.mubr.msk.f32.vlgmr.msra.gmra.mxu0 %vm226_vm1, %v4628_v46  ;;  %4826 = vmatmul.mubr.msk.f32.vlgmr.msra.gmra.mxu1 %vm226_vm1, %v4628_v46  ;;  %v2244_v47 = vpop.permute.xlu1 %2243  ;;  %v2413_v48 = vpop.permute.xlu0 %2412 }
 0x130   : > { %v2250_v49 = vsel %vm558_vm6, %v2244_v47, %v2246_v33  ;;  %v2251_v50 = vsel %vm558_vm6, %v2248_v36, %v2244_v47  ;;  %2330 = vmatprep.mubr.f32.mxu0 %v4970_v6  ;;  %4830 = vmatprep.mubr.msk.f32.mxu1 %vm4971_vm2, %v4970_v6 }
 0x131   : > { %4636 = vmatpush1.msk.msra.mxu0 %vm230_vm0, %v2250_v49  ;;  %4829 = vmatpush3.msk.msra.mxu1 %vm230_vm0, %v2251_v50 }
 0x132   : > { %4833 = vmatprep.subr.mxu1 %v4970_v6 }
 0x133   : > { %4637 = vmatmul.mubr.msk.f32.vlgmr.msra.gmra.mxu0 %vm226_vm1, %v4634_v51  ;;  %4831 = vmatmul.mubr.msk.f32.vlgmr.msra.gmra.mxu1 %vm226_vm1, %v4634_v51  ;;  %v2415_v52 = vpop.permute.xlu1 %2414  ;;  %v2411_v53 = vpop.permute.xlu0 %2410 }
 0x134   : > { %v2416_v54 = vsel %vm726_vm7, %v2413_v48, %v2415_v52  ;;  %v2417_v55 = vsel %vm726_vm7, %v2411_v53, %v2413_v48  ;;  %v2418_v59 = vsel %vm726_vm7, %v2415_v52, %v2411_v53  ;;  %4835 = vmatprep.mubr.msk.f32.mxu1 %vm4971_vm2, %v4970_v6  ;;  %2497 = vmatprep.mubr.f32.mxu0 %v4970_v6  ;;  %v4694_v48 = vld [vmem:[%s5632_s1 + $0xb0] sm:$0xff]  ;;  %v4700_v52 = vld [vmem:[%s5632_s1 + $0xb8] sm:$0xff] }
 0x135   : > { %4641 = vmatprep.subr.msk.mxu0 %vm230_vm0, %v2416_v54  ;;  %4834 = vmatpush3.msk.msra.mxu1 %vm230_vm0, %v2418_v59 }
 0x136   : > { %4642 = vmatpush1.msk.msra.mxu0 %vm230_vm0, %v2417_v55  ;;  %4838 = vmatprep.subr.mxu1 %v4970_v6 }
 0x137   : > { %4836 = vmatmul.mubr.msk.f32.vlgmr.msra.gmra.mxu1 %vm226_vm1, %v4640_v60  ;;  %4643 = vmatmul.mubr.msk.f32.vlgmr.msra.gmra.mxu0 %vm226_vm1, %v4640_v60 }
 0x138   : > { %v2580_v61 = vpop.permute.xlu1 %2579  ;;  %2664 = vmatprep.mubr.f32.mxu0 %v4970_v6  ;;  %4840 = vmatprep.mubr.msk.f32.mxu1 %vm4971_vm2, %v4970_v6 }
 0x139   : > { %v2582_v63 = vpop.permute.xlu0 %2581 }
 0x13a   : > { %v2583_v0 = vsel %vm894_vm8, %v2580_v61, %v2582_v63 }
 0x13b   : > { %4647 = vmatprep.subr.msk.mxu0 %vm230_vm0, %v2583_v0  ;;  %v4706_v0 = vld [vmem:[%s5632_s1 + $0xc0] sm:$0xff] }
 0x13c   : > { %v2578_v4 = vpop.permute.xlu1 %2577 }
 0x13d   : > { %v2584_v7 = vsel %vm894_vm8, %v2578_v4, %v2580_v61  ;;  %v2585_v8 = vsel %vm894_vm8, %v2582_v63, %v2578_v4  ;;  %v2923_v9 = vpop.permute.xlu0 %2922 }
 0x13e   : > { %4648 = vmatpush1.msk.msra.mxu0 %vm230_vm0, %v2584_v7  ;;  %4839 = vmatpush3.msk.msra.mxu1 %vm230_vm0, %v2585_v8 }
 0x13f   : > { %4649 = vmatmul.mubr.msk.f32.vlgmr.msra.gmra.mxu0 %vm226_vm1, %v4646_v5  ;;  %4841 = vmatmul.mubr.msk.f32.vlgmr.msra.gmra.mxu1 %vm226_vm1, %v4646_v5 }
 0x140   : > { %4653 = vmatprep.subr.msk.mxu0 %vm230_vm0, %v5216_v56  ;;  %4843 = vmatprep.subr.mxu1 %v4970_v6  ;;  %v2925_v10 = vpop.permute.xlu1 %2924 }
 0x141   : > { %v2926_v11 = vsel %vm390_vm4, %v2923_v9, %v2925_v10  ;;  %4844 = vmatpush3.msk.msra.mxu1 %vm230_vm0, %v5228_v57  ;;  %v2921_v12 = vpop.permute.xlu0 %2920  ;;  %4654 = vmatpush1.msk.msra.mxu0 %vm230_vm0, %v5232_v58 }
 0x142   : > { %v2927_v56 = vsel %vm390_vm4, %v2921_v12, %v2923_v9  ;;  %v2928_v14 = vsel %vm390_vm4, %v2925_v10, %v2921_v12  ;;  %2837 = vmatprep.mubr.f32.mxu0 %v4970_v6  ;;  %4845 = vmatprep.mubr.msk.f32.mxu1 %vm4971_vm2, %v4970_v6 }
 0x143   : > { %4659 = vmatprep.subr.msk.mxu0 %vm230_vm0, %v2926_v11  ;;  %4848 = vmatprep.subr.mxu1 %v4970_v6 }
 0x144   : > { %4655 = vmatmul.mubr.msk.f32.vlgmr.msra.gmra.mxu0 %vm226_vm1, %v4652_v13  ;;  %4846 = vmatmul.mubr.msk.f32.vlgmr.msra.gmra.mxu1 %vm226_vm1, %v4652_v13  ;;  %v3090_v57 = vpop.permute.xlu1 %3089 }
 0x145   : > { %4660 = vmatpush1.msk.msra.mxu0 %vm230_vm0, %v2927_v56  ;;  %4849 = vmatpush3.msk.msra.mxu1 %vm230_vm0, %v2928_v14  ;;  %v3092_v58 = vpop.permute.xlu0 %3091 }
 0x146   : > { %v3093_v16 = vsel %vm558_vm6, %v3090_v57, %v3092_v58  ;;  %3007 = vmatprep.mubr.f32.mxu0 %v4970_v6  ;;  %4850 = vmatprep.mubr.msk.f32.mxu1 %vm4971_vm2, %v4970_v6 }
 0x147   : > { %4665 = vmatprep.subr.msk.mxu0 %vm230_vm0, %v3093_v16  ;;  %4853 = vmatprep.subr.mxu1 %v4970_v6 }
 0x148   : > { %4661 = vmatmul.mubr.msk.f32.vlgmr.msra.gmra.mxu0 %vm226_vm1, %v4658_v15  ;;  %4851 = vmatmul.mubr.msk.f32.vlgmr.msra.gmra.mxu1 %vm226_vm1, %v4658_v15  ;;  %v3088_v18 = vpop.permute.xlu1 %3087 }
 0x149   : > { %v3094_v19 = vsel %vm558_vm6, %v3088_v18, %v3090_v57  ;;  %v3095_v20 = vsel %vm558_vm6, %v3092_v58, %v3088_v18  ;;  %v3257_v21 = vpop.permute.xlu0 %3256  ;;  %3174 = vmatprep.mubr.f32.mxu0 %v4970_v6  ;;  %4855 = vmatprep.mubr.msk.f32.mxu1 %vm4971_vm2, %v4970_v6 }
 0x14a   : > { %4666 = vmatpush1.msk.msra.mxu0 %vm230_vm0, %v3094_v19  ;;  %4854 = vmatpush3.msk.msra.mxu1 %vm230_vm0, %v3095_v20  ;;  %v303_v19 = vpop.f32.mrf.mxu0 }
 0x14b   : > { %4858 = vmatprep.subr.mxu1 %v4970_v6 }
 0x14c   : > { %4667 = vmatmul.mubr.msk.f32.vlgmr.msra.gmra.mxu0 %vm226_vm1, %v4664_v22  ;;  %4856 = vmatmul.mubr.msk.f32.vlgmr.msra.gmra.mxu1 %vm226_vm1, %v4664_v22  ;;  %v3259_v23 = vpop.permute.xlu1 %3258  ;;  %v305_v20 = vpop.f32.mrf.mxu0 }
 0x14d   : > { %v3260_v24 = vsel %vm726_vm7, %v3257_v21, %v3259_v23  ;;  %v3255_v25 = vpop.permute.xlu0 %3254  ;;  %4860 = vmatprep.mubr.msk.f32.mxu1 %vm4971_vm2, %v4970_v6  ;;  %3341 = vmatprep.mubr.f32.mxu0 %v4970_v6 }
 0x14e   : > { %v3261_v27 = vsel %vm726_vm7, %v3255_v25, %v3257_v21  ;;  %v3262_v28 = vsel %vm726_vm7, %v3259_v23, %v3255_v25  ;;  %4671 = vmatprep.subr.msk.mxu0 %vm230_vm0, %v3260_v24 }
 0x14f   : > { %4859 = vmatpush3.msk.msra.mxu1 %vm230_vm0, %v3262_v28  ;;  %4672 = vmatpush1.msk.msra.mxu0 %vm230_vm0, %v3261_v27 }
 0x150   : > { %4861 = vmatmul.mubr.msk.f32.vlgmr.msra.gmra.mxu1 %vm226_vm1, %v4670_v26  ;;  %v3424_v29 = vpop.permute.xlu1 %3423  ;;  %4673 = vmatmul.mubr.msk.f32.vlgmr.msra.gmra.mxu0 %vm226_vm1, %v4670_v26 }
 0x151   : > { %v3426_v30 = vpop.permute.xlu0 %3425  ;;  %4863 = vmatprep.subr.mxu1 %v4970_v6  ;;  %3508 = vmatprep.mubr.f32.mxu0 %v4970_v6 }
 0x152   : > { %v3427_v31 = vsel %vm894_vm8, %v3424_v29, %v3426_v30  ;;  %4865 = vmatprep.mubr.msk.f32.mxu1 %vm4971_vm2, %v4970_v6 }
 0x153   : > { %4677 = vmatprep.subr.msk.mxu0 %vm230_vm0, %v3427_v31 }
 0x154   : > { %v3422_v34 = vpop.permute.xlu1 %3421 }
 0x155   : > { %v3428_v37 = vsel %vm894_vm8, %v3422_v34, %v3424_v29  ;;  %v3429_v38 = vsel %vm894_vm8, %v3426_v30, %v3422_v34  ;;  %v3767_v39 = vpop.permute.xlu0 %3766 }
 0x156   : > { %4678 = vmatpush1.msk.msra.mxu0 %vm230_vm0, %v3428_v37  ;;  %4864 = vmatpush3.msk.msra.mxu1 %vm230_vm0, %v3429_v38 }
 0x157   : > { %4679 = vmatmul.mubr.msk.f32.vlgmr.msra.gmra.mxu0 %vm226_vm1, %v4676_v35  ;;  %4866 = vmatmul.mubr.msk.f32.vlgmr.msra.gmra.mxu1 %vm226_vm1, %v4676_v35 }
 0x158   : > { %4683 = vmatprep.subr.msk.mxu0 %vm230_vm0, %v5254_v62  ;;  %4868 = vmatprep.subr.mxu1 %v4970_v6  ;;  %v3769_v40 = vpop.permute.xlu1 %3768 }
 0x159   : > { %v3770_v41 = vsel %vm390_vm4, %v3767_v39, %v3769_v40  ;;  %4869 = vmatpush3.msk.msra.mxu1 %vm230_vm0, %v5260_v1  ;;  %v3765_v42 = vpop.permute.xlu0 %3764  ;;  %4684 = vmatpush1.msk.msra.mxu0 %vm230_vm0, %v5262_v2 }
 0x15a   : > { %v3771_v62 = vsel %vm390_vm4, %v3765_v42, %v3767_v39  ;;  %v3772_v32 = vsel %vm390_vm4, %v3769_v40, %v3765_v42  ;;  %3681 = vmatprep.mubr.f32.mxu0 %v4970_v6  ;;  %4870 = vmatprep.mubr.msk.f32.mxu1 %vm4971_vm2, %v4970_v6 }
 0x15b   : > { %4689 = vmatprep.subr.msk.mxu0 %vm230_vm0, %v3770_v41  ;;  %4873 = vmatprep.subr.mxu1 %v4970_v6 }
 0x15c   : > { %4685 = vmatmul.mubr.msk.f32.vlgmr.msra.gmra.mxu0 %vm226_vm1, %v4682_v43  ;;  %4871 = vmatmul.mubr.msk.f32.vlgmr.msra.gmra.mxu1 %vm226_vm1, %v4682_v43  ;;  %v3934_v1 = vpop.permute.xlu1 %3933 }
 0x15d   : > { %4690 = vmatpush1.msk.msra.mxu0 %vm230_vm0, %v3771_v62  ;;  %4874 = vmatpush3.msk.msra.mxu1 %vm230_vm0, %v3772_v32  ;;  %v3936_v2 = vpop.permute.xlu0 %3935 }
 0x15e   : > { %v3937_v33 = vsel %vm558_vm6, %v3934_v1, %v3936_v2  ;;  %3851 = vmatprep.mubr.f32.mxu0 %v4970_v6  ;;  %4875 = vmatprep.mubr.msk.f32.mxu1 %vm4971_vm2, %v4970_v6 }
 0x15f   : > { %4695 = vmatprep.subr.msk.mxu0 %vm230_vm0, %v3937_v33  ;;  %4878 = vmatprep.subr.mxu1 %v4970_v6 }
 0x160   : > { %4691 = vmatmul.mubr.msk.f32.vlgmr.msra.gmra.mxu0 %vm226_vm1, %v4688_v44  ;;  %4876 = vmatmul.mubr.msk.f32.vlgmr.msra.gmra.mxu1 %vm226_vm1, %v4688_v44  ;;  %v3932_v36 = vpop.permute.xlu1 %3931 }
 0x161   : > { %v3938_v45 = vsel %vm558_vm6, %v3932_v36, %v3934_v1  ;;  %v3939_v46 = vsel %vm558_vm6, %v3936_v2, %v3932_v36  ;;  %v4101_v47 = vpop.permute.xlu0 %4100  ;;  %4018 = vmatprep.mubr.f32.mxu0 %v4970_v6  ;;  %4880 = vmatprep.mubr.msk.f32.mxu1 %vm4971_vm2, %v4970_v6 }
 0x162   : > { %4696 = vmatpush1.msk.msra.mxu0 %vm230_vm0, %v3938_v45  ;;  %4879 = vmatpush3.msk.msra.mxu1 %vm230_vm0, %v3939_v46 }
 0x163   : > { %4883 = vmatprep.subr.mxu1 %v4970_v6 }
 0x164   : > { %4697 = vmatmul.mubr.msk.f32.vlgmr.msra.gmra.mxu0 %vm226_vm1, %v4694_v48  ;;  %4881 = vmatmul.mubr.msk.f32.vlgmr.msra.gmra.mxu1 %vm226_vm1, %v4694_v48  ;;  %v4103_v49 = vpop.permute.xlu1 %4102 }
 0x165   : > { %v4104_v50 = vsel %vm726_vm7, %v4101_v47, %v4103_v49  ;;  %v4099_v51 = vpop.permute.xlu0 %4098  ;;  %4885 = vmatprep.mubr.msk.f32.mxu1 %vm4971_vm2, %v4970_v6  ;;  %4185 = vmatprep.mubr.f32.mxu0 %v4970_v6 }
 0x166   : > { %v4105_v53 = vsel %vm726_vm7, %v4099_v51, %v4101_v47  ;;  %v4106_v54 = vsel %vm726_vm7, %v4103_v49, %v4099_v51  ;;  %4701 = vmatprep.subr.msk.mxu0 %vm230_vm0, %v4104_v50 }
 0x167   : > { %4884 = vmatpush3.msk.msra.mxu1 %vm230_vm0, %v4106_v54  ;;  %4702 = vmatpush1.msk.msra.mxu0 %vm230_vm0, %v4105_v53 }
 0x168   : > { %4886 = vmatmul.mubr.msk.f32.vlgmr.msra.gmra.mxu1 %vm226_vm1, %v4700_v52  ;;  %v4268_v55 = vpop.permute.xlu1 %4267  ;;  %4703 = vmatmul.mubr.msk.f32.vlgmr.msra.gmra.mxu0 %vm226_vm1, %v4700_v52 }
 0x169   : > { %v4270_v59 = vpop.permute.xlu0 %4269  ;;  %4888 = vmatprep.subr.mxu1 %v4970_v6  ;;  %4352 = vmatprep.mubr.f32.mxu0 %v4970_v6 }
 0x16a   : > { %v4271_v60 = vsel %vm894_vm8, %v4268_v55, %v4270_v59  ;;  %4890 = vmatprep.mubr.msk.f32.mxu1 %vm4971_vm2, %v4970_v6 }
 0x16b   : > { %4707 = vmatprep.subr.msk.mxu0 %vm230_vm0, %v4271_v60  ;;  %v545_v61 = vpop.f32.mrf.mxu1  ;;  %v474_v21 = vpop.f32.mrf.mxu0 }
 0x16c   : > { %v4266_v63 = vpop.permute.xlu1 %4265 }
 0x16d   : > { %v4272_v4 = vsel %vm894_vm8, %v4266_v63, %v4268_v55  ;;  %v4273_v5 = vsel %vm894_vm8, %v4270_v59, %v4266_v63  ;;  %v4777_v7 = vpop.f32.mrf.mxu1  ;;  %v476_v22 = vpop.f32.mrf.mxu0 }
 0x16e   : > { %4708 = vmatpush1.msk.msra.mxu0 %vm230_vm0, %v4272_v4  ;;  %4889 = vmatpush3.msk.msra.mxu1 %vm230_vm0, %v4273_v5 }
 0x16f   : > { %4709 = vmatmul.mubr.msk.f32.vlgmr.msra.gmra.mxu0 %vm226_vm1, %v4706_v0  ;;  %4891 = vmatmul.mubr.msk.f32.vlgmr.msra.gmra.mxu1 %vm226_vm1, %v4706_v0 }
 0x176   : > { %v218_v6 = vpop.permute.xlu0 %217 }
 0x177   : > { %v713_v8 = vpop.f32.mrf.mxu1  ;;  %v380_v9 = vadd.f32 %v5280_v3, %v218_v6  ;;  %v378_v49 = vadd.f32 %v303_v19, %v218_v6  ;;  %v379_v55 = vadd.f32 %v305_v20, %v218_v6 }
 0x178   : > { %v642_v23 = vpop.f32.mrf.mxu0 }
 0x179   : > { %v4782_v10 = vpop.f32.mrf.mxu1  ;;  %v551_v11 = vadd.f32 %v545_v61, %v380_v9  ;;  %v549_v54 = vadd.f32 %v474_v21, %v378_v49  ;;  %v550_v0 = vadd.f32 %v476_v22, %v379_v55 }
 0x17a   : > { %v644_v24 = vpop.f32.mrf.mxu0 }
 0x17b   : > { %v719_v12 = vadd.f32 %v713_v8, %v551_v11  ;;  %v717_v63 = vadd.f32 %v642_v23, %v549_v54  ;;  %v718_v8 = vadd.f32 %v644_v24, %v550_v0 }
 0x17f   : > { %v881_v13 = vpop.f32.mrf.mxu1  ;;  %v810_v3 = vpop.f32.mrf.mxu0 }
 0x180   : > { %v887_v56 = vadd.f32 %v881_v13, %v719_v12  ;;  %v885_v7 = vadd.f32 %v810_v3, %v717_v63 }
 0x181   : > { %v4787_v17 = vpop.f32.mrf.mxu1  ;;  %v812_v25 = vpop.f32.mrf.mxu0 }
 0x182   : > { %v886_v13 = vadd.f32 %v812_v25, %v718_v8 }
 0x184   : > { %v1049_v14 = vpop.f32.mrf.mxu1 }
 0x185   : > { %v1055_v57 = vadd.f32 %v1049_v14, %v887_v56 }
 0x186   : > { %v4792_v58 = vpop.f32.mrf.mxu1  ;;  %v978_v26 = vpop.f32.mrf.mxu0 }
 0x187   : > { %v1053_v12 = vadd.f32 %v978_v26, %v885_v7 }
 0x188   : > { %v980_v27 = vpop.f32.mrf.mxu0 }
 0x189   : > { %v1222_v15 = vpop.f32.mrf.mxu1  ;;  %v1054_v6 = vadd.f32 %v980_v27, %v886_v13 }
 0x18a   : > { %v5621_v16 = vadd.f32 %v1222_v15, %v1055_v57  ;;  %v1151_v28 = vpop.f32.mrf.mxu0 }
 0x18b   : > { %v4797_v18 = vpop.f32.mrf.mxu1  ;;  %v1226_v14 = vadd.f32 %v1151_v28, %v1053_v12 }
 0x18c   : > { %v1153_v29 = vpop.f32.mrf.mxu0 }
 0x18d   : > { %v1227_v23 = vadd.f32 %v1153_v29, %v1054_v6 }
 0x1d3   : > { %v1321_v30 = vpop.f32.mrf.mxu0  ;;  %v1392_v31 = vpop.f32.mrf.mxu1 }
 0x1d4   : > { %v1396_v19 = vadd.f32 %v1321_v30, %v1226_v14  ;;  %v1398_v20 = vadd.f32 %v1392_v31, %v5621_v16 }
 0x1d5   : > { %v4802_v34 = vpop.f32.mrf.mxu1  ;;  %v1323_v35 = vpop.f32.mrf.mxu0 }
 0x1da   : > { %v1488_v37 = vpop.f32.mrf.mxu0 }
 0x1db   : > { %v1559_v38 = vpop.f32.mrf.mxu1  ;;  %v1563_v34 = vadd.f32 %v1488_v37, %v1396_v19 }
 0x1dc   : > { %v1490_v39 = vpop.f32.mrf.mxu0 }
 0x1dd   : > { %v4807_v40 = vpop.f32.mrf.mxu1 }
 0x1de   : > { %v1565_v40 = vadd.f32 %v1559_v38, %v1398_v20 }
 0x1df   : > { %v1726_v41 = vpop.f32.mrf.mxu1  ;;  %v1655_v42 = vpop.f32.mrf.mxu0 }
 0x1e0   : > { %v1732_v49 = vadd.f32 %v1726_v41, %v1565_v40 }
 0x1e1   : > { %v4812_v43 = vpop.f32.mrf.mxu1  ;;  %v1657_v62 = vpop.f32.mrf.mxu0 }
 0x1e2   : > { %v1397_v43 = vadd.f32 %v1323_v35, %v1227_v23 }
 0x1e6   : > { %v1822_v32 = vpop.f32.mrf.mxu0  ;;  %v1893_v1 = vpop.f32.mrf.mxu1 }
 0x1e7   : > { %v1899_v55 = vadd.f32 %v1893_v1, %v1732_v49 }
 0x1e8   : > { %v1824_v2 = vpop.f32.mrf.mxu0  ;;  %v4817_v44 = vpop.f32.mrf.mxu1 }
 0x1eb   : > { %v1995_v33 = vpop.f32.mrf.mxu0  ;;  %v2066_v36 = vpop.f32.mrf.mxu1 }
 0x1ec   : > { %v2072_v29 = vadd.f32 %v2066_v36, %v1899_v55 }
 0x1ed   : > { %v1997_v45 = vpop.f32.mrf.mxu0  ;;  %v4822_v46 = vpop.f32.mrf.mxu1 }
 0x1ee   : > { %v1730_v46 = vadd.f32 %v1655_v42, %v1563_v34 }
 0x1ef   : > { %v2165_v47 = vpop.f32.mrf.mxu0  ;;  %v2236_v48 = vpop.f32.mrf.mxu1 }
 0x1f0   : > { %v1897_v30 = vadd.f32 %v1822_v32, %v1730_v46  ;;  %v2242_v38 = vadd.f32 %v2236_v48, %v2072_v29  ;;  %v4442_v29 = vstv %s4562_s14 }
 0x1f1   : > { %v2167_v50 = vpop.f32.mrf.mxu0  ;;  %v4827_v51 = vpop.f32.mrf.mxu1 }
 0x1f2   : > { %v1564_v51 = vadd.f32 %v1490_v39, %v1397_v43 }
 0x1f3   : > { %v2332_v52 = vpop.f32.mrf.mxu0  ;;  %v2403_v53 = vpop.f32.mrf.mxu1 }
 0x1f4   : > { %v1731_v31 = vadd.f32 %v1657_v62, %v1564_v51  ;;  %v2409_v12 = vadd.f32 %v2403_v53, %v2242_v38 }
 0x1f5   : > { %v2334_v59 = vpop.f32.mrf.mxu0  ;;  %v4832_v60 = vpop.f32.mrf.mxu1 }
 0x1f6   : > { %v2070_v60 = vadd.f32 %v1995_v33, %v1897_v30  ;;  %v1898_v63 = vadd.f32 %v1824_v2, %v1731_v31 }
 0x1f7   : > { %v2570_v61 = vpop.f32.mrf.mxu1  ;;  %v2499_v4 = vpop.f32.mrf.mxu0 }
 0x1f8   : > { %v2240_v37 = vadd.f32 %v2165_v47, %v2070_v60  ;;  %v2576_v39 = vadd.f32 %v2570_v61, %v2409_v12  ;;  %v4435_v60 = vstv %s212_s13 }
 0x1f9   : > { %v4837_v5 = vpop.f32.mrf.mxu1  ;;  %v2501_v9 = vpop.f32.mrf.mxu0 }
 0x1fa   : > { %v2071_v5 = vadd.f32 %v1997_v45, %v1898_v63  ;;  %v2407_v8 = vadd.f32 %v2332_v52, %v2240_v37 }
 0x1fc   : > { %v2241_v42 = vadd.f32 %v2167_v50, %v2071_v5 }
 0x1fe   : > { %v2408_v32 = vadd.f32 %v2334_v59, %v2241_v42 }
 0x1ff   : > { %v2666_v10 = vpop.f32.mrf.mxu0  ;;  %v2737_v11 = vpop.f32.mrf.mxu1 }
 0x200   : > { %v2743_v14 = vadd.f32 %v2737_v11, %v2576_v39  ;;  %v2575_v36 = vadd.f32 %v2501_v9, %v2408_v32 }
 0x201   : > { %v2668_v56 = vpop.f32.mrf.mxu0  ;;  %v4842_v17 = vpop.f32.mrf.mxu1 }
 0x202   : > { %v2574_v17 = vadd.f32 %v2499_v4, %v2407_v8  ;;  %v2742_v45 = vadd.f32 %v2668_v56, %v2575_v36 }
 0x204   : > { %v2839_v57 = vpop.f32.mrf.mxu0  ;;  %v2910_v58 = vpop.f32.mrf.mxu1  ;;  %v2741_v1 = vadd.f32 %v2666_v10, %v2574_v17 }
 0x205   : > { %v2916_v6 = vadd.f32 %v2910_v58, %v2743_v14 }
 0x206   : > { %v2841_v15 = vpop.f32.mrf.mxu0  ;;  %v4847_v18 = vpop.f32.mrf.mxu1  ;;  %v2914_v2 = vadd.f32 %v2839_v57, %v2741_v1 }
 0x207   : > { %v2915_v50 = vadd.f32 %v2841_v15, %v2742_v45 }
 0x208   : > { %v3009_v21 = vpop.f32.mrf.mxu0  ;;  %v3080_v22 = vpop.f32.mrf.mxu1 }
 0x209   : > { %v3084_v18 = vadd.f32 %v3009_v21, %v2914_v2  ;;  %v3086_v19 = vadd.f32 %v3080_v22, %v2916_v6 }
 0x20a   : > { %v3011_v24 = vpop.f32.mrf.mxu0  ;;  %v4852_v3 = vpop.f32.mrf.mxu1 }
 0x20b   : > { %v3085_v59 = vadd.f32 %v3011_v24, %v2915_v50 }
 0x20c   : > { %v3176_v26 = vpop.f32.mrf.mxu0  ;;  %v3247_v25 = vpop.f32.mrf.mxu1 }
 0x20d   : > { %v3251_v20 = vadd.f32 %v3176_v26, %v3084_v18  ;;  %v3253_v23 = vadd.f32 %v3247_v25, %v3086_v19 }
 0x20e   : > { %v3178_v44 = vpop.f32.mrf.mxu0  ;;  %v4857_v28 = vpop.f32.mrf.mxu1 }
 0x20f   : > { %v3252_v9 = vadd.f32 %v3178_v44, %v3085_v59 }
 0x210   : > { %v3414_v27 = vpop.f32.mrf.mxu1  ;;  %v3343_v54 = vpop.f32.mrf.mxu0 }
 0x211   : > { %v3420_v10 = vadd.f32 %v3414_v27, %v3253_v23  ;;  %v3418_v11 = vadd.f32 %v3343_v54, %v3251_v20 }
 0x212   : > { %v4862_v16 = vpop.f32.mrf.mxu1  ;;  %v3345_v0 = vpop.f32.mrf.mxu0 }
 0x213   : > { %v3419_v56 = vadd.f32 %v3345_v0, %v3252_v9 }
 0x217   : > { %v3510_v7 = vpop.f32.mrf.mxu0  ;;  %v3581_v35 = vpop.f32.mrf.mxu1 }
 0x218   : > { %v3585_v57 = vadd.f32 %v3510_v7, %v3418_v11  ;;  %v3587_v58 = vadd.f32 %v3581_v35, %v3420_v10 }
 0x219   : > { %v3512_v41 = vpop.f32.mrf.mxu0  ;;  %v4867_v13 = vpop.f32.mrf.mxu1 }
 0x21a   : > { %v3586_v26 = vadd.f32 %v3512_v41, %v3419_v56 }
 0x21c   : > { %v3683_v62 = vpop.f32.mrf.mxu0  ;;  %v3754_v33 = vpop.f32.mrf.mxu1 }
 0x21d   : > { %v3758_v21 = vadd.f32 %v3683_v62, %v3585_v57  ;;  %v3760_v22 = vadd.f32 %v3754_v33, %v3587_v58 }
 0x21e   : > { %v3685_v47 = vpop.f32.mrf.mxu0  ;;  %v4872_v48 = vpop.f32.mrf.mxu1 }
 0x21f   : > { %v3759_v49 = vadd.f32 %v3685_v47, %v3586_v26 }
 0x220   : > { %v3853_v52 = vpop.f32.mrf.mxu0  ;;  %v3924_v53 = vpop.f32.mrf.mxu1 }
 0x221   : > { %v3928_v28 = vadd.f32 %v3853_v52, %v3758_v21  ;;  %v3930_v46 = vadd.f32 %v3924_v53, %v3760_v22 }
 0x222   : > { %v3855_v61 = vpop.f32.mrf.mxu0  ;;  %v4877_v4 = vpop.f32.mrf.mxu1 }
 0x223   : > { %v3929_v54 = vadd.f32 %v3855_v61, %v3759_v49 }
 0x224   : > { %v4020_v3 = vpop.f32.mrf.mxu0  ;;  %v4091_v34 = vpop.f32.mrf.mxu1 }
 0x225   : > { %v4095_v27 = vadd.f32 %v4020_v3, %v3928_v28  ;;  %v4097_v51 = vadd.f32 %v4091_v34, %v3930_v46 }
 0x226   : > { %v4022_v40 = vpop.f32.mrf.mxu0  ;;  %v4882_v43 = vpop.f32.mrf.mxu1 }
 0x227   : > { %v4096_v16 = vadd.f32 %v4022_v40, %v3929_v54 }
 0x228   : > { %v4258_v15 = vpop.f32.mrf.mxu1  ;;  %v4187_v25 = vpop.f32.mrf.mxu0 }
 0x229   : > { %v4264_v30 = vadd.f32 %v4258_v15, %v4097_v51  ;;  %v4262_v55 = vadd.f32 %v4187_v25, %v4095_v27 }
 0x22a   : > { %v4887_v24 = vpop.f32.mrf.mxu1  ;;  %v4189_v44 = vpop.f32.mrf.mxu0 }
 0x22b   : > { %v4263_v38 = vadd.f32 %v4189_v44, %v4096_v16 }
 0x22f   : > { %v4354_v31 = vpop.f32.mrf.mxu0  ;;  %v4425_v63 = vpop.f32.mrf.mxu1 }
 0x230   : > { %v4429_v0 = vadd.f32 %v4354_v31, %v4262_v55  ;;  %v4431_v37 = vadd.f32 %v4425_v63, %v4264_v30 }
 0x231   : > { %v4356_v5 = vpop.f32.mrf.mxu0  ;;  %v4892_v7 = vpop.f32.mrf.mxu1 }
 0x232   : > { %vm4432_vm11 = vcmp.ge.f32.partialorder %v4429_v0, 0.0  ;;  %v4436_v35 = vmul.f32 %v4435_v60, %v4429_v0  ;;  %v4443_v8 = vmul.f32 %v4442_v29, %v4429_v0  ;;  %vm4434_vm12 = vcmp.ge.f32.partialorder %v4431_v37, 0.0 }
 0x233   : > { %v4438_v12 = vmul.f32 %v4435_v60, %v4431_v37  ;;  %v4445_v42 = vmul.f32 %v4442_v29, %v4431_v37  ;;  %v4430_v41 = vadd.f32 %v4356_v5, %v4263_v38 }
 0x234   : > { %v4446_v13 = vsel %vm4432_vm11, %v4429_v0, %v4443_v8  ;;  %v4439_v32 = vsel %vm4432_vm11, %v4429_v0, %v4436_v35 }
 0x235   : > { %v4452_v39 = vrot.slane %v4446_v13, 4  ;;  %v4448_v17 = vsel %vm4434_vm12, %v4431_v37, %v4445_v42  ;;  %vm4433_vm13 = vcmp.ge.f32.partialorder %v4430_v41, 0.0  ;;  %v4437_v14 = vmul.f32 %v4435_v60, %v4430_v41 }
 0x236   : > { %v4454_v1 = vrot.slane %v4448_v17, 4  ;;  %v4444_v62 = vmul.f32 %v4442_v29, %v4430_v41  ;;  %v4441_v36 = vsel %vm4434_vm12, %v4431_v37, %v4438_v12 }
 0x237   : > { %v4458_v33 = vsub.f32 %v4439_v32, %v4452_v39  ;;  %v4440_v18 = vsel %vm4433_vm13, %v4430_v41, %v4437_v14 }
 0x238   : > { %v4460_v2 = vsub.f32 %v4441_v36, %v4454_v1  ;;  %v4447_v6 = vsel %vm4433_vm13, %v4430_v41, %v4444_v62 }
 0x239   : > { %v4712_v47 = vmul.f32 -1.442695, %v4458_v33  ;;  %v4453_v48 = vrot.slane %v4447_v6, 4 }
 0x23a   : > { %v4714_v45 = vmul.f32 -1.442695, %v4460_v2 }
 0x23b   : > { %4927 = vpow2.f32 %v4712_v47  ;;  %v4459_v19 = vsub.f32 %v4440_v18, %v4453_v48 }
 0x23c   : > { %4929 = vpow2.f32 %v4714_v45 }
 0x23d   : > { %v4713_v52 = vmul.f32 -1.442695, %v4459_v19 }
 0x23f   : > { %4931 = vpow2.f32 %v4713_v52 }
 0x248   : > { %v4928_v53 = vpop.eup %4927 }
 0x249   : > { %v4930_v50 = vpop.eup %4929  ;;  %v4470_v20 = vadd.f32 1.0, %v4928_v53 }
 0x24a   : > { %v4472_v23 = vadd.f32 1.0, %v4930_v50 }
 0x24c   : > { %v4932_v61 = vpop.eup %4931  ;;  %4933 = vrcp.f32 %v4472_v23 }
 0x24d   : > { %v4471_v4 = vadd.f32 1.0, %v4932_v61  ;;  %4935 = vrcp.f32 %v4470_v20 }
 0x24f   : > { %4937 = vrcp.f32 %v4471_v4 }
 0x259   : > { %v4934_v59 = vpop.eup %4933 }
 0x25a   : > { %4484 = vst [vmem:[%s211_s20 + $0x8] sm:$0xf] %v4934_v59  ;;  %v4936_v10 = vpop.eup %4935 }
 0x25c   : > { %v4938_v11 = vpop.eup %4937 }
 0x25d   : > { %v4481_v3 = vcombine.low %v4936_v10, %v4938_v11 }
 0x25f   : > { %4483 = vst [vmem:[%s211_s20] sm:$0xff] %v4481_v3 }
 0x260 PF: > { %s15_s15 = sadd.s32 1, %s4964_s15  }
 0x261   : > { %p12_p1 = scmp.ge.s32.totalorder %s15_s15, 4  }
 0x263   :  { %14 = sbr.rel (!%p12_p1) target bundleno = 1 (0x1), region = 95 }
 0x268   :  { %4506 = vsyncpa [#allocation3], 1 }
 0x269   :  { %4508 = vsyncpa [#allocation3 + $0x1], 1 }

// kernel: ricd_forward.1
= control target key start
LH: loop header
LB: loop body
LE: loop exit
PB: predicated region body
PF: predicated region fallthrough
CT: control target
= control target key end

     0   :  { %9 = vsyncpa [#allocation3], 0  ;;  %s5136_s15 = smov 0   ;;  %s5695_s0 = inlined_call_operand.vmem [shape: f32[2,4,512], index: 0, kind: input, shape index: {}]   ;;  %s5696_s1 = inlined_call_operand.vmem [shape: f32[25,8,4], index: 1, kind: input, shape index: {}]   ;;  %s5697_s2 = inlined_call_operand.vmem [shape: f32[8,1], index: 2, kind: input, shape index: {}]   ;;  %s5698_s3 = inlined_call_operand.vmem [shape: f32[2], index: 3, kind: input, shape index: {}]   ;;  %s5699_s4 = inlined_call_operand.vmem [shape: f32[2,4,384], index: 4, kind: output, shape index: {}]  }
   0x1 LB: > { %s4653_s16 = sadd.s32 4294967295, %s5081_s15   ;;  %p4655_p0 = scmp.ge.s32.totalorder %s5081_s15, 1  ;;  %s5081_s15 = sphi %s5136_s15, %s15_s15  }
   0x2   : > { %p135_p1 = scmp.lt.s32.totalorder %s5081_s15, 3  ;;  %s154_s19 = sshll.u32 %s5698_s3, 4  ;;  %s155_s19 = int_to_ptr.vmem [resolvable:$true] %s154_s19 }
   0x3   : > { %p5003_p3 = scmp.eq.s32.totalorder %s4653_s16, 0  ;;  %s5056_s21 = scalar_lea.vmem %s155_s19, 16 }
   0x4   : > { %p5147_p2 = pnand %p4655_p0, %p135_p1  ;;  %p5057_p6 = scmp.ne.s32.totalorder %s155_s19, %s5056_s21 }
   0x5   : > { %p5064_p10 = scmp.lt.s32.totalorder %s155_s19, %s155_s19  ;;  %p5065_p11 = scmp.lt.s32.totalorder %s5056_s21, %s5056_s21 }
   0x6   : > { %p4999_p4 = pneg %p5147_p2 }
   0x7   : > { %p5066_p12 = por %p5065_p11, %p5064_p10 }
   0x8   : > { %p5000_p5 = pnand %p5003_p3, %p4999_p4 }
   0xa   : > { %p5058_p7 = pneg %p5000_p5 }
   0xc   : > { %p5059_p8 = pnand %p5058_p7, %p5057_p6 }
   0xe   : > { %p5060_p9 = pneg %p5059_p8 }
  0x10   : > { %p5067_p13 = pnand %p5066_p12, %p5060_p9 }
  0x12   : > { %5070 = shalt.err (!%p5067_p13)
}
  0x13   : > { %s5083_s22 = smov [#allocation2]   ;;  %175 = sbr.rel (%p5147_p2) target bundleno = 579 (0x243), region = 36 }
  0x14   : > { %5002 = dma.vmem_to_smem (!%p5000_p5), %s155_s19, 16, %s5083_s22, [#allocation3]  }
  0x18   : > { %5076 = dma.done.wait (%p5003_p3), [#allocation3], 16  }
  0x19   : > { %5078 = vsyncadd (%p5003_p3), [#allocation3], 4294967280 }
  0x1a   : > { %181 = sfence }
  0x1b   : > { %p202_p0 = scmp.lt.s32.totalorder %s4653_s16, 1  ;;  %v5084_v0 = vmov 0.0   ;;  %vm5085_vm0 = vmmov 0   ;;  %vm230_vm1 = vcmask 1043456   ;;  %s5086_s27 = smov 127   ;;  %v222_v5 = vld [vmem:[%s5696_s1] sm:$0xff] }
  0x1c   : > { %4869 = vmatprep.subr.mxu1 %v5084_v0  ;;  %301 = vmatprep.mubr.f32.mxu0 %v5084_v0  ;;  %vm226_vm2 = vcmask 31744   ;;  %s5087_s30 = smov 126   ;;  %s5088_s5 = smov 125   ;;  %vm397_vm3 = vcmask 1039360   ;;  %vm570_vm4 = vcmask 1031168   ;;  %v4669_v16 = vld [vmem:[%s5696_s1 + $0x8] sm:$0xff] }
  0x1d   : > { %s5702_s16 = smov (!%p202_p0, %s4653_s16), 1  ;;  %4871 = vmatprep.mubr.msk.f32.mxu1 %vm5085_vm0, %v5084_v0  ;;  %s5089_s6 = smov 124   ;;  %vm743_vm5 = vcmask 1022976   ;;  %v4675_v21 = vld [vmem:[%s5696_s1 + $0x10] sm:$0xff]  ;;  %v4681_v29 = vld [vmem:[%s5696_s1 + $0x18] sm:$0xff]  ;;  %vm916_vm6 = vcmask 1014784  }
  0x1e   : > { %s4818_s23 = sshll.u32 %s5702_s16, 4  ;;  %s5090_s7 = smov 108   ;;  %v4687_v37 = vld [vmem:[%s5696_s1 + $0x20] sm:$0xff]  ;;  %vm1089_vm7 = vcmask 883712   ;;  %v4693_v45 = vld [vmem:[%s5696_s1 + $0x28] sm:$0xff]  ;;  %v5106_v46 = vmov 0  }
  0x1f   : > { %s206_s26 = scalar_lea.vmem %s5695_s0, %s4818_s23  ;;  %s5091_s8 = smov 107   ;;  %5041 = vset.pattern.permute.xlu0 %v5106_v46  ;;  %vm1262_vm8 = vcmask 875520   ;;  %v4699_v54 = vld [vmem:[%s5696_s1 + $0x30] sm:$0xff]  ;;  %vm1435_vm9 = vcmask 867328   ;;  %v4705_v62 = vld [vmem:[%s5696_s1 + $0x38] sm:$0xff]  ;;  %vm1608_vm10 = vcmask 859136  }
  0x20   : > { %v5168_v1 = vld [vmem:[%s206_s26 + $0x8] sm:$0xff]  ;;  %v5170_v2 = vld [vmem:[%s206_s26] sm:$0xff]  ;;  %s5092_s9 = smov 106   ;;  %s5093_s10 = smov 105   ;;  %vm1781_vm11 = vcmask 850944   ;;  %vm1954_vm12 = vcmask 719872  }
  0x21   : > { %v221_v3 = vld [vmem:[%s206_s26 + $0x8] sm:$0xf]  ;;  %393 = vrot.lane.b32.xlu0 %v5168_v1, %s5086_s27  ;;  %389 = vrot.lane.b32.xlu1 %v5170_v2, %s5086_s27  ;;  %v5176_v4 = vcombine.high %v5170_v2, %v5170_v2  ;;  %v5190_v6 = vcombine.high %v5168_v1, %v5168_v1  ;;  %s5094_s11 = smov 104   ;;  %s5095_s12 = smov 88   ;;  %vm2127_vm13 = vcmask 711680   ;;  %vm2300_vm14 = vcmask 703488  }
  0x22   : > { %4870 = vmatpush3.msk.msra.mxu1 %vm230_vm1, %v221_v3  ;;  %s5096_s13 = smov 87   ;;  %s5097_s14 = smov 86   ;;  %vm2473_vm15 = vcmask 695296  }
  0x23   : > { %4664 = vmatprep.subr.msk.mxu0 %vm230_vm1, %v5176_v4  ;;  %4874 = vmatprep.subr.mxu1 %v5084_v0  ;;  %s5098_s17 = smov 85   ;;  %s5099_s18 = smov 84  }
  0x24   : > { %4665 = vmatpush1.msk.msra.mxu0 %vm230_vm1, %v5170_v2  ;;  %4872 = vmatmul.mubr.msk.f32.vlgmr.msra.gmra.mxu1 %vm226_vm2, %v222_v5  ;;  %s5100_s19 = smov 68   ;;  %s5101_s20 = smov 67  }
  0x25   : > { %566 = vrot.lane.b32.xlu0 %v5168_v1, %s5087_s30  ;;  %564 = vrot.lane.b32.xlu1 %v5176_v4, %s5087_s30  ;;  %s5102_s21 = smov 66   ;;  %s5103_s26 = smov 65  }
  0x26   : > { %4666 = vmatmul.mubr.msk.f32.vlgmr.msra.gmra.mxu0 %vm226_vm2, %v222_v5  ;;  %4876 = vmatprep.mubr.msk.f32.mxu1 %vm5085_vm0, %v5084_v0  ;;  %s5104_s29 = smov 64  }
  0x27   : > { %474 = vmatprep.mubr.f32.mxu0 %v5084_v0 }
  0x29   : > { %395 = vrot.lane.b32.xlu1 %v5190_v6, %s5086_s27  ;;  %391 = vrot.lane.b32.xlu0 %v5176_v4, %s5086_s27 }
  0x2d   : > { %737 = vrot.lane.b32.xlu1 %v5176_v4, %s5088_s5  ;;  %562 = vrot.lane.b32.xlu0 %v5170_v2, %s5087_s30 }
  0x31   : > { %568 = vrot.lane.b32.xlu1 %v5190_v6, %s5087_s30  ;;  %739 = vrot.lane.b32.xlu0 %v5168_v1, %s5088_s5 }
  0x35   : > { %910 = vrot.lane.b32.xlu1 %v5176_v4, %s5089_s6  ;;  %735 = vrot.lane.b32.xlu0 %v5170_v2, %s5088_s5 }
  0x39   : > { %741 = vrot.lane.b32.xlu1 %v5190_v6, %s5088_s5  ;;  %912 = vrot.lane.b32.xlu0 %v5168_v1, %s5089_s6  ;;  %s212_s5 = sld [smem:[#allocation2]] }
  0x3d   : > { %1083 = vrot.lane.b32.xlu1 %v5176_v4, %s5090_s7  ;;  %908 = vrot.lane.b32.xlu0 %v5170_v2, %s5089_s6 }
  0x41   : > { %914 = vrot.lane.b32.xlu1 %v5190_v6, %s5089_s6  ;;  %1085 = vrot.lane.b32.xlu0 %v5168_v1, %s5090_s7  ;;  %s5105_s6 = smov 48  }
  0x45   : > { %1256 = vrot.lane.b32.xlu1 %v5176_v4, %s5091_s8  ;;  %1081 = vrot.lane.b32.xlu0 %v5170_v2, %s5090_s7 }
  0x49   : > { %1087 = vrot.lane.b32.xlu1 %v5190_v6, %s5090_s7  ;;  %1258 = vrot.lane.b32.xlu0 %v5168_v1, %s5091_s8  ;;  %s4994_s7 = smul.u32 12, %s5702_s16 }
  0x4d   : > { %1429 = vrot.lane.b32.xlu1 %v5176_v4, %s5092_s9  ;;  %1254 = vrot.lane.b32.xlu0 %v5170_v2, %s5091_s8 }
  0x51   : > { %1260 = vrot.lane.b32.xlu1 %v5190_v6, %s5091_s8  ;;  %1431 = vrot.lane.b32.xlu0 %v5168_v1, %s5092_s9 }
  0x55   : > { %1602 = vrot.lane.b32.xlu1 %v5176_v4, %s5093_s10  ;;  %1427 = vrot.lane.b32.xlu0 %v5170_v2, %s5092_s9 }
  0x59   : > { %1433 = vrot.lane.b32.xlu1 %v5190_v6, %s5092_s9  ;;  %1604 = vrot.lane.b32.xlu0 %v5168_v1, %s5093_s10  ;;  %s5107_s9 = smov 47  }
  0x5d   : > { %1775 = vrot.lane.b32.xlu1 %v5176_v4, %s5094_s11  ;;  %1600 = vrot.lane.b32.xlu0 %v5170_v2, %s5093_s10 }
  0x61   : > { %1606 = vrot.lane.b32.xlu1 %v5190_v6, %s5093_s10  ;;  %1777 = vrot.lane.b32.xlu0 %v5168_v1, %s5094_s11  ;;  %s211_s10 = scalar_lea.vmem %s5699_s4, %s4994_s7 }
  0x65   : > { %1948 = vrot.lane.b32.xlu1 %v5176_v4, %s5095_s12  ;;  %1773 = vrot.lane.b32.xlu0 %v5170_v2, %s5094_s11 }
  0x69   : > { %1779 = vrot.lane.b32.xlu1 %v5190_v6, %s5094_s11  ;;  %1950 = vrot.lane.b32.xlu0 %v5168_v1, %s5095_s12 }
  0x6d   : > { %2121 = vrot.lane.b32.xlu1 %v5176_v4, %s5096_s13  ;;  %1946 = vrot.lane.b32.xlu0 %v5170_v2, %s5095_s12 }
  0x71   : > { %1952 = vrot.lane.b32.xlu1 %v5190_v6, %s5095_s12  ;;  %2123 = vrot.lane.b32.xlu0 %v5168_v1, %s5096_s13  ;;  %s5108_s12 = smov 46  }
  0x75   : > { %2294 = vrot.lane.b32.xlu1 %v5176_v4, %s5097_s14  ;;  %2119 = vrot.lane.b32.xlu0 %v5170_v2, %s5096_s13 }
  0x79   : > { %2125 = vrot.lane.b32.xlu1 %v5190_v6, %s5096_s13  ;;  %2296 = vrot.lane.b32.xlu0 %v5168_v1, %s5097_s14 }
  0x7d   : > { %2467 = vrot.lane.b32.xlu1 %v5176_v4, %s5098_s17  ;;  %2292 = vrot.lane.b32.xlu0 %v5170_v2, %s5097_s14 }
  0x81   : > { %2298 = vrot.lane.b32.xlu1 %v5190_v6, %s5097_s14  ;;  %2469 = vrot.lane.b32.xlu0 %v5168_v1, %s5098_s17 }
  0x85   : > { %2640 = vrot.lane.b32.xlu1 %v5176_v4, %s5099_s18  ;;  %2465 = vrot.lane.b32.xlu0 %v5170_v2, %s5098_s17 }
  0x89   : > { %2471 = vrot.lane.b32.xlu1 %v5190_v6, %s5098_s17  ;;  %2642 = vrot.lane.b32.xlu0 %v5168_v1, %s5099_s18  ;;  %s5109_s17 = smov 45  }
  0x8d   : > { %2813 = vrot.lane.b32.xlu1 %v5176_v4, %s5100_s19  ;;  %2638 = vrot.lane.b32.xlu0 %v5170_v2, %s5099_s18 }
  0x91   : > { %2644 = vrot.lane.b32.xlu1 %v5190_v6, %s5099_s18  ;;  %2815 = vrot.lane.b32.xlu0 %v5168_v1, %s5100_s19 }
  0x93   : > { %v394_v7 = vpop.permute.xlu0 %393  ;;  %v390_v8 = vpop.permute.xlu1 %389 }
  0x95   : > { %2986 = vrot.lane.b32.xlu1 %v5176_v4, %s5101_s20  ;;  %2811 = vrot.lane.b32.xlu0 %v5170_v2, %s5100_s19 }
  0x97   : > { %v567_v9 = vpop.permute.xlu0 %566  ;;  %v565_v10 = vpop.permute.xlu1 %564 }
  0x98   : > { %v572_v17 = vsel %vm570_vm4, %v565_v10, %v567_v9 }
  0x99   : > { %2817 = vrot.lane.b32.xlu1 %v5190_v6, %s5100_s19  ;;  %2988 = vrot.lane.b32.xlu0 %v5168_v1, %s5101_s20 }
  0x9b   : > { %v396_v11 = vpop.permute.xlu1 %395  ;;  %v392_v12 = vpop.permute.xlu0 %391 }
  0x9c   : > { %v400_v13 = vsel %vm397_vm3, %v394_v7, %v396_v11  ;;  %v398_v14 = vsel %vm397_vm3, %v390_v8, %v392_v12  ;;  %v399_v15 = vsel %vm397_vm3, %v392_v12, %v394_v7  ;;  %v4711_v11 = vld [vmem:[%s5696_s1 + $0x40] sm:$0xff]  ;;  %vm2646_vm3 = vcmask 687104  }
  0x9d   : > { %3159 = vrot.lane.b32.xlu1 %v5176_v4, %s5102_s21  ;;  %2984 = vrot.lane.b32.xlu0 %v5170_v2, %s5101_s20 }
  0x9e   : > { %4670 = vmatprep.subr.msk.mxu0 %vm230_vm1, %v399_v15  ;;  %4875 = vmatpush3.msk.msra.mxu1 %vm230_vm1, %v400_v13 }
  0x9f   : > { %4671 = vmatpush1.msk.msra.mxu0 %vm230_vm1, %v398_v14  ;;  %v738_v18 = vpop.permute.xlu1 %737  ;;  %v563_v19 = vpop.permute.xlu0 %562  ;;  %4879 = vmatprep.subr.mxu1 %v5084_v0 }
  0xa0   : > { %v571_v20 = vsel %vm570_vm4, %v563_v19, %v565_v10  ;;  %4676 = vmatprep.subr.msk.mxu0 %vm230_vm1, %v572_v17  ;;  %4672 = vmatmul.mubr.msk.f32.vlgmr.msra.gmra.mxu0 %vm226_vm2, %v4669_v16  ;;  %v4717_v19 = vld [vmem:[%s5696_s1 + $0x48] sm:$0xff] }
  0xa1   : > { %2990 = vrot.lane.b32.xlu1 %v5190_v6, %s5101_s20  ;;  %3161 = vrot.lane.b32.xlu0 %v5168_v1, %s5102_s21  ;;  %s5110_s20 = smov 44  }
  0xa2   : > { %4677 = vmatpush1.msk.msra.mxu0 %vm230_vm1, %v571_v20  ;;  %4877 = vmatmul.mubr.msk.f32.vlgmr.msra.gmra.mxu1 %vm226_vm2, %v4669_v16 }
  0xa3   : > { %v569_v22 = vpop.permute.xlu1 %568  ;;  %v740_v23 = vpop.permute.xlu0 %739  ;;  %647 = vmatprep.mubr.f32.mxu0 %v5084_v0  ;;  %4881 = vmatprep.mubr.msk.f32.mxu1 %vm5085_vm0, %v5084_v0 }
  0xa4   : > { %v573_v24 = vsel %vm570_vm4, %v567_v9, %v569_v22  ;;  %v745_v25 = vsel %vm743_vm5, %v738_v18, %v740_v23  ;;  %4678 = vmatmul.mubr.msk.f32.vlgmr.msra.gmra.mxu0 %vm226_vm2, %v4675_v21  ;;  %vm2819_vm4 = vcmask 556032  }
  0xa5   : > { %3332 = vrot.lane.b32.xlu1 %v5176_v4, %s5103_s26  ;;  %3157 = vrot.lane.b32.xlu0 %v5170_v2, %s5102_s21 }
  0xa6   : > { %4880 = vmatpush3.msk.msra.mxu1 %vm230_vm1, %v573_v24  ;;  %4682 = vmatprep.subr.msk.mxu0 %vm230_vm1, %v745_v25 }
  0xa7   : > { %v911_v26 = vpop.permute.xlu1 %910  ;;  %v736_v27 = vpop.permute.xlu0 %735  ;;  %4884 = vmatprep.subr.mxu1 %v5084_v0  ;;  %4882 = vmatmul.mubr.msk.f32.vlgmr.msra.gmra.mxu1 %vm226_vm2, %v4675_v21 }
  0xa8   : > { %v744_v28 = vsel %vm743_vm5, %v736_v27, %v738_v18  ;;  %820 = vmatprep.mubr.f32.mxu0 %v5084_v0  ;;  %4886 = vmatprep.mubr.msk.f32.mxu1 %vm5085_vm0, %v5084_v0 }
  0xa9   : > { %3163 = vrot.lane.b32.xlu1 %v5190_v6, %s5102_s21  ;;  %3334 = vrot.lane.b32.xlu0 %v5168_v1, %s5103_s26 }
  0xaa   : > { %4683 = vmatpush1.msk.msra.mxu0 %vm230_vm1, %v744_v28 }
  0xab   : > { %v742_v30 = vpop.permute.xlu1 %741  ;;  %v913_v31 = vpop.permute.xlu0 %912  ;;  %4684 = vmatmul.mubr.msk.f32.vlgmr.msra.gmra.mxu0 %vm226_vm2, %v4681_v29 }
  0xac   : > { %v746_v32 = vsel %vm743_vm5, %v740_v23, %v742_v30  ;;  %v918_v33 = vsel %vm916_vm6, %v911_v26, %v913_v31  ;;  %993 = vmatprep.mubr.f32.mxu0 %v5084_v0  ;;  %vm2992_vm5 = vcmask 547840  }
  0xad   : > { %3505 = vrot.lane.b32.xlu1 %v5176_v4, %s5104_s29  ;;  %3330 = vrot.lane.b32.xlu0 %v5170_v2, %s5103_s26 }
  0xae   : > { %4885 = vmatpush3.msk.msra.mxu1 %vm230_vm1, %v746_v32  ;;  %4688 = vmatprep.subr.msk.mxu0 %vm230_vm1, %v918_v33  ;;  %v4729_v33 = vld [vmem:[%s5696_s1 + $0x58] sm:$0xff] }
  0xaf   : > { %v1084_v34 = vpop.permute.xlu1 %1083  ;;  %v909_v35 = vpop.permute.xlu0 %908  ;;  %4889 = vmatprep.subr.mxu1 %v5084_v0  ;;  %4887 = vmatmul.mubr.msk.f32.vlgmr.msra.gmra.mxu1 %vm226_vm2, %v4681_v29 }
  0xb0   : > { %v917_v36 = vsel %vm916_vm6, %v909_v35, %v911_v26  ;;  %4891 = vmatprep.mubr.msk.f32.mxu1 %vm5085_vm0, %v5084_v0 }
  0xb1   : > { %3336 = vrot.lane.b32.xlu1 %v5190_v6, %s5103_s26  ;;  %3507 = vrot.lane.b32.xlu0 %v5168_v1, %s5104_s29 }
  0xb2   : > { %4689 = vmatpush1.msk.msra.mxu0 %vm230_vm1, %v917_v36 }
  0xb3   : > { %v915_v38 = vpop.permute.xlu1 %914  ;;  %v1086_v39 = vpop.permute.xlu0 %1085  ;;  %4690 = vmatmul.mubr.msk.f32.vlgmr.msra.gmra.mxu0 %vm226_vm2, %v4687_v37 }
  0xb4   : > { %v919_v40 = vsel %vm916_vm6, %v913_v31, %v915_v38  ;;  %v1091_v41 = vsel %vm1089_vm7, %v1084_v34, %v1086_v39  ;;  %1166 = vmatprep.mubr.f32.mxu0 %v5084_v0  ;;  %vm3165_vm6 = vcmask 539648  }
  0xb5   : > { %3678 = vrot.lane.b32.xlu1 %v5176_v4, %s5105_s6  ;;  %3503 = vrot.lane.b32.xlu0 %v5170_v2, %s5104_s29 }
  0xb6   : > { %4890 = vmatpush3.msk.msra.mxu1 %vm230_vm1, %v919_v40  ;;  %4694 = vmatprep.subr.msk.mxu0 %vm230_vm1, %v1091_v41  ;;  %v4735_v41 = vld [vmem:[%s5696_s1 + $0x60] sm:$0xff] }
  0xb7   : > { %v1257_v42 = vpop.permute.xlu1 %1256  ;;  %v1082_v43 = vpop.permute.xlu0 %1081  ;;  %4894 = vmatprep.subr.mxu1 %v5084_v0  ;;  %4892 = vmatmul.mubr.msk.f32.vlgmr.msra.gmra.mxu1 %vm226_vm2, %v4687_v37 }
  0xb8   : > { %v1090_v44 = vsel %vm1089_vm7, %v1082_v43, %v1084_v34  ;;  %4896 = vmatprep.mubr.msk.f32.mxu1 %vm5085_vm0, %v5084_v0 }
  0xb9   : > { %3509 = vrot.lane.b32.xlu1 %v5190_v6, %s5104_s29  ;;  %3680 = vrot.lane.b32.xlu0 %v5168_v1, %s5105_s6 }
  0xba   : > { %4695 = vmatpush1.msk.msra.mxu0 %vm230_vm1, %v1090_v44 }
  0xbb   : > { %v1088_v47 = vpop.permute.xlu1 %1087  ;;  %v1259_v48 = vpop.permute.xlu0 %1258  ;;  %4696 = vmatmul.mubr.msk.f32.vlgmr.msra.gmra.mxu0 %vm226_vm2, %v4693_v45 }
  0xbc   : > { %v1092_v49 = vsel %vm1089_vm7, %v1086_v39, %v1088_v47  ;;  %v1264_v50 = vsel %vm1262_vm8, %v1257_v42, %v1259_v48  ;;  %1339 = vmatprep.mubr.f32.mxu0 %v5084_v0  ;;  %vm3338_vm7 = vcmask 531456  }
  0xbd   : > { %3851 = vrot.lane.b32.xlu1 %v5176_v4, %s5107_s9  ;;  %3676 = vrot.lane.b32.xlu0 %v5170_v2, %s5105_s6 }
  0xbe   : > { %4895 = vmatpush3.msk.msra.mxu1 %vm230_vm1, %v1092_v49  ;;  %4700 = vmatprep.subr.msk.mxu0 %vm230_vm1, %v1264_v50  ;;  %v4741_v49 = vld [vmem:[%s5696_s1 + $0x68] sm:$0xff] }
  0xbf   : > { %v1430_v51 = vpop.permute.xlu1 %1429  ;;  %v1255_v52 = vpop.permute.xlu0 %1254  ;;  %4899 = vmatprep.subr.mxu1 %v5084_v0  ;;  %4897 = vmatmul.mubr.msk.f32.vlgmr.msra.gmra.mxu1 %vm226_vm2, %v4693_v45 }
  0xc0   : > { %v1263_v53 = vsel %vm1262_vm8, %v1255_v52, %v1257_v42  ;;  %4901 = vmatprep.mubr.msk.f32.mxu1 %vm5085_vm0, %v5084_v0 }
  0xc1   : > { %3682 = vrot.lane.b32.xlu1 %v5190_v6, %s5105_s6  ;;  %3853 = vrot.lane.b32.xlu0 %v5168_v1, %s5107_s9  ;;  %s4663_s6 = sld [smem:[#allocation2 + $0x1]] }
  0xc2   : > { %4701 = vmatpush1.msk.msra.mxu0 %vm230_vm1, %v1263_v53 }
  0xc3   : > { %v1261_v55 = vpop.permute.xlu1 %1260  ;;  %v1432_v56 = vpop.permute.xlu0 %1431  ;;  %4702 = vmatmul.mubr.msk.f32.vlgmr.msra.gmra.mxu0 %vm226_vm2, %v4699_v54 }
  0xc4   : > { %v1265_v57 = vsel %vm1262_vm8, %v1259_v48, %v1261_v55  ;;  %v1437_v58 = vsel %vm1435_vm9, %v1430_v51, %v1432_v56  ;;  %1512 = vmatprep.mubr.f32.mxu0 %v5084_v0  ;;  %vm3511_vm8 = vcmask 523264  }
  0xc5   : > { %4024 = vrot.lane.b32.xlu1 %v5176_v4, %s5108_s12  ;;  %3849 = vrot.lane.b32.xlu0 %v5170_v2, %s5107_s9 }
  0xc6   : > { %4900 = vmatpush3.msk.msra.mxu1 %vm230_vm1, %v1265_v57  ;;  %4706 = vmatprep.subr.msk.mxu0 %vm230_vm1, %v1437_v58  ;;  %v4747_v57 = vld [vmem:[%s5696_s1 + $0x70] sm:$0xff] }
  0xc7   : > { %v1603_v59 = vpop.permute.xlu1 %1602  ;;  %v1428_v60 = vpop.permute.xlu0 %1427  ;;  %4904 = vmatprep.subr.mxu1 %v5084_v0  ;;  %4902 = vmatmul.mubr.msk.f32.vlgmr.msra.gmra.mxu1 %vm226_vm2, %v4699_v54 }
  0xc8   : > { %v1436_v61 = vsel %vm1435_vm9, %v1428_v60, %v1430_v51  ;;  %4906 = vmatprep.mubr.msk.f32.mxu1 %vm5085_vm0, %v5084_v0 }
  0xc9   : > { %3855 = vrot.lane.b32.xlu1 %v5190_v6, %s5107_s9  ;;  %4026 = vrot.lane.b32.xlu0 %v5168_v1, %s5108_s12 }
  0xca   : > { %4707 = vmatpush1.msk.msra.mxu0 %vm230_vm1, %v1436_v61 }
  0xcb   : > { %v1434_v63 = vpop.permute.xlu1 %1433  ;;  %v1605_v3 = vpop.permute.xlu0 %1604  ;;  %4708 = vmatmul.mubr.msk.f32.vlgmr.msra.gmra.mxu0 %vm226_vm2, %v4705_v62 }
  0xcc   : > { %v1438_v5 = vsel %vm1435_vm9, %v1432_v56, %v1434_v63  ;;  %v1610_v7 = vsel %vm1608_vm10, %v1603_v59, %v1605_v3  ;;  %1685 = vmatprep.mubr.f32.mxu0 %v5084_v0  ;;  %vm3684_vm9 = vcmask 392192  }
  0xcd   : > { %4197 = vrot.lane.b32.xlu1 %v5176_v4, %s5109_s17  ;;  %4022 = vrot.lane.b32.xlu0 %v5170_v2, %s5108_s12 }
  0xce   : > { %4905 = vmatpush3.msk.msra.mxu1 %vm230_vm1, %v1438_v5  ;;  %4712 = vmatprep.subr.msk.mxu0 %vm230_vm1, %v1610_v7  ;;  %v4753_v5 = vld [vmem:[%s5696_s1 + $0x78] sm:$0xff] }
  0xcf   : > { %v1776_v8 = vpop.permute.xlu1 %1775  ;;  %v1601_v9 = vpop.permute.xlu0 %1600  ;;  %4909 = vmatprep.subr.mxu1 %v5084_v0  ;;  %4907 = vmatmul.mubr.msk.f32.vlgmr.msra.gmra.mxu1 %vm226_vm2, %v4705_v62 }
  0xd0   : > { %v1609_v10 = vsel %vm1608_vm10, %v1601_v9, %v1603_v59  ;;  %4911 = vmatprep.mubr.msk.f32.mxu1 %vm5085_vm0, %v5084_v0 }
  0xd1   : > { %4028 = vrot.lane.b32.xlu1 %v5190_v6, %s5108_s12  ;;  %4199 = vrot.lane.b32.xlu0 %v5168_v1, %s5109_s17 }
  0xd2   : > { %4713 = vmatpush1.msk.msra.mxu0 %vm230_vm1, %v1609_v10 }
  0xd3   : > { %v1607_v12 = vpop.permute.xlu1 %1606  ;;  %v1778_v13 = vpop.permute.xlu0 %1777  ;;  %4714 = vmatmul.mubr.msk.f32.vlgmr.msra.gmra.mxu0 %vm226_vm2, %v4711_v11 }
  0xd4   : > { %v1611_v14 = vsel %vm1608_vm10, %v1605_v3, %v1607_v12  ;;  %v1783_v15 = vsel %vm1781_vm11, %v1776_v8, %v1778_v13  ;;  %1858 = vmatprep.mubr.f32.mxu0 %v5084_v0  ;;  %vm3857_vm10 = vcmask 384000  }
  0xd5   : > { %4370 = vrot.lane.b32.xlu1 %v5176_v4, %s5110_s20  ;;  %4195 = vrot.lane.b32.xlu0 %v5170_v2, %s5109_s17 }
  0xd6   : > { %4910 = vmatpush3.msk.msra.mxu1 %vm230_vm1, %v1611_v14  ;;  %4718 = vmatprep.subr.msk.mxu0 %vm230_vm1, %v1783_v15  ;;  %v4759_v14 = vld [vmem:[%s5696_s1 + $0x80] sm:$0xff] }
  0xd7   : > { %v1949_v16 = vpop.permute.xlu1 %1948  ;;  %v1774_v17 = vpop.permute.xlu0 %1773  ;;  %4914 = vmatprep.subr.mxu1 %v5084_v0  ;;  %4912 = vmatmul.mubr.msk.f32.vlgmr.msra.gmra.mxu1 %vm226_vm2, %v4711_v11 }
  0xd8   : > { %v1782_v18 = vsel %vm1781_vm11, %v1774_v17, %v1776_v8  ;;  %4916 = vmatprep.mubr.msk.f32.mxu1 %vm5085_vm0, %v5084_v0 }
  0xd9   : > { %4201 = vrot.lane.b32.xlu1 %v5190_v6, %s5109_s17  ;;  %4372 = vrot.lane.b32.xlu0 %v5168_v1, %s5110_s20  ;;  %v214_v1 = vld [vmem:[%s5697_s2] sm:$0xff] }
  0xda   : > { %4719 = vmatpush1.msk.msra.mxu0 %vm230_vm1, %v1782_v18 }
  0xdb   : > { %v1780_v4 = vpop.permute.xlu1 %1779  ;;  %v1951_v20 = vpop.permute.xlu0 %1950  ;;  %4720 = vmatmul.mubr.msk.f32.vlgmr.msra.gmra.mxu0 %vm226_vm2, %v4717_v19 }
  0xdc   : > { %v1784_v21 = vsel %vm1781_vm11, %v1778_v13, %v1780_v4  ;;  %v1956_v22 = vsel %vm1954_vm12, %v1949_v16, %v1951_v20  ;;  %2031 = vmatprep.mubr.f32.mxu0 %v5084_v0  ;;  %vm4030_vm11 = vcmask 375808  }
  0xdd   : > { %4374 = vrot.lane.b32.xlu1 %v5190_v6, %s5110_s20  ;;  %4368 = vrot.lane.b32.xlu0 %v5170_v2, %s5110_s20  ;;  %v4723_v6 = vld [vmem:[%s5696_s1 + $0x50] sm:$0xff] }
  0xde   : > { %4915 = vmatpush3.msk.msra.mxu1 %vm230_vm1, %v1784_v21  ;;  %4724 = vmatprep.subr.msk.mxu0 %vm230_vm1, %v1956_v22  ;;  %v4765_v21 = vld [vmem:[%s5696_s1 + $0x88] sm:$0xff] }
  0xdf   : > { %v2122_v23 = vpop.permute.xlu1 %2121  ;;  %v1947_v24 = vpop.permute.xlu0 %1946  ;;  %4919 = vmatprep.subr.mxu1 %v5084_v0  ;;  %4917 = vmatmul.mubr.msk.f32.vlgmr.msra.gmra.mxu1 %vm226_vm2, %v4717_v19 }
  0xe0   : > { %v1955_v2 = vsel %vm1954_vm12, %v1947_v24, %v1949_v16  ;;  %4921 = vmatprep.mubr.msk.f32.mxu1 %vm5085_vm0, %v5084_v0 }
  0xe1   : > { %4725 = vmatpush1.msk.msra.mxu0 %vm230_vm1, %v1955_v2  ;;  %217 = vperm.xlu0 %5041, %v214_v1  }
  0xe2   : > { %4726 = vmatmul.mubr.msk.f32.vlgmr.msra.gmra.mxu0 %vm226_vm2, %v4723_v6 }
  0xe3   : > { %v1953_v25 = vpop.permute.xlu1 %1952  ;;  %v2124_v26 = vpop.permute.xlu0 %2123  ;;  %2204 = vmatprep.mubr.f32.mxu0 %v5084_v0 }
  0xe4   : > { %v1957_v27 = vsel %vm1954_vm12, %v1951_v20, %v1953_v25  ;;  %v2129_v28 = vsel %vm2127_vm13, %v2122_v23, %v2124_v26  ;;  %v5464_v29 = vpop.f32.mrf.mxu1  ;;  %vm4203_vm12 = vcmask 367616  }
  0xe5   : > { %4920 = vmatpush3.msk.msra.mxu1 %vm230_vm1, %v1957_v27  ;;  %4730 = vmatprep.subr.msk.mxu0 %vm230_vm1, %v2129_v28 }
  0xe6   : > { %4924 = vmatprep.subr.mxu1 %v5084_v0  ;;  %4922 = vmatmul.mubr.msk.f32.vlgmr.msra.gmra.mxu1 %vm226_vm2, %v4723_v6  ;;  %v4873_v30 = vpop.f32.mrf.mxu1 }
  0xe7   : > { %v2295_v31 = vpop.permute.xlu1 %2294  ;;  %v2120_v32 = vpop.permute.xlu0 %2119  ;;  %4926 = vmatprep.mubr.msk.f32.mxu1 %vm5085_vm0, %v5084_v0 }
  0xe8   : > { %v2128_v34 = vsel %vm2127_vm13, %v2120_v32, %v2122_v23 }
  0xe9   : > { %4731 = vmatpush1.msk.msra.mxu0 %vm230_vm1, %v2128_v34 }
  0xea   : > { %4732 = vmatmul.mubr.msk.f32.vlgmr.msra.gmra.mxu0 %vm226_vm2, %v4729_v33 }
  0xeb   : > { %v2126_v35 = vpop.permute.xlu1 %2125  ;;  %v2297_v36 = vpop.permute.xlu0 %2296  ;;  %2377 = vmatprep.mubr.f32.mxu0 %v5084_v0 }
  0xec   : > { %v2130_v37 = vsel %vm2127_vm13, %v2124_v26, %v2126_v35  ;;  %v2302_v38 = vsel %vm2300_vm14, %v2295_v31, %v2297_v36  ;;  %v4771_v26 = vld [vmem:[%s5696_s1 + $0x90] sm:$0xff]  ;;  %v4777_v35 = vld [vmem:[%s5696_s1 + $0x98] sm:$0xff]  ;;  %vm4376_vm13 = vcmask 359424  }
  0xed   : > { %4925 = vmatpush3.msk.msra.mxu1 %vm230_vm1, %v2130_v37  ;;  %4736 = vmatprep.subr.msk.mxu0 %vm230_vm1, %v2302_v38 }
  0xee   : > { %4929 = vmatprep.subr.mxu1 %v5084_v0  ;;  %4927 = vmatmul.mubr.msk.f32.vlgmr.msra.gmra.mxu1 %vm226_vm2, %v4729_v33 }
  0xef   : > { %v2468_v39 = vpop.permute.xlu1 %2467  ;;  %v2293_v40 = vpop.permute.xlu0 %2292  ;;  %4931 = vmatprep.mubr.msk.f32.mxu1 %vm5085_vm0, %v5084_v0 }
  0xf0   : > { %v2301_v42 = vsel %vm2300_vm14, %v2293_v40, %v2295_v31 }
  0xf1   : > { %4737 = vmatpush1.msk.msra.mxu0 %vm230_vm1, %v2301_v42 }
  0xf2   : > { %4738 = vmatmul.mubr.msk.f32.vlgmr.msra.gmra.mxu0 %vm226_vm2, %v4735_v41 }
  0xf3   : > { %v2299_v43 = vpop.permute.xlu1 %2298  ;;  %v2470_v44 = vpop.permute.xlu0 %2469  ;;  %2550 = vmatprep.mubr.f32.mxu0 %v5084_v0 }
  0xf4   : > { %v2303_v45 = vsel %vm2300_vm14, %v2297_v36, %v2299_v43  ;;  %v2475_v46 = vsel %vm2473_vm15, %v2468_v39, %v2470_v44  ;;  %v4783_v43 = vld [vmem:[%s5696_s1 + $0xa0] sm:$0xff] }
  0xf5   : > { %4930 = vmatpush3.msk.msra.mxu1 %vm230_vm1, %v2303_v45  ;;  %4742 = vmatprep.subr.msk.mxu0 %vm230_vm1, %v2475_v46 }
  0xf6   : > { %4934 = vmatprep.subr.mxu1 %v5084_v0  ;;  %4932 = vmatmul.mubr.msk.f32.vlgmr.msra.gmra.mxu1 %vm226_vm2, %v4735_v41 }
  0xf7   : > { %v2641_v47 = vpop.permute.xlu1 %2640  ;;  %v2466_v48 = vpop.permute.xlu0 %2465  ;;  %4936 = vmatprep.mubr.msk.f32.mxu1 %vm5085_vm0, %v5084_v0 }
  0xf8   : > { %v2474_v50 = vsel %vm2473_vm15, %v2466_v48, %v2468_v39 }
  0xf9   : > { %4743 = vmatpush1.msk.msra.mxu0 %vm230_vm1, %v2474_v50 }
  0xfa   : > { %4744 = vmatmul.mubr.msk.f32.vlgmr.msra.gmra.mxu0 %vm226_vm2, %v4741_v49 }
  0xfb   : > { %v2472_v51 = vpop.permute.xlu1 %2471  ;;  %v2643_v52 = vpop.permute.xlu0 %2642  ;;  %2723 = vmatprep.mubr.f32.mxu0 %v5084_v0 }
  0xfc   : > { %v2476_v53 = vsel %vm2473_vm15, %v2470_v44, %v2472_v51  ;;  %v2648_v54 = vsel %vm2646_vm3, %v2641_v47, %v2643_v52  ;;  %v4789_v51 = vld [vmem:[%s5696_s1 + $0xa8] sm:$0xff] }
  0xfd   : > { %4935 = vmatpush3.msk.msra.mxu1 %vm230_vm1, %v2476_v53  ;;  %4748 = vmatprep.subr.msk.mxu0 %vm230_vm1, %v2648_v54 }
  0xfe   : > { %4939 = vmatprep.subr.mxu1 %v5084_v0  ;;  %4937 = vmatmul.mubr.msk.f32.vlgmr.msra.gmra.mxu1 %vm226_vm2, %v4741_v49 }
  0xff   : > { %v2814_v55 = vpop.permute.xlu1 %2813  ;;  %v2639_v56 = vpop.permute.xlu0 %2638  ;;  %4941 = vmatprep.mubr.msk.f32.mxu1 %vm5085_vm0, %v5084_v0 }
 0x100   : > { %v2647_v58 = vsel %vm2646_vm3, %v2639_v56, %v2641_v47 }
 0x101   : > { %4749 = vmatpush1.msk.msra.mxu0 %vm230_vm1, %v2647_v58 }
 0x102   : > { %4750 = vmatmul.mubr.msk.f32.vlgmr.msra.gmra.mxu0 %vm226_vm2, %v4747_v57 }
 0x103   : > { %v2645_v59 = vpop.permute.xlu1 %2644  ;;  %v2816_v60 = vpop.permute.xlu0 %2815  ;;  %2896 = vmatprep.mubr.f32.mxu0 %v5084_v0 }
 0x104   : > { %v2649_v61 = vsel %vm2646_vm3, %v2643_v52, %v2645_v59  ;;  %v2821_v62 = vsel %vm2819_vm4, %v2814_v55, %v2816_v60  ;;  %v4795_v59 = vld [vmem:[%s5696_s1 + $0xb0] sm:$0xff] }
 0x105   : > { %4940 = vmatpush3.msk.msra.mxu1 %vm230_vm1, %v2649_v61  ;;  %4754 = vmatprep.subr.msk.mxu0 %vm230_vm1, %v2821_v62 }
 0x106   : > { %4944 = vmatprep.subr.mxu1 %v5084_v0  ;;  %4942 = vmatmul.mubr.msk.f32.vlgmr.msra.gmra.mxu1 %vm226_vm2, %v4747_v57 }
 0x107   : > { %v2987_v63 = vpop.permute.xlu1 %2986  ;;  %v2812_v3 = vpop.permute.xlu0 %2811  ;;  %4946 = vmatprep.mubr.msk.f32.mxu1 %vm5085_vm0, %v5084_v0 }
 0x108   : > { %v2820_v7 = vsel %vm2819_vm4, %v2812_v3, %v2814_v55 }
 0x109   : > { %4755 = vmatpush1.msk.msra.mxu0 %vm230_vm1, %v2820_v7 }
 0x10a   : > { %4756 = vmatmul.mubr.msk.f32.vlgmr.msra.gmra.mxu0 %vm226_vm2, %v4753_v5 }
 0x10b   : > { %v2818_v8 = vpop.permute.xlu1 %2817  ;;  %v2989_v9 = vpop.permute.xlu0 %2988  ;;  %3069 = vmatprep.mubr.f32.mxu0 %v5084_v0 }
 0x10c   : > { %v2822_v10 = vsel %vm2819_vm4, %v2816_v60, %v2818_v8  ;;  %v2994_v11 = vsel %vm2992_vm5, %v2987_v63, %v2989_v9  ;;  %v4801_v8 = vld [vmem:[%s5696_s1 + $0xb8] sm:$0xff] }
 0x10d   : > { %4945 = vmatpush3.msk.msra.mxu1 %vm230_vm1, %v2822_v10  ;;  %4760 = vmatprep.subr.msk.mxu0 %vm230_vm1, %v2994_v11 }
 0x10e   : > { %4949 = vmatprep.subr.mxu1 %v5084_v0  ;;  %4947 = vmatmul.mubr.msk.f32.vlgmr.msra.gmra.mxu1 %vm226_vm2, %v4753_v5 }
 0x10f   : > { %v3160_v12 = vpop.permute.xlu1 %3159  ;;  %v2985_v13 = vpop.permute.xlu0 %2984  ;;  %4951 = vmatprep.mubr.msk.f32.mxu1 %vm5085_vm0, %v5084_v0 }
 0x110   : > { %v2993_v15 = vsel %vm2992_vm5, %v2985_v13, %v2987_v63 }
 0x111   : > { %4761 = vmatpush1.msk.msra.mxu0 %vm230_vm1, %v2993_v15 }
 0x112   : > { %4762 = vmatmul.mubr.msk.f32.vlgmr.msra.gmra.mxu0 %vm226_vm2, %v4759_v14 }
 0x113   : > { %v2991_v16 = vpop.permute.xlu1 %2990  ;;  %v3162_v17 = vpop.permute.xlu0 %3161  ;;  %3242 = vmatprep.mubr.f32.mxu0 %v5084_v0 }
 0x114   : > { %v2995_v18 = vsel %vm2992_vm5, %v2989_v9, %v2991_v16  ;;  %v3167_v19 = vsel %vm3165_vm6, %v3160_v12, %v3162_v17  ;;  %v4807_v16 = vld [vmem:[%s5696_s1 + $0xc0] sm:$0xff] }
 0x115   : > { %4950 = vmatpush3.msk.msra.mxu1 %vm230_vm1, %v2995_v18  ;;  %4766 = vmatprep.subr.msk.mxu0 %vm230_vm1, %v3167_v19 }
 0x116   : > { %4952 = vmatmul.mubr.msk.f32.vlgmr.msra.gmra.mxu1 %vm226_vm2, %v4759_v14  ;;  %4954 = vmatprep.subr.mxu1 %v5084_v0 }
 0x117   : > { %v3333_v4 = vpop.permute.xlu1 %3332  ;;  %v3158_v20 = vpop.permute.xlu0 %3157  ;;  %4956 = vmatprep.mubr.msk.f32.mxu1 %vm5085_vm0, %v5084_v0 }
 0x118   : > { %v3166_v22 = vsel %vm3165_vm6, %v3158_v20, %v3160_v12 }
 0x119   : > { %4767 = vmatpush1.msk.msra.mxu0 %vm230_vm1, %v3166_v22 }
 0x11a   : > { %4768 = vmatmul.mubr.msk.f32.vlgmr.msra.gmra.mxu0 %vm226_vm2, %v4765_v21 }
 0x11b   : > { %v3164_v1 = vpop.permute.xlu1 %3163  ;;  %v3335_v23 = vpop.permute.xlu0 %3334  ;;  %3415 = vmatprep.mubr.f32.mxu0 %v5084_v0 }
 0x11c   : > { %v3168_v24 = vsel %vm3165_vm6, %v3162_v17, %v3164_v1  ;;  %v3340_v6 = vsel %vm3338_vm7, %v3333_v4, %v3335_v23 }
 0x11d   : > { %4955 = vmatpush3.msk.msra.mxu1 %vm230_vm1, %v3168_v24  ;;  %4772 = vmatprep.subr.msk.mxu0 %vm230_vm1, %v3340_v6 }
 0x11e   : > { %4957 = vmatmul.mubr.msk.f32.vlgmr.msra.gmra.mxu1 %vm226_vm2, %v4765_v21  ;;  %4959 = vmatprep.subr.mxu1 %v5084_v0 }
 0x11f   : > { %v3506_v2 = vpop.permute.xlu1 %3505  ;;  %v3331_v25 = vpop.permute.xlu0 %3330  ;;  %4961 = vmatprep.mubr.msk.f32.mxu1 %vm5085_vm0, %v5084_v0 }
 0x120   : > { %v3339_v27 = vsel %vm3338_vm7, %v3331_v25, %v3333_v4  ;;  %v5680_v4 = vpop.f32.mrf.mxu0 }
 0x121   : > { %4773 = vmatpush1.msk.msra.mxu0 %vm230_vm1, %v3339_v27 }
 0x122   : > { %4774 = vmatmul.mubr.msk.f32.vlgmr.msra.gmra.mxu0 %vm226_vm2, %v4771_v26  ;;  %v5682_v1 = vpop.f32.mrf.mxu0 }
 0x123   : > { %v3337_v28 = vpop.permute.xlu1 %3336  ;;  %v3508_v30 = vpop.permute.xlu0 %3507  ;;  %3588 = vmatprep.mubr.f32.mxu0 %v5084_v0 }
 0x124   : > { %v3341_v31 = vsel %vm3338_vm7, %v3335_v23, %v3337_v28  ;;  %v3513_v32 = vsel %vm3511_vm8, %v3506_v2, %v3508_v30 }
 0x125   : > { %4960 = vmatpush3.msk.msra.mxu1 %vm230_vm1, %v3341_v31  ;;  %4778 = vmatprep.subr.msk.mxu0 %vm230_vm1, %v3513_v32 }
 0x126   : > { %4962 = vmatmul.mubr.msk.f32.vlgmr.msra.gmra.mxu1 %vm226_vm2, %v4771_v26  ;;  %4964 = vmatprep.subr.mxu1 %v5084_v0 }
 0x127   : > { %v3679_v33 = vpop.permute.xlu1 %3678  ;;  %v3504_v34 = vpop.permute.xlu0 %3503  ;;  %4966 = vmatprep.mubr.msk.f32.mxu1 %vm5085_vm0, %v5084_v0 }
 0x128   : > { %v3512_v36 = vsel %vm3511_vm8, %v3504_v34, %v3506_v2 }
 0x129   : > { %4779 = vmatpush1.msk.msra.mxu0 %vm230_vm1, %v3512_v36 }
 0x12a   : > { %4780 = vmatmul.mubr.msk.f32.vlgmr.msra.gmra.mxu0 %vm226_vm2, %v4777_v35 }
 0x12b   : > { %v3510_v37 = vpop.permute.xlu1 %3509  ;;  %v3681_v38 = vpop.permute.xlu0 %3680  ;;  %3761 = vmatprep.mubr.f32.mxu0 %v5084_v0 }
 0x12c   : > { %v3514_v39 = vsel %vm3511_vm8, %v3508_v30, %v3510_v37  ;;  %v3686_v40 = vsel %vm3684_vm9, %v3679_v33, %v3681_v38 }
 0x12d   : > { %4965 = vmatpush3.msk.msra.mxu1 %vm230_vm1, %v3514_v39  ;;  %4784 = vmatprep.subr.msk.mxu0 %vm230_vm1, %v3686_v40 }
 0x12e   : > { %4967 = vmatmul.mubr.msk.f32.vlgmr.msra.gmra.mxu1 %vm226_vm2, %v4777_v35  ;;  %4969 = vmatprep.subr.mxu1 %v5084_v0 }
 0x12f   : > { %v3852_v41 = vpop.permute.xlu1 %3851  ;;  %v3677_v42 = vpop.permute.xlu0 %3676  ;;  %4971 = vmatprep.mubr.msk.f32.mxu1 %vm5085_vm0, %v5084_v0 }
 0x130   : > { %v3685_v44 = vsel %vm3684_vm9, %v3677_v42, %v3679_v33 }
 0x131   : > { %4785 = vmatpush1.msk.msra.mxu0 %vm230_vm1, %v3685_v44 }
 0x132   : > { %4786 = vmatmul.mubr.msk.f32.vlgmr.msra.gmra.mxu0 %vm226_vm2, %v4783_v43 }
 0x133   : > { %v3683_v45 = vpop.permute.xlu1 %3682  ;;  %v3854_v46 = vpop.permute.xlu0 %3853  ;;  %3934 = vmatprep.mubr.f32.mxu0 %v5084_v0 }
 0x134   : > { %v3687_v47 = vsel %vm3684_vm9, %v3681_v38, %v3683_v45  ;;  %v3859_v48 = vsel %vm3857_vm10, %v3852_v41, %v3854_v46 }
 0x135   : > { %4970 = vmatpush3.msk.msra.mxu1 %vm230_vm1, %v3687_v47  ;;  %4790 = vmatprep.subr.msk.mxu0 %vm230_vm1, %v3859_v48 }
 0x136   : > { %4972 = vmatmul.mubr.msk.f32.vlgmr.msra.gmra.mxu1 %vm226_vm2, %v4783_v43  ;;  %4974 = vmatprep.subr.mxu1 %v5084_v0 }
 0x137   : > { %v4025_v49 = vpop.permute.xlu1 %4024  ;;  %v3850_v50 = vpop.permute.xlu0 %3849  ;;  %4976 = vmatprep.mubr.msk.f32.mxu1 %vm5085_vm0, %v5084_v0 }
 0x138   : > { %v3858_v52 = vsel %vm3857_vm10, %v3850_v50, %v3852_v41 }
 0x139   : > { %4791 = vmatpush1.msk.msra.mxu0 %vm230_vm1, %v3858_v52 }
 0x13a   : > { %4792 = vmatmul.mubr.msk.f32.vlgmr.msra.gmra.mxu0 %vm226_vm2, %v4789_v51 }
 0x13b   : > { %v3856_v53 = vpop.permute.xlu1 %3855  ;;  %v4027_v54 = vpop.permute.xlu0 %4026  ;;  %4107 = vmatprep.mubr.f32.mxu0 %v5084_v0 }
 0x13c   : > { %v3860_v55 = vsel %vm3857_vm10, %v3854_v46, %v3856_v53  ;;  %v4032_v56 = vsel %vm4030_vm11, %v4025_v49, %v4027_v54 }
 0x13d   : > { %4975 = vmatpush3.msk.msra.mxu1 %vm230_vm1, %v3860_v55  ;;  %4796 = vmatprep.subr.msk.mxu0 %vm230_vm1, %v4032_v56 }
 0x13e   : > { %4977 = vmatmul.mubr.msk.f32.vlgmr.msra.gmra.mxu1 %vm226_vm2, %v4789_v51  ;;  %4979 = vmatprep.subr.mxu1 %v5084_v0 }
 0x13f   : > { %v4198_v57 = vpop.permute.xlu1 %4197  ;;  %v4023_v58 = vpop.permute.xlu0 %4022  ;;  %4981 = vmatprep.mubr.msk.f32.mxu1 %vm5085_vm0, %v5084_v0 }
 0x140   : > { %v4031_v60 = vsel %vm4030_vm11, %v4023_v58, %v4025_v49 }
 0x141   : > { %4797 = vmatpush1.msk.msra.mxu0 %vm230_vm1, %v4031_v60 }
 0x142   : > { %4798 = vmatmul.mubr.msk.f32.vlgmr.msra.gmra.mxu0 %vm226_vm2, %v4795_v59 }
 0x143   : > { %v4029_v61 = vpop.permute.xlu1 %4028  ;;  %v4200_v62 = vpop.permute.xlu0 %4199  ;;  %4280 = vmatprep.mubr.f32.mxu0 %v5084_v0 }
 0x144   : > { %v4033_v63 = vsel %vm4030_vm11, %v4027_v54, %v4029_v61  ;;  %v4205_v3 = vsel %vm4203_vm12, %v4198_v57, %v4200_v62 }
 0x145   : > { %4980 = vmatpush3.msk.msra.mxu1 %vm230_vm1, %v4033_v63  ;;  %4802 = vmatprep.subr.msk.mxu0 %vm230_vm1, %v4205_v3 }
 0x146   : > { %4982 = vmatmul.mubr.msk.f32.vlgmr.msra.gmra.mxu1 %vm226_vm2, %v4795_v59  ;;  %4984 = vmatprep.subr.mxu1 %v5084_v0 }
 0x147   : > { %v4371_v5 = vpop.permute.xlu1 %4370  ;;  %v4196_v7 = vpop.permute.xlu0 %4195  ;;  %4986 = vmatprep.mubr.msk.f32.mxu1 %vm5085_vm0, %v5084_v0 }
 0x148   : > { %v4204_v9 = vsel %vm4203_vm12, %v4196_v7, %v4198_v57 }
 0x149   : > { %4803 = vmatpush1.msk.msra.mxu0 %vm230_vm1, %v4204_v9 }
 0x14a   : > { %4804 = vmatmul.mubr.msk.f32.vlgmr.msra.gmra.mxu0 %vm226_vm2, %v4801_v8 }
 0x14b   : > { %v4202_v10 = vpop.permute.xlu1 %4201  ;;  %v4373_v11 = vpop.permute.xlu0 %4372  ;;  %4453 = vmatprep.mubr.f32.mxu0 %v5084_v0 }
 0x14c   : > { %v4206_v12 = vsel %vm4203_vm12, %v4200_v62, %v4202_v10  ;;  %v4378_v13 = vsel %vm4376_vm13, %v4371_v5, %v4373_v11 }
 0x14d   : > { %4985 = vmatpush3.msk.msra.mxu1 %vm230_vm1, %v4206_v12  ;;  %4808 = vmatprep.subr.msk.mxu0 %vm230_vm1, %v4378_v13 }
 0x14e   : > { %4987 = vmatmul.mubr.msk.f32.vlgmr.msra.gmra.mxu1 %vm226_vm2, %v4801_v8  ;;  %4989 = vmatprep.subr.mxu1 %v5084_v0 }
 0x14f   : > { %v4375_v14 = vpop.permute.xlu1 %4374  ;;  %v4369_v15 = vpop.permute.xlu0 %4368  ;;  %4991 = vmatprep.mubr.msk.f32.mxu1 %vm5085_vm0, %v5084_v0 }
 0x150   : > { %v4379_v17 = vsel %vm4376_vm13, %v4373_v11, %v4375_v14  ;;  %v4377_v18 = vsel %vm4376_vm13, %v4369_v15, %v4371_v5 }
 0x151   : > { %4809 = vmatpush1.msk.msra.mxu0 %vm230_vm1, %v4377_v18  ;;  %4990 = vmatpush3.msk.msra.mxu1 %vm230_vm1, %v4379_v17 }
 0x152   : > { %4810 = vmatmul.mubr.msk.f32.vlgmr.msra.gmra.mxu0 %vm226_vm2, %v4807_v16  ;;  %4992 = vmatmul.mubr.msk.f32.vlgmr.msra.gmra.mxu1 %vm226_vm2, %v4807_v16 }
 0x15c   : > { %v5676_v19 = vpop.permute.xlu0 %217 }
 0x15d   : > { %v380_v0 = vadd.f32 %v5464_v29, %v5676_v19 }
 0x160   : > { %v476_v2 = vpop.f32.mrf.mxu0 }
 0x162   : > { %v547_v20 = vpop.f32.mrf.mxu1  ;;  %v478_v25 = vpop.f32.mrf.mxu0 }
 0x163   : > { %v553_v22 = vadd.f32 %v547_v20, %v380_v0  ;;  %v378_v20 = vadd.f32 %v5680_v4, %v5676_v19 }
 0x164   : > { %v4878_v21 = vpop.f32.mrf.mxu1  ;;  %v649_v30 = vpop.f32.mrf.mxu0 }
 0x166   : > { %v651_v31 = vpop.f32.mrf.mxu0 }
 0x167   : > { %v720_v23 = vpop.f32.mrf.mxu1 }
 0x168   : > { %v726_v24 = vadd.f32 %v720_v23, %v553_v22  ;;  %v551_v23 = vadd.f32 %v476_v2, %v378_v20 }
 0x169   : > { %v4883_v6 = vpop.f32.mrf.mxu1 }
 0x16b   : > { %v822_v34 = vpop.f32.mrf.mxu0 }
 0x16d   : > { %v824_v35 = vpop.f32.mrf.mxu0 }
 0x16f   : > { %v893_v26 = vpop.f32.mrf.mxu1 }
 0x170   : > { %v899_v27 = vadd.f32 %v893_v26, %v726_v24  ;;  %v379_v24 = vadd.f32 %v5682_v1, %v5676_v19 }
 0x171   : > { %v4888_v28 = vpop.f32.mrf.mxu1 }
 0x172   : > { %v552_v28 = vadd.f32 %v478_v25, %v379_v24 }
 0x173   : > { %v995_v39 = vpop.f32.mrf.mxu0 }
 0x175   : > { %v997_v40 = vpop.f32.mrf.mxu0 }
 0x177   : > { %v1066_v32 = vpop.f32.mrf.mxu1 }
 0x178   : > { %v1072_v33 = vadd.f32 %v1066_v32, %v899_v27  ;;  %v724_v27 = vadd.f32 %v649_v30, %v551_v23 }
 0x179   : > { %v4893_v29 = vpop.f32.mrf.mxu1 }
 0x17a   : > { %v897_v29 = vadd.f32 %v822_v34, %v724_v27 }
 0x17b   : > { %v1168_v44 = vpop.f32.mrf.mxu0 }
 0x17d   : > { %v1170_v45 = vpop.f32.mrf.mxu0 }
 0x17f   : > { %v1239_v36 = vpop.f32.mrf.mxu1 }
 0x180   : > { %v1245_v37 = vadd.f32 %v1239_v36, %v1072_v33  ;;  %v725_v36 = vadd.f32 %v651_v31, %v552_v28 }
 0x181   : > { %v4898_v38 = vpop.f32.mrf.mxu1 }
 0x183   : > { %v1341_v49 = vpop.f32.mrf.mxu0 }
 0x185   : > { %v1343_v50 = vpop.f32.mrf.mxu0 }
 0x187   : > { %v1412_v41 = vpop.f32.mrf.mxu1 }
 0x188   : > { %v1418_v42 = vadd.f32 %v1412_v41, %v1245_v37  ;;  %v1070_v41 = vadd.f32 %v995_v39, %v897_v29 }
 0x189   : > { %v4903_v43 = vpop.f32.mrf.mxu1 }
 0x18b   : > { %v1514_v54 = vpop.f32.mrf.mxu0 }
 0x18d   : > { %v1516_v55 = vpop.f32.mrf.mxu0 }
 0x18f   : > { %v1585_v46 = vpop.f32.mrf.mxu1 }
 0x190   : > { %v1591_v47 = vadd.f32 %v1585_v46, %v1418_v42  ;;  %v898_v42 = vadd.f32 %v824_v35, %v725_v36  ;;  %v1243_v46 = vadd.f32 %v1168_v44, %v1070_v41 }
 0x191   : > { %v4908_v48 = vpop.f32.mrf.mxu1 }
 0x193   : > { %v1687_v59 = vpop.f32.mrf.mxu0 }
 0x195   : > { %v1689_v60 = vpop.f32.mrf.mxu0 }
 0x197   : > { %v1758_v51 = vpop.f32.mrf.mxu1 }
 0x198   : > { %v1764_v52 = vadd.f32 %v1758_v51, %v1591_v47  ;;  %v1071_v47 = vadd.f32 %v997_v40, %v898_v42  ;;  %v1416_v51 = vadd.f32 %v1341_v49, %v1243_v46 }
 0x199   : > { %v4913_v53 = vpop.f32.mrf.mxu1 }
 0x19a   : > { %v1244_v19 = vadd.f32 %v1170_v45, %v1071_v47  ;;  %v1589_v30 = vadd.f32 %v1514_v54, %v1416_v51 }
 0x19b   : > { %v1860_v3 = vpop.f32.mrf.mxu0 }
 0x19c   : > { %v1417_v25 = vadd.f32 %v1343_v50, %v1244_v19  ;;  %v1762_v34 = vadd.f32 %v1687_v59, %v1589_v30 }
 0x19d   : > { %v1862_v5 = vpop.f32.mrf.mxu0 }
 0x19e   : > { %v1590_v31 = vadd.f32 %v1516_v55, %v1417_v25  ;;  %v1935_v39 = vadd.f32 %v1860_v3, %v1762_v34 }
 0x19f   : > { %v1931_v56 = vpop.f32.mrf.mxu1 }
 0x1a0   : > { %v1937_v57 = vadd.f32 %v1931_v56, %v1764_v52  ;;  %v1763_v35 = vadd.f32 %v1689_v60, %v1590_v31 }
 0x1a1   : > { %v4918_v58 = vpop.f32.mrf.mxu1 }
 0x1a2   : > { %v2033_v10 = vpop.f32.mrf.mxu0  ;;  %v1936_v40 = vadd.f32 %v1862_v5, %v1763_v35 }
 0x1a3   : > { %v2108_v44 = vadd.f32 %v2033_v10, %v1935_v39 }
 0x1a4   : > { %v2035_v11 = vpop.f32.mrf.mxu0 }
 0x1a6   : > { %v2104_v61 = vpop.f32.mrf.mxu1 }
 0x1a7   : > { %v2110_v62 = vadd.f32 %v2104_v61, %v1937_v57 }
 0x1a8   : > { %v4923_v63 = vpop.f32.mrf.mxu1 }
 0x1aa   : > { %v2206_v15 = vpop.f32.mrf.mxu0 }
 0x1ab   : > { %v2281_v45 = vadd.f32 %v2206_v15, %v2108_v44  ;;  %v4543_v44 = vstv %s4663_s6 }
 0x1ac   : > { %v2208_v16 = vpop.f32.mrf.mxu0 }
 0x1ae   : > { %v2277_v7 = vpop.f32.mrf.mxu1 }
 0x1af   : > { %v2283_v8 = vadd.f32 %v2277_v7, %v2110_v62 }
 0x1b0   : > { %v4928_v9 = vpop.f32.mrf.mxu1 }
 0x1b2   : > { %v2379_v0 = vpop.f32.mrf.mxu0 }
 0x1b3   : > { %v2454_v50 = vadd.f32 %v2379_v0, %v2281_v45 }
 0x1b4   : > { %v2381_v21 = vpop.f32.mrf.mxu0 }
 0x1b6   : > { %v2450_v12 = vpop.f32.mrf.mxu1 }
 0x1b7   : > { %v2456_v13 = vadd.f32 %v2450_v12, %v2283_v8  ;;  %v2109_v8 = vadd.f32 %v2035_v11, %v1936_v40 }
 0x1b8   : > { %v4933_v14 = vpop.f32.mrf.mxu1 }
 0x1b9   : > { %v2282_v12 = vadd.f32 %v2208_v16, %v2109_v8 }
 0x1ba   : > { %v2552_v26 = vpop.f32.mrf.mxu0 }
 0x1bb   : > { %v2627_v55 = vadd.f32 %v2552_v26, %v2454_v50  ;;  %v2455_v20 = vadd.f32 %v2381_v21, %v2282_v12 }
 0x1bc   : > { %v2554_v32 = vpop.f32.mrf.mxu0 }
 0x1bd   : > { %v2628_v5 = vadd.f32 %v2554_v32, %v2455_v20 }
 0x1be   : > { %v2623_v17 = vpop.f32.mrf.mxu1 }
 0x1c0   : > { %v4938_v18 = vpop.f32.mrf.mxu1 }
 0x1c1   : > { %v2629_v18 = vadd.f32 %v2623_v17, %v2456_v13 }
 0x1c2   : > { %v2725_v38 = vpop.f32.mrf.mxu0 }
 0x1c3   : > { %v2800_v24 = vadd.f32 %v2725_v38, %v2627_v55 }
 0x1c4   : > { %v2727_v43 = vpop.f32.mrf.mxu0 }
 0x1c5   : > { %v2801_v11 = vadd.f32 %v2727_v43, %v2628_v5 }
 0x1c6   : > { %v2796_v22 = vpop.f32.mrf.mxu1 }
 0x1c7   : > { %v2802_v10 = vadd.f32 %v2796_v22, %v2629_v18 }
 0x1c8   : > { %v4943_v6 = vpop.f32.mrf.mxu1 }
 0x1ca   : > { %v2898_v48 = vpop.f32.mrf.mxu0 }
 0x1cb   : > { %v2973_v28 = vadd.f32 %v2898_v48, %v2800_v24 }
 0x1cc   : > { %v2900_v1 = vpop.f32.mrf.mxu0 }
 0x1ce   : > { %v2969_v33 = vpop.f32.mrf.mxu1 }
 0x1cf   : > { %v2975_v15 = vadd.f32 %v2969_v33, %v2802_v10 }
 0x1d0   : > { %v4948_v37 = vpop.f32.mrf.mxu1 }
 0x1d1   : > { %v2974_v37 = vadd.f32 %v2900_v1, %v2801_v11 }
 0x1d2   : > { %v3071_v56 = vpop.f32.mrf.mxu0 }
 0x1d3   : > { %v3146_v0 = vadd.f32 %v3071_v56, %v2973_v28 }
 0x1d4   : > { %v3073_v57 = vpop.f32.mrf.mxu0 }
 0x1d5   : > { %v3147_v17 = vadd.f32 %v3073_v57, %v2974_v37 }
 0x1d6   : > { %v3142_v4 = vpop.f32.mrf.mxu1 }
 0x1d7   : > { %v3148_v16 = vadd.f32 %v3142_v4, %v2975_v15 }
 0x1d8   : > { %v4953_v2 = vpop.f32.mrf.mxu1 }
 0x1da   : > { %v3244_v61 = vpop.f32.mrf.mxu0 }
 0x1db   : > { %v3319_v26 = vadd.f32 %v3244_v61, %v3146_v0 }
 0x1dc   : > { %v3246_v63 = vpop.f32.mrf.mxu0 }
 0x1dd   : > { %v3320_v22 = vadd.f32 %v3246_v63, %v3147_v17 }
 0x1de   : > { %v3315_v52 = vpop.f32.mrf.mxu1 }
 0x1df   : > { %v3321_v13 = vadd.f32 %v3315_v52, %v3148_v16 }
 0x1e0   : > { %v4958_v53 = vpop.f32.mrf.mxu1 }
 0x1e2   : > { %v3417_v7 = vpop.f32.mrf.mxu0 }
 0x1e3   : > { %v3492_v46 = vadd.f32 %v3417_v7, %v3319_v26 }
 0x1e4   : > { %v3419_v54 = vpop.f32.mrf.mxu0 }
 0x1e5   : > { %v3493_v33 = vadd.f32 %v3419_v54, %v3320_v22 }
 0x1e6   : > { %v3488_v58 = vpop.f32.mrf.mxu1 }
 0x1e7   : > { %v3494_v38 = vadd.f32 %v3488_v58, %v3321_v13 }
 0x1e8   : > { %v4963_v62 = vpop.f32.mrf.mxu1 }
 0x1e9   : > { %v4536_v62 = vstv %s212_s5 }
 0x1ea   : > { %v3590_v14 = vpop.f32.mrf.mxu0 }
 0x1eb   : > { %v3665_v47 = vadd.f32 %v3590_v14, %v3492_v46 }
 0x1ec   : > { %v3592_v3 = vpop.f32.mrf.mxu0 }
 0x1ed   : > { %v3666_v4 = vadd.f32 %v3592_v3, %v3493_v33 }
 0x1ee   : > { %v3661_v49 = vpop.f32.mrf.mxu1 }
 0x1ef   : > { %v3667_v2 = vadd.f32 %v3661_v49, %v3494_v38 }
 0x1f0   : > { %v4968_v9 = vpop.f32.mrf.mxu1 }
 0x1f2   : > { %v3763_v23 = vpop.f32.mrf.mxu0 }
 0x1f3   : > { %v3838_v48 = vadd.f32 %v3763_v23, %v3665_v47 }
 0x1f4   : > { %v3765_v6 = vpop.f32.mrf.mxu0 }
 0x1f5   : > { %v3839_v52 = vadd.f32 %v3765_v6, %v3666_v4 }
 0x1f6   : > { %v3834_v59 = vpop.f32.mrf.mxu1 }
 0x1f7   : > { %v3840_v51 = vadd.f32 %v3834_v59, %v3667_v2 }
 0x1f8   : > { %v4973_v60 = vpop.f32.mrf.mxu1 }
 0x1fa   : > { %v3936_v29 = vpop.f32.mrf.mxu0 }
 0x1fb   : > { %v4011_v1 = vadd.f32 %v3936_v29, %v3838_v48 }
 0x1fc   : > { %v3938_v41 = vpop.f32.mrf.mxu0 }
 0x1fd   : > { %v4012_v34 = vadd.f32 %v3938_v41, %v3839_v52 }
 0x1fe   : > { %v4007_v27 = vpop.f32.mrf.mxu1 }
 0x1ff   : > { %v4013_v30 = vadd.f32 %v4007_v27, %v3840_v51 }
 0x200   : > { %v4978_v36 = vpop.f32.mrf.mxu1 }
 0x202   : > { %v4109_v21 = vpop.f32.mrf.mxu0 }
 0x203   : > { %v4184_v53 = vadd.f32 %v4109_v21, %v4011_v1 }
 0x204   : > { %v4111_v43 = vpop.f32.mrf.mxu0 }
 0x205   : > { %v4185_v35 = vadd.f32 %v4111_v43, %v4012_v34 }
 0x206   : > { %v4180_v42 = vpop.f32.mrf.mxu1 }
 0x207   : > { %v4186_v56 = vadd.f32 %v4180_v42, %v4013_v30 }
 0x208   : > { %v4983_v32 = vpop.f32.mrf.mxu1 }
 0x20a   : > { %v4282_v19 = vpop.f32.mrf.mxu0 }
 0x20b   : > { %v4357_v58 = vadd.f32 %v4282_v19, %v4184_v53 }
 0x20c   : > { %v4284_v31 = vpop.f32.mrf.mxu0 }
 0x20d   : > { %v4358_v49 = vadd.f32 %v4284_v31, %v4185_v35 }
 0x20e   : > { %v4353_v25 = vpop.f32.mrf.mxu1 }
 0x20f   : > { %v4359_v39 = vadd.f32 %v4353_v25, %v4186_v56 }
 0x210   : > { %v4988_v57 = vpop.f32.mrf.mxu1 }
 0x212   : > { %v4455_v61 = vpop.f32.mrf.mxu0  ;;  %v4526_v40 = vpop.f32.mrf.mxu1 }
 0x213   : > { %v4530_v63 = vadd.f32 %v4455_v61, %v4357_v58  ;;  %v4532_v7 = vadd.f32 %v4526_v40, %v4359_v39 }
 0x214   : > { %v4457_v45 = vpop.f32.mrf.mxu0  ;;  %v4993_v8 = vpop.f32.mrf.mxu1 }
 0x215   : > { %vm4533_vm0 = vcmp.ge.f32.partialorder %v4530_v63, 0.0  ;;  %v4537_v9 = vmul.f32 %v4536_v62, %v4530_v63  ;;  %v4544_v54 = vmul.f32 %v4543_v44, %v4530_v63  ;;  %vm4535_vm1 = vcmp.ge.f32.partialorder %v4532_v7, 0.0 }
 0x216   : > { %v4539_v50 = vmul.f32 %v4536_v62, %v4532_v7  ;;  %v4546_v12 = vmul.f32 %v4543_v44, %v4532_v7  ;;  %v4531_v14 = vadd.f32 %v4457_v45, %v4358_v49 }
 0x217   : > { %v4547_v59 = vsel %vm4533_vm0, %v4530_v63, %v4544_v54  ;;  %v4540_v20 = vsel %vm4533_vm0, %v4530_v63, %v4537_v9 }
 0x218   : > { %v4553_v55 = vrot.slane %v4547_v59, 4  ;;  %v4549_v18 = vsel %vm4535_vm1, %v4532_v7, %v4546_v12  ;;  %vm4534_vm2 = vcmp.ge.f32.partialorder %v4531_v14, 0.0  ;;  %v4538_v60 = vmul.f32 %v4536_v62, %v4531_v14 }
 0x219   : > { %v4555_v3 = vrot.slane %v4549_v18, 4  ;;  %v4545_v23 = vmul.f32 %v4543_v44, %v4531_v14  ;;  %v4542_v10 = vsel %vm4535_vm1, %v4532_v7, %v4539_v50 }
 0x21a   : > { %v4559_v24 = vsub.f32 %v4540_v20, %v4553_v55  ;;  %v4541_v11 = vsel %vm4534_vm2, %v4531_v14, %v4538_v60 }
 0x21b   : > { %v4561_v5 = vsub.f32 %v4542_v10, %v4555_v3  ;;  %v4548_v6 = vsel %vm4534_vm2, %v4531_v14, %v4545_v23 }
 0x21c   : > { %v4813_v27 = vmul.f32 -1.442695, %v4559_v24  ;;  %v4554_v28 = vrot.slane %v4548_v6, 4 }
 0x21d   : > { %v4815_v15 = vmul.f32 -1.442695, %v4561_v5 }
 0x21e   : > { %5044 = vpow2.f32 %v4813_v27  ;;  %v4560_v29 = vsub.f32 %v4541_v11, %v4554_v28 }
 0x21f   : > { %5046 = vpow2.f32 %v4815_v15 }
 0x220   : > { %v4814_v36 = vmul.f32 -1.442695, %v4560_v29 }
 0x222   : > { %5048 = vpow2.f32 %v4814_v36 }
 0x22b   : > { %v5045_v0 = vpop.eup %5044 }
 0x22c   : > { %v5047_v16 = vpop.eup %5046  ;;  %v4571_v37 = vadd.f32 1.0, %v5045_v0 }
 0x22d   : > { %v4573_v41 = vadd.f32 1.0, %v5047_v16 }
 0x22f   : > { %v5049_v26 = vpop.eup %5048  ;;  %5050 = vrcp.f32 %v4573_v41 }
 0x230   : > { %v4572_v13 = vadd.f32 1.0, %v5049_v26  ;;  %5052 = vrcp.f32 %v4571_v37 }
 0x232   : > { %5054 = vrcp.f32 %v4572_v13 }
 0x23c   : > { %v5051_v17 = vpop.eup %5050 }
 0x23d   : > { %4585 = vst [vmem:[%s211_s10 + $0x8] sm:$0xf] %v5051_v17  ;;  %v5053_v21 = vpop.eup %5052 }
 0x23f   : > { %v5055_v42 = vpop.eup %5054 }
 0x240   : > { %v4582_v46 = vcombine.low %v5053_v21, %v5055_v42 }
 0x242   : > { %4584 = vst [vmem:[%s211_s10] sm:$0xff] %v4582_v46 }
 0x243 PF: > { %s15_s15 = sadd.s32 1, %s5081_s15  }
 0x244   : > { %p12_p1 = scmp.ge.s32.totalorder %s15_s15, 4  }
 0x246   :  { %14 = sbr.rel (!%p12_p1) target bundleno = 1 (0x1), region = 95 }
 0x24b   :  { %4607 = vsyncpa [#allocation3], 1 }
 0x24c   :  { %4609 = vsyncpa [#allocation3 + $0x1], 1 }

</bundles_post_ra>
